<compile_context>
chip_gen: v6e
topology: v6e:2x2x1
jax: 0.10.0
libtpu: 0.0.40
codegen_flags: <defaults>
</compile_context>

<pallas_src>
import math

import numpy as np
import jax
import jax.numpy as jnp
from jax.experimental import pallas as pl
from jax.experimental.pallas import tpu as pltpu

# ----------------------------- module constants -----------------------------
NUM_IMGS = 12
NUM_ANGLES = 120
N_CLASSES = 12
TRM_LAYER = 2
TRM_NEIGHBOR = 1
HEATMAP_OFFSET = 5

# Downscaled synthetic sizes (structure identical to the PyTorch module).
HIDDEN = 128                       # stands in for 768
NUM_HEADS = 2                      # stands in for 12 (head_dim = 64, same as 768/12)
HEAD_DIM = HIDDEN // NUM_HEADS
INTERMEDIATE = 4 * HIDDEN          # BertConfig default intermediate_size = 4 * hidden
C_RGB, H_RGB, W_RGB = 32, 7, 7     # stands in for (2048, 7, 7)
C_DEP, H_DEP, W_DEP = 8, 4, 4      # stands in for (128, 4, 4)
RGB_FLAT = C_RGB * H_RGB * W_RGB   # 1568
RGB_PAD = pl.cdiv(RGB_FLAT, 128) * 128   # 1664 = 13*128 (lane-dense K)
DEP_FLAT = C_DEP * H_DEP * W_DEP   # 128 (already lane dense)
CLS_OUT = int(N_CLASSES * (NUM_ANGLES / NUM_IMGS))   # 120
CLS_PAD = 128                      # lane-dense output store; sliced back to 120 in the wrapper
LN_EPS = 1e-12                     # BertConfig default layer_norm_eps

# ----------------- packed-weight slab layout (row offsets) ------------------
# Slab A: all bf16 weights whose output dim is HIDDEN, stacked along rows (K axis).
OFF_W_RGB = 0
OFF_W_DEP = OFF_W_RGB + RGB_PAD            # 1664
OFF_W_MRG = OFF_W_DEP + HIDDEN             # 1792
OFF_W_C1 = OFF_W_MRG + 2 * HIDDEN          # 2048
OFF_W_C2 = OFF_W_C1 + HIDDEN               # 2176
OFF_LAYER0 = OFF_W_C2 + HIDDEN             # 2304
ROWS_PER_LAYER_A = HIDDEN + INTERMEDIATE   # wo (128) + w_ff (512)
A_ROWS = OFF_LAYER0 + ROWS_PER_LAYER_A * TRM_LAYER   # 3584 (all offsets multiples of 16)

# f32 parameter slab: one row per bias / LayerNorm vector, width = INTERMEDIATE (512).
ROW_B_RGB, ROW_B_DEP, ROW_B_MRG, ROW_B_C1, ROW_B_C2 = 0, 1, 2, 3, 4
ROW_LAYER0 = 5
ROWS_PER_LAYER_PF = 10   # bq, bk, bv, bo, ln1_g, ln1_b, b_int, b_ff, ln2_g, ln2_b
PF_ROWS = ROW_LAYER0 + ROWS_PER_LAYER_PF * TRM_LAYER  # 25


# ----------------------------- attention mask -------------------------------
def get_attention_mask(num_imgs=12, neighbor=1):
    # Replicates VLN-CE waypoint_prediction.utils.get_attention_mask
    mask = np.zeros((num_imgs, num_imgs), dtype=np.float32)
    t = np.zeros(num_imgs, dtype=np.float32)
    t[: neighbor + 1] = 1.0
    if neighbor != 0:
        t[-neighbor:] = 1.0
    for ri in range(num_imgs):
        mask[ri] = t
        t = np.roll(t, 1)
    return mask


def _neighbor_mask_bias():
    # (12, 12) additive bias, same -10000 masking WaypointBert applies in-block.
    m = get_attention_mask(NUM_IMGS, TRM_NEIGHBOR)
    return jnp.asarray((1.0 - m) * -10000.0, jnp.float32)


# --------------------------- exact-erf GELU (BERT) ---------------------------
def _erf(x):
    # Abramowitz & Stegun 7.1.26 polynomial, |error| < 1.5e-7.  Uses only exp/mul/add/where
    # so it lowers on every Mosaic version (no dependence on an erf lowering rule).
    a1, a2, a3, a4, a5 = 0.254829592, -0.284496736, 1.421413741, -1.453152027, 1.061405429
    p = 0.3275911
    ax = jnp.abs(x)
    t = 1.0 / (1.0 + p * ax)
    poly = ((((a5 * t + a4) * t + a3) * t + a2) * t + a1) * t
    y = 1.0 - poly * jnp.exp(-ax * ax)
    return jnp.where(x >= 0.0, y, -y)


def _gelu(x):
    # Exact BERT gelu: x * 0.5 * (1 + erf(x / sqrt(2)))  (to ~1e-7 via the polynomial above).
    return 0.5 * x * (1.0 + _erf(x * (1.0 / math.sqrt(2.0))))


def _layer_norm(x, g, b, eps=LN_EPS):
    mu = jnp.mean(x, axis=-1, keepdims=True)
    xc = x - mu
    var = jnp.mean(xc * xc, axis=-1, keepdims=True)
    return xc * jax.lax.rsqrt(var + eps) * g + b


# ----------------------------- fused forward kernel --------------------------
def _fused_kernel(rgb_ref, dep_ref, mask_ref, wA_ref, wqkv_ref, wint_ref, pf_ref, out_ref):
    # One grid step == one batch item (12 tokens).  All weights are VMEM-resident slabs.

    def pvec(row, width=HIDDEN):
        return pf_ref[row:row + 1, :width]          # (1, width) f32, static slice

    mask_bias = mask_ref[...]                       # (12, 12) f32

    # visual_fc_rgb / visual_fc_depth: Flatten + Linear + ReLU.
    x_rgb = jnp.maximum(
        jnp.dot(rgb_ref[...].astype(jnp.bfloat16),
                wA_ref[OFF_W_RGB:OFF_W_RGB + RGB_PAD, :],
                preferred_element_type=jnp.float32) + pvec(ROW_B_RGB), 0.0)
    x_dep = jnp.maximum(
        jnp.dot(dep_ref[...].astype(jnp.bfloat16),
                wA_ref[OFF_W_DEP:OFF_W_DEP + HIDDEN, :],
                preferred_element_type=jnp.float32) + pvec(ROW_B_DEP), 0.0)

    # visual_merge: single K=256 matmul on the lane-concatenated [rgb | depth] activations.
    xm = jnp.concatenate([x_rgb, x_dep], axis=-1).astype(jnp.bfloat16)      # (12, 256)
    h = jnp.maximum(
        jnp.dot(xm, wA_ref[OFF_W_MRG:OFF_W_MRG + 2 * HIDDEN, :],
                preferred_element_type=jnp.float32) + pvec(ROW_B_MRG), 0.0)

    # WaypointBert: 2 post-LN BERT layers (dropout = identity at eval).
    scale = 1.0 / math.sqrt(HEAD_DIM)
    for l in range(TRM_LAYER):
        base = ROW_LAYER0 + l * ROWS_PER_LAYER_PF
        off_wo = OFF_LAYER0 + l * ROWS_PER_LAYER_A
        off_ff = off_wo + HIDDEN

        hb = h.astype(jnp.bfloat16)
        # Fused Q|K|V projection: one (12,128)@(128,384) matmul.
        qkv = jnp.dot(hb, wqkv_ref[l], preferred_element_type=jnp.float32)   # (12, 384) f32
        qb = ((qkv[:, 0 * HIDDEN:1 * HIDDEN] + pvec(base + 0)) * scale).astype(jnp.bfloat16)
        kb = (qkv[:, 1 * HIDDEN:2 * HIDDEN] + pvec(base + 1)).astype(jnp.bfloat16)
        vb = (qkv[:, 2 * HIDDEN:3 * HIDDEN] + pvec(base + 2)).astype(jnp.bfloat16)

        # Per-head attention; output projection accumulated per head (no ctx scratch).
        attn = pvec(base + 3)                        # bo, broadcasts to (12, 128)
        for hd in range(NUM_HEADS):
            lo = hd * HEAD_DIM
            qh = qb[:, lo:lo + HEAD_DIM]
            kh = kb[:, lo:lo + HEAD_DIM]
            vh = vb[:, lo:lo + HEAD_DIM]
            # q @ k^T via dot_general contracting last dims (no explicit transpose).
            s = jax.lax.dot_general(qh, kh, (((1,), (1,)), ((), ())),
                                    preferred_element_type=jnp.float32) + mask_bias
            s = s - jnp.max(s, axis=-1, keepdims=True)
            p = jnp.exp(s)                           # f32 softmax (mask underflow -> exact 0)
            p = p * pl.reciprocal(jnp.sum(p, axis=-1, keepdims=True), approx=True)
            ctx = jnp.dot(p.astype(jnp.bfloat16), vh, preferred_element_type=jnp.float32)
            attn = attn + jnp.dot(ctx.astype(jnp.bfloat16),
                                  wA_ref[off_wo + lo:off_wo + lo + HEAD_DIM, :],
                                  preferred_element_type=jnp.float32)

        h1 = _layer_norm(attn + h, pvec(base + 4), pvec(base + 5))          # BertSelfOutput
        ff = _gelu(jnp.dot(h1.astype(jnp.bfloat16), wint_ref[l],
                           preferred_element_type=jnp.float32)
                   + pvec(base + 6, INTERMEDIATE))                          # BertIntermediate
        ff2 = jnp.dot(ff.astype(jnp.bfloat16),
                      wA_ref[off_ff:off_ff + INTERMEDIATE, :],
                      preferred_element_type=jnp.float32) + pvec(base + 7)
        h = _layer_norm(ff2 + h1, pvec(base + 8), pvec(base + 9))           # BertOutput
    # WaypointBert's final nn.Dropout -> identity at eval time.

    # vis_classifier: Linear + ReLU + Linear (output lane-padded 120 -> 128, zero columns).
    c1 = jnp.maximum(
        jnp.dot(h.astype(jnp.bfloat16), wA_ref[OFF_W_C1:OFF_W_C1 + HIDDEN, :],
                preferred_element_type=jnp.float32) + pvec(ROW_B_C1), 0.0)
    out_ref[...] = (jnp.dot(c1.astype(jnp.bfloat16),
                            wA_ref[OFF_W_C2:OFF_W_C2 + HIDDEN, :],
                            preferred_element_type=jnp.float32) + pvec(ROW_B_C2)
                    ).astype(out_ref.dtype)


# ------------------------------ parameter init -------------------------------
def init_params(key):
    ks = list(jax.random.split(key, 64))

    def w_init(shape):
        return jax.random.normal(ks.pop(), shape, jnp.float32) * 0.02

    def b_init(size):
        return jax.random.normal(ks.pop(), (size,), jnp.float32) * 0.01

    # Top-level weights (w_rgb rows zero-padded to RGB_PAD, classifier cols zero-padded to 128).
    w_rgb = jnp.pad(w_init((RGB_FLAT, HIDDEN)), ((0, RGB_PAD - RGB_FLAT), (0, 0)))
    b_rgb = b_init(HIDDEN)
    w_dep, b_dep = w_init((DEP_FLAT, HIDDEN)), b_init(HIDDEN)
    w_mrg, b_mrg = w_init((2 * HIDDEN, HIDDEN)), b_init(HIDDEN)
    w_c1, b_c1 = w_init((HIDDEN, HIDDEN)), b_init(HIDDEN)
    w_c2 = jnp.pad(w_init((HIDDEN, CLS_OUT)), ((0, 0), (0, CLS_PAD - CLS_OUT)))
    b_c2 = jnp.pad(b_init(CLS_OUT), (0, CLS_PAD - CLS_OUT))

    wA_parts = [w_rgb, w_dep, w_mrg, w_c1, w_c2]
    pf_rows = [b_rgb, b_dep, b_mrg, b_c1, b_c2]
    wqkv_layers, wint_layers = [], []
    for _ in range(TRM_LAYER):
        wq, bq = w_init((HIDDEN, HIDDEN)), b_init(HIDDEN)
        wk, bk = w_init((HIDDEN, HIDDEN)), b_init(HIDDEN)
        wv, bv = w_init((HIDDEN, HIDDEN)), b_init(HIDDEN)
        wo, bo = w_init((HIDDEN, HIDDEN)), b_init(HIDDEN)
        wi, bi = w_init((HIDDEN, INTERMEDIATE)), b_init(INTERMEDIATE)
        wf, bf = w_init((INTERMEDIATE, HIDDEN)), b_init(HIDDEN)
        g1, be1 = jnp.ones((HIDDEN,), jnp.float32), jnp.zeros((HIDDEN,), jnp.float32)
        g2, be2 = jnp.ones((HIDDEN,), jnp.float32), jnp.zeros((HIDDEN,), jnp.float32)
        wqkv_layers.append(jnp.concatenate([wq, wk, wv], axis=1))   # (128, 384)
        wint_layers.append(wi)                                      # (128, 512)
        wA_parts += [wo, wf]
        pf_rows += [bq, bk, bv, bo, g1, be1, bi, bf, g2, be2]

    wA = jnp.concatenate(wA_parts, axis=0).astype(jnp.bfloat16)
    assert wA.shape == (A_ROWS, HIDDEN), wA.shape
    w_qkv = jnp.stack(wqkv_layers).astype(jnp.bfloat16)             # (L, 128, 384)
    w_int = jnp.stack(wint_layers).astype(jnp.bfloat16)             # (L, 128, 512)
    pf = jnp.stack([jnp.pad(r, (0, INTERMEDIATE - r.shape[0])) for r in pf_rows])
    assert pf.shape == (PF_ROWS, INTERMEDIATE), pf.shape
    return {"wA": wA, "w_qkv": w_qkv, "w_int": w_int, "pf": pf}


# ------------------------------ forward pass ---------------------------------
def binary_dist_predictor_trm(rgb_feats, depth_feats, params):
    """Eval-mode forward of BinaryDistPredictor_TRM (dropout layers are identity)."""
    n = rgb_feats.shape[0]
    bsi = n // NUM_IMGS

    # nn.Flatten() on NCHW, lane-pad RGB to 13*128 (weight rows zero-padded to match).
    rgb_flat = rgb_feats.reshape(n, -1)
    rgb_flat = jnp.pad(rgb_flat, ((0, 0), (0, RGB_PAD - RGB_FLAT)))
    rgb3 = rgb_flat.reshape(bsi, NUM_IMGS, RGB_PAD)
    dep3 = depth_feats.reshape(bsi, NUM_IMGS, DEP_FLAT)
    mask_bias = _neighbor_mask_bias()

    out = pl.pallas_call(
        _fused_kernel,
        out_shape=jax.ShapeDtypeStruct((bsi, NUM_IMGS, CLS_PAD), jnp.float32),
        grid=(bsi,),
        in_specs=[
            pl.BlockSpec((None, NUM_IMGS, RGB_PAD), lambda b: (b, 0, 0)),
            pl.BlockSpec((None, NUM_IMGS, DEP_FLAT), lambda b: (b, 0, 0)),
            pl.BlockSpec((NUM_IMGS, NUM_IMGS), lambda b: (0, 0)),
            pl.BlockSpec((A_ROWS, HIDDEN), lambda b: (0, 0)),
            pl.BlockSpec((TRM_LAYER, HIDDEN, 3 * HIDDEN), lambda b: (0, 0, 0)),
            pl.BlockSpec((TRM_LAYER, HIDDEN, INTERMEDIATE), lambda b: (0, 0, 0)),
            pl.BlockSpec((PF_ROWS, INTERMEDIATE), lambda b: (0, 0)),
        ],
        out_specs=pl.BlockSpec((None, NUM_IMGS, CLS_PAD), lambda b: (b, 0, 0)),
        compiler_params=pltpu.CompilerParams(dimension_semantics=("parallel",)),
    )(rgb3, dep3, mask_bias, params["wA"], params["w_qkv"], params["w_int"], params["pf"])

    # Drop the lane padding, reshape(bsi, num_angles, n_classes) and heatmap roll.
    logits = out[:, :, :CLS_OUT].reshape(bsi, NUM_ANGLES, N_CLASSES)
    logits = jnp.concatenate(
        [logits[:, HEATMAP_OFFSET:, :], logits[:, :HEATMAP_OFFSET, :]], axis=1)
    return logits


# ----------------------------------- main ------------------------------------
if __name__ == "__main__":
    key = jax.random.PRNGKey(0)
    k_rgb, k_dep, k_par = jax.random.split(key, 3)

    bsi = 2
    rgb_feats = jax.random.normal(k_rgb, (bsi * NUM_IMGS, C_RGB, H_RGB, W_RGB), jnp.float32)
    depth_feats = jax.random.normal(k_dep, (bsi * NUM_IMGS, C_DEP, H_DEP, W_DEP), jnp.float32)

    params = init_params(k_par)

    forward = jax.jit(binary_dist_predictor_trm)
    out = jax.block_until_ready(forward(rgb_feats, depth_feats, params))

    assert out.shape == (bsi, NUM_ANGLES, N_CLASSES), out.shape
    assert bool(jnp.all(jnp.isfinite(out)))
    print("KERNEL_OK")
</pallas_src>

<mosaic_0001>
module attributes {stable_mosaic.version = 11 : i64} {
  func.func @_fused_kernel(%arg0: i32, %arg1: memref<1x12x1664xf32, #tpu.memory_space<vmem>>, %arg2: memref<1x12x128xf32, #tpu.memory_space<vmem>>, %arg3: memref<12x12xf32, #tpu.memory_space<vmem>>, %arg4: memref<3584x128xbf16, #tpu.memory_space<vmem>>, %arg5: memref<2x128x384xbf16, #tpu.memory_space<vmem>>, %arg6: memref<2x128x512xbf16, #tpu.memory_space<vmem>>, %arg7: memref<25x512xf32, #tpu.memory_space<vmem>>, %arg8: memref<1x12x128xf32, #tpu.memory_space<vmem>>) attributes {dimension_semantics = [#tpu.dimension_semantics<parallel>], iteration_bounds = array<i64: 2>, scalar_prefetch = 0 : i64, scratch_operands = 0 : i64, tpu.core_type = #tpu.core_type<tc>, window_params = [{transform_indices = @transform_0, window_bounds = array<i64: 1, 12, 1664>}, {transform_indices = @transform_1, window_bounds = array<i64: 1, 12, 128>}, {pipeline_mode = #tpu.pipeline_mode<synchronous>, transform_indices = @transform_2, window_bounds = array<i64: 12, 12>}, {pipeline_mode = #tpu.pipeline_mode<synchronous>, transform_indices = @transform_3, window_bounds = array<i64: 3584, 128>}, {pipeline_mode = #tpu.pipeline_mode<synchronous>, transform_indices = @transform_4, window_bounds = array<i64: 2, 128, 384>}, {pipeline_mode = #tpu.pipeline_mode<synchronous>, transform_indices = @transform_5, window_bounds = array<i64: 2, 128, 512>}, {pipeline_mode = #tpu.pipeline_mode<synchronous>, transform_indices = @transform_6, window_bounds = array<i64: 25, 512>}, {transform_indices = @transform_7, window_bounds = array<i64: 1, 12, 128>}]} {
    %c0 = arith.constant 0 : index
    %c0_0 = arith.constant 0 : index
    %0 = vector.load %arg3[%c0, %c0_0] : memref<12x12xf32, #tpu.memory_space<vmem>>, vector<12x12xf32>
    %c0_1 = arith.constant 0 : index
    %c0_2 = arith.constant 0 : index
    %c0_3 = arith.constant 0 : index
    %1 = vector.load %arg1[%c0_1, %c0_2, %c0_3] : memref<1x12x1664xf32, #tpu.memory_space<vmem>>, vector<1x12x1664xf32>
    %2 = vector.shape_cast %1 : vector<1x12x1664xf32> to vector<12x1664xf32>
    %3 = arith.truncf %2 : vector<12x1664xf32> to vector<12x1664xbf16>
    %c0_4 = arith.constant 0 : index
    %c0_5 = arith.constant 0 : index
    %4 = vector.load %arg4[%c0_4, %c0_5] : memref<3584x128xbf16, #tpu.memory_space<vmem>>, vector<1664x128xbf16>
    %cst = arith.constant dense<0.000000e+00> : vector<12x128xf32>
    %5 = tpu.matmul %3, %4, %cst {dimension_numbers = #tpu.dot_dimension_numbers<[1], [0], [0], [1], [0, 0, 1, 1], [], []>} : vector<12x1664xbf16>, vector<1664x128xbf16>, vector<12x128xf32> -> vector<12x128xf32>
    %c0_6 = arith.constant 0 : index
    %c0_7 = arith.constant 0 : index
    %6 = vector.load %arg7[%c0_6, %c0_7] : memref<25x512xf32, #tpu.memory_space<vmem>>, vector<1x128xf32>
    %7 = vector.broadcast %6 : vector<1x128xf32> to vector<12x128xf32>
    %8 = arith.addf %5, %7 : vector<12x128xf32>
    %cst_8 = arith.constant 0.000000e+00 : f32
    %9 = vector.broadcast %cst_8 : f32 to vector<12x128xf32>
    %10 = arith.maximumf %8, %9 : vector<12x128xf32>
    %c0_9 = arith.constant 0 : index
    %c0_10 = arith.constant 0 : index
    %c0_11 = arith.constant 0 : index
    %11 = vector.load %arg2[%c0_9, %c0_10, %c0_11] : memref<1x12x128xf32, #tpu.memory_space<vmem>>, vector<1x12x128xf32>
    %12 = vector.shape_cast %11 : vector<1x12x128xf32> to vector<12x128xf32>
    %13 = arith.truncf %12 : vector<12x128xf32> to vector<12x128xbf16>
    %c1664 = arith.constant 1664 : index
    %c0_12 = arith.constant 0 : index
    %14 = vector.load %arg4[%c1664, %c0_12] : memref<3584x128xbf16, #tpu.memory_space<vmem>>, vector<128x128xbf16>
    %cst_13 = arith.constant dense<0.000000e+00> : vector<12x128xf32>
    %15 = tpu.matmul %13, %14, %cst_13 {dimension_numbers = #tpu.dot_dimension_numbers<[1], [0], [0], [1], [0, 0, 1, 1], [], []>} : vector<12x128xbf16>, vector<128x128xbf16>, vector<12x128xf32> -> vector<12x128xf32>
    %c1 = arith.constant 1 : index
    %c0_14 = arith.constant 0 : index
    %16 = vector.load %arg7[%c1, %c0_14] : memref<25x512xf32, #tpu.memory_space<vmem>>, vector<1x128xf32>
    %17 = vector.broadcast %16 : vector<1x128xf32> to vector<12x128xf32>
    %18 = arith.addf %15, %17 : vector<12x128xf32>
    %cst_15 = arith.constant 0.000000e+00 : f32
    %19 = vector.broadcast %cst_15 : f32 to vector<12x128xf32>
    %20 = arith.maximumf %18, %19 : vector<12x128xf32>
    %21 = tpu.concatenate %10, %20 in 1 : vector<12x128xf32>, vector<12x128xf32> -> vector<12x256xf32>
    %22 = arith.truncf %21 : vector<12x256xf32> to vector<12x256xbf16>
    %c1792 = arith.constant 1792 : index
    %c0_16 = arith.constant 0 : index
    %23 = vector.load %arg4[%c1792, %c0_16] : memref<3584x128xbf16, #tpu.memory_space<vmem>>, vector<256x128xbf16>
    %cst_17 = arith.constant dense<0.000000e+00> : vector<12x128xf32>
    %24 = tpu.matmul %22, %23, %cst_17 {dimension_numbers = #tpu.dot_dimension_numbers<[1], [0], [0], [1], [0, 0, 1, 1], [], []>} : vector<12x256xbf16>, vector<256x128xbf16>, vector<12x128xf32> -> vector<12x128xf32>
    %c2 = arith.constant 2 : index
    %c0_18 = arith.constant 0 : index
    %25 = vector.load %arg7[%c2, %c0_18] : memref<25x512xf32, #tpu.memory_space<vmem>>, vector<1x128xf32>
    %26 = vector.broadcast %25 : vector<1x128xf32> to vector<12x128xf32>
    %27 = arith.addf %24, %26 : vector<12x128xf32>
    %cst_19 = arith.constant 0.000000e+00 : f32
    %28 = vector.broadcast %cst_19 : f32 to vector<12x128xf32>
    %29 = arith.maximumf %27, %28 : vector<12x128xf32>
    %30 = arith.truncf %29 : vector<12x128xf32> to vector<12x128xbf16>
    %c0_20 = arith.constant 0 : index
    %c0_21 = arith.constant 0 : index
    %c0_22 = arith.constant 0 : index
    %31 = vector.load %arg5[%c0_20, %c0_21, %c0_22] : memref<2x128x384xbf16, #tpu.memory_space<vmem>>, vector<1x128x384xbf16>
    %32 = vector.shape_cast %31 : vector<1x128x384xbf16> to vector<128x384xbf16>
    %cst_23 = arith.constant dense<0.000000e+00> : vector<12x384xf32>
    %33 = tpu.matmul %30, %32, %cst_23 {dimension_numbers = #tpu.dot_dimension_numbers<[1], [0], [0], [1], [0, 0, 1, 1], [], []>} : vector<12x128xbf16>, vector<128x384xbf16>, vector<12x384xf32> -> vector<12x384xf32>
    %34 = vector.extract_strided_slice %33 {offsets = [0, 0], sizes = [12, 128], strides = [1, 1]} : vector<12x384xf32> to vector<12x128xf32>
    %c5 = arith.constant 5 : index
    %c0_24 = arith.constant 0 : index
    %35 = vector.load %arg7[%c5, %c0_24] : memref<25x512xf32, #tpu.memory_space<vmem>>, vector<1x128xf32>
    %36 = vector.broadcast %35 : vector<1x128xf32> to vector<12x128xf32>
    %37 = arith.addf %34, %36 : vector<12x128xf32>
    %cst_25 = arith.constant 1.250000e-01 : f32
    %38 = vector.broadcast %cst_25 : f32 to vector<12x128xf32>
    %39 = arith.mulf %37, %38 : vector<12x128xf32>
    %40 = arith.truncf %39 : vector<12x128xf32> to vector<12x128xbf16>
    %41 = vector.extract_strided_slice %33 {offsets = [0, 128], sizes = [12, 128], strides = [1, 1]} : vector<12x384xf32> to vector<12x128xf32>
    %c6 = arith.constant 6 : index
    %c0_26 = arith.constant 0 : index
    %42 = vector.load %arg7[%c6, %c0_26] : memref<25x512xf32, #tpu.memory_space<vmem>>, vector<1x128xf32>
    %43 = vector.broadcast %42 : vector<1x128xf32> to vector<12x128xf32>
    %44 = arith.addf %41, %43 : vector<12x128xf32>
    %45 = arith.truncf %44 : vector<12x128xf32> to vector<12x128xbf16>
    %46 = vector.extract_strided_slice %33 {offsets = [0, 256], sizes = [12, 128], strides = [1, 1]} : vector<12x384xf32> to vector<12x128xf32>
    %c7 = arith.constant 7 : index
    %c0_27 = arith.constant 0 : index
    %47 = vector.load %arg7[%c7, %c0_27] : memref<25x512xf32, #tpu.memory_space<vmem>>, vector<1x128xf32>
    %48 = vector.broadcast %47 : vector<1x128xf32> to vector<12x128xf32>
    %49 = arith.addf %46, %48 : vector<12x128xf32>
    %50 = arith.truncf %49 : vector<12x128xf32> to vector<12x128xbf16>
    %c8 = arith.constant 8 : index
    %c0_28 = arith.constant 0 : index
    %51 = vector.load %arg7[%c8, %c0_28] : memref<25x512xf32, #tpu.memory_space<vmem>>, vector<1x128xf32>
    %52 = vector.extract_strided_slice %40 {offsets = [0, 0], sizes = [12, 64], strides = [1, 1]} : vector<12x128xbf16> to vector<12x64xbf16>
    %53 = vector.extract_strided_slice %45 {offsets = [0, 0], sizes = [12, 64], strides = [1, 1]} : vector<12x128xbf16> to vector<12x64xbf16>
    %54 = vector.extract_strided_slice %50 {offsets = [0, 0], sizes = [12, 64], strides = [1, 1]} : vector<12x128xbf16> to vector<12x64xbf16>
    %cst_29 = arith.constant dense<0.000000e+00> : vector<12x12xf32>
    %55 = tpu.matmul %52, %53, %cst_29 {dimension_numbers = #tpu.dot_dimension_numbers<[1], [1], [0], [0], [0, 0, 1, 0], [], []>} : vector<12x64xbf16>, vector<12x64xbf16>, vector<12x12xf32> -> vector<12x12xf32>
    %56 = arith.addf %55, %0 : vector<12x12xf32>
    %cst_30 = arith.constant dense<0xFF800000> : vector<12xf32>
    %57 = vector.multi_reduction <maximumf>, %56, %cst_30 [1] : vector<12x12xf32> to vector<12xf32>
    %58 = vector.shape_cast %57 : vector<12xf32> to vector<12x1xf32>
    %59 = vector.broadcast %58 : vector<12x1xf32> to vector<12x12xf32>
    %60 = arith.subf %56, %59 : vector<12x12xf32>
    %61 = math.exp %60 : vector<12x12xf32>
    %cst_31 = arith.constant dense<0.000000e+00> : vector<12xf32>
    %62 = vector.multi_reduction <add>, %61, %cst_31 [1] : vector<12x12xf32> to vector<12xf32>
    %63 = vector.shape_cast %62 : vector<12xf32> to vector<12x1xf32>
    %64 = tpu.reciprocal %63 {approx = true} : vector<12x1xf32> -> vector<12x1xf32>
    %65 = vector.broadcast %64 : vector<12x1xf32> to vector<12x12xf32>
    %66 = arith.mulf %61, %65 : vector<12x12xf32>
    %67 = arith.truncf %66 : vector<12x12xf32> to vector<12x12xbf16>
    %cst_32 = arith.constant dense<0.000000e+00> : vector<12x64xf32>
    %68 = tpu.matmul %67, %54, %cst_32 {dimension_numbers = #tpu.dot_dimension_numbers<[1], [0], [0], [1], [0, 0, 1, 1], [], []>} : vector<12x12xbf16>, vector<12x64xbf16>, vector<12x64xf32> -> vector<12x64xf32>
    %69 = arith.truncf %68 : vector<12x64xf32> to vector<12x64xbf16>
    %c2304 = arith.constant 2304 : index
    %c0_33 = arith.constant 0 : index
    %70 = vector.load %arg4[%c2304, %c0_33] : memref<3584x128xbf16, #tpu.memory_space<vmem>>, vector<64x128xbf16>
    %cst_34 = arith.constant dense<0.000000e+00> : vector<12x128xf32>
    %71 = tpu.matmul %69, %70, %cst_34 {dimension_numbers = #tpu.dot_dimension_numbers<[1], [0], [0], [1], [0, 0, 1, 1], [], []>} : vector<12x64xbf16>, vector<64x128xbf16>, vector<12x128xf32> -> vector<12x128xf32>
    %72 = vector.broadcast %51 : vector<1x128xf32> to vector<12x128xf32>
    %73 = arith.addf %72, %71 : vector<12x128xf32>
    %74 = vector.extract_strided_slice %40 {offsets = [0, 64], sizes = [12, 64], strides = [1, 1]} : vector<12x128xbf16> to vector<12x64xbf16>
    %75 = vector.extract_strided_slice %45 {offsets = [0, 64], sizes = [12, 64], strides = [1, 1]} : vector<12x128xbf16> to vector<12x64xbf16>
    %76 = vector.extract_strided_slice %50 {offsets = [0, 64], sizes = [12, 64], strides = [1, 1]} : vector<12x128xbf16> to vector<12x64xbf16>
    %cst_35 = arith.constant dense<0.000000e+00> : vector<12x12xf32>
    %77 = tpu.matmul %74, %75, %cst_35 {dimension_numbers = #tpu.dot_dimension_numbers<[1], [1], [0], [0], [0, 0, 1, 0], [], []>} : vector<12x64xbf16>, vector<12x64xbf16>, vector<12x12xf32> -> vector<12x12xf32>
    %78 = arith.addf %77, %0 : vector<12x12xf32>
    %cst_36 = arith.constant dense<0xFF800000> : vector<12xf32>
    %79 = vector.multi_reduction <maximumf>, %78, %cst_36 [1] : vector<12x12xf32> to vector<12xf32>
    %80 = vector.shape_cast %79 : vector<12xf32> to vector<12x1xf32>
    %81 = vector.broadcast %80 : vector<12x1xf32> to vector<12x12xf32>
    %82 = arith.subf %78, %81 : vector<12x12xf32>
    %83 = math.exp %82 : vector<12x12xf32>
    %cst_37 = arith.constant dense<0.000000e+00> : vector<12xf32>
    %84 = vector.multi_reduction <add>, %83, %cst_37 [1] : vector<12x12xf32> to vector<12xf32>
    %85 = vector.shape_cast %84 : vector<12xf32> to vector<12x1xf32>
    %86 = tpu.reciprocal %85 {approx = true} : vector<12x1xf32> -> vector<12x1xf32>
    %87 = vector.broadcast %86 : vector<12x1xf32> to vector<12x12xf32>
    %88 = arith.mulf %83, %87 : vector<12x12xf32>
    %89 = arith.truncf %88 : vector<12x12xf32> to vector<12x12xbf16>
    %cst_38 = arith.constant dense<0.000000e+00> : vector<12x64xf32>
    %90 = tpu.matmul %89, %76, %cst_38 {dimension_numbers = #tpu.dot_dimension_numbers<[1], [0], [0], [1], [0, 0, 1, 1], [], []>} : vector<12x12xbf16>, vector<12x64xbf16>, vector<12x64xf32> -> vector<12x64xf32>
    %91 = arith.truncf %90 : vector<12x64xf32> to vector<12x64xbf16>
    %c2368 = arith.constant 2368 : index
    %c0_39 = arith.constant 0 : index
    %92 = vector.load %arg4[%c2368, %c0_39] : memref<3584x128xbf16, #tpu.memory_space<vmem>>, vector<64x128xbf16>
    %cst_40 = arith.constant dense<0.000000e+00> : vector<12x128xf32>
    %93 = tpu.matmul %91, %92, %cst_40 {dimension_numbers = #tpu.dot_dimension_numbers<[1], [0], [0], [1], [0, 0, 1, 1], [], []>} : vector<12x64xbf16>, vector<64x128xbf16>, vector<12x128xf32> -> vector<12x128xf32>
    %94 = arith.addf %73, %93 : vector<12x128xf32>
    %95 = arith.addf %94, %29 : vector<12x128xf32>
    %c9 = arith.constant 9 : index
    %c0_41 = arith.constant 0 : index
    %96 = vector.load %arg7[%c9, %c0_41] : memref<25x512xf32, #tpu.memory_space<vmem>>, vector<1x128xf32>
    %c10 = arith.constant 10 : index
    %c0_42 = arith.constant 0 : index
    %97 = vector.load %arg7[%c10, %c0_42] : memref<25x512xf32, #tpu.memory_space<vmem>>, vector<1x128xf32>
    %cst_43 = arith.constant dense<0.000000e+00> : vector<12xf32>
    %98 = vector.multi_reduction <add>, %95, %cst_43 [1] : vector<12x128xf32> to vector<12xf32>
    %99 = vector.shape_cast %98 : vector<12xf32> to vector<12x1xf32>
    %cst_44 = arith.constant 1.280000e+02 : f32
    %100 = vector.broadcast %cst_44 : f32 to vector<12x1xf32>
    %101 = arith.divf %99, %100 : vector<12x1xf32>
    %102 = vector.broadcast %101 : vector<12x1xf32> to vector<12x128xf32>
    %103 = arith.subf %95, %102 : vector<12x128xf32>
    %104 = arith.mulf %103, %103 : vector<12x128xf32>
    %cst_45 = arith.constant dense<0.000000e+00> : vector<12xf32>
    %105 = vector.multi_reduction <add>, %104, %cst_45 [1] : vector<12x128xf32> to vector<12xf32>
    %106 = vector.shape_cast %105 : vector<12xf32> to vector<12x1xf32>
    %cst_46 = arith.constant 1.280000e+02 : f32
    %107 = vector.broadcast %cst_46 : f32 to vector<12x1xf32>
    %108 = arith.divf %106, %107 : vector<12x1xf32>
    %cst_47 = arith.constant 9.99999996E-13 : f32
    %109 = vector.broadcast %cst_47 : f32 to vector<12x1xf32>
    %110 = arith.addf %108, %109 : vector<12x1xf32>
    %111 = math.rsqrt %110 : vector<12x1xf32>
    %112 = vector.broadcast %111 : vector<12x1xf32> to vector<12x128xf32>
    %113 = arith.mulf %103, %112 : vector<12x128xf32>
    %114 = vector.broadcast %96 : vector<1x128xf32> to vector<12x128xf32>
    %115 = arith.mulf %113, %114 : vector<12x128xf32>
    %116 = vector.broadcast %97 : vector<1x128xf32> to vector<12x128xf32>
    %117 = arith.addf %115, %116 : vector<12x128xf32>
    %118 = arith.truncf %117 : vector<12x128xf32> to vector<12x128xbf16>
    %c0_48 = arith.constant 0 : index
    %c0_49 = arith.constant 0 : index
    %c0_50 = arith.constant 0 : index
    %119 = vector.load %arg6[%c0_48, %c0_49, %c0_50] : memref<2x128x512xbf16, #tpu.memory_space<vmem>>, vector<1x128x512xbf16>
    %120 = vector.shape_cast %119 : vector<1x128x512xbf16> to vector<128x512xbf16>
    %cst_51 = arith.constant dense<0.000000e+00> : vector<12x512xf32>
    %121 = tpu.matmul %118, %120, %cst_51 {dimension_numbers = #tpu.dot_dimension_numbers<[1], [0], [0], [1], [0, 0, 1, 1], [], []>} : vector<12x128xbf16>, vector<128x512xbf16>, vector<12x512xf32> -> vector<12x512xf32>
    %c11 = arith.constant 11 : index
    %c0_52 = arith.constant 0 : index
    %122 = vector.load %arg7[%c11, %c0_52] : memref<25x512xf32, #tpu.memory_space<vmem>>, vector<1x512xf32>
    %123 = vector.broadcast %122 : vector<1x512xf32> to vector<12x512xf32>
    %124 = arith.addf %121, %123 : vector<12x512xf32>
    %cst_53 = arith.constant 5.000000e-01 : f32
    %125 = vector.broadcast %cst_53 : f32 to vector<12x512xf32>
    %126 = arith.mulf %125, %124 : vector<12x512xf32>
    %cst_54 = arith.constant 0.707106769 : f32
    %127 = vector.broadcast %cst_54 : f32 to vector<12x512xf32>
    %128 = arith.mulf %124, %127 : vector<12x512xf32>
    %129 = math.absf %128 : vector<12x512xf32>
    %cst_55 = arith.constant 0.327591091 : f32
    %130 = vector.broadcast %cst_55 : f32 to vector<12x512xf32>
    %131 = arith.mulf %130, %129 : vector<12x512xf32>
    %cst_56 = arith.constant 1.000000e+00 : f32
    %132 = vector.broadcast %cst_56 : f32 to vector<12x512xf32>
    %133 = arith.addf %132, %131 : vector<12x512xf32>
    %cst_57 = arith.constant 1.000000e+00 : f32
    %134 = vector.broadcast %cst_57 : f32 to vector<12x512xf32>
    %135 = arith.divf %134, %133 : vector<12x512xf32>
    %cst_58 = arith.constant 1.06140542 : f32
    %136 = vector.broadcast %cst_58 : f32 to vector<12x512xf32>
    %137 = arith.mulf %136, %135 : vector<12x512xf32>
    %cst_59 = arith.constant -1.45315206 : f32
    %138 = vector.broadcast %cst_59 : f32 to vector<12x512xf32>
    %139 = arith.addf %137, %138 : vector<12x512xf32>
    %140 = arith.mulf %139, %135 : vector<12x512xf32>
    %cst_60 = arith.constant 1.42141378 : f32
    %141 = vector.broadcast %cst_60 : f32 to vector<12x512xf32>
    %142 = arith.addf %140, %141 : vector<12x512xf32>
    %143 = arith.mulf %142, %135 : vector<12x512xf32>
    %cst_61 = arith.constant -0.284496725 : f32
    %144 = vector.broadcast %cst_61 : f32 to vector<12x512xf32>
    %145 = arith.addf %143, %144 : vector<12x512xf32>
    %146 = arith.mulf %145, %135 : vector<12x512xf32>
    %cst_62 = arith.constant 0.254829586 : f32
    %147 = vector.broadcast %cst_62 : f32 to vector<12x512xf32>
    %148 = arith.addf %146, %147 : vector<12x512xf32>
    %149 = arith.mulf %148, %135 : vector<12x512xf32>
    %cst_63 = arith.constant 0.000000e+00 : f32
    %150 = vector.broadcast %cst_63 : f32 to vector<12x512xf32>
    %151 = arith.subf %150, %129 : vector<12x512xf32>
    %152 = arith.mulf %151, %129 : vector<12x512xf32>
    %153 = math.exp %152 : vector<12x512xf32>
    %154 = arith.mulf %149, %153 : vector<12x512xf32>
    %cst_64 = arith.constant 1.000000e+00 : f32
    %155 = vector.broadcast %cst_64 : f32 to vector<12x512xf32>
    %156 = arith.subf %155, %154 : vector<12x512xf32>
    %cst_65 = arith.constant 0.000000e+00 : f32
    %157 = vector.broadcast %cst_65 : f32 to vector<12x512xf32>
    %158 = arith.cmpf oge, %128, %157 : vector<12x512xf32>
    %cst_66 = arith.constant 0.000000e+00 : f32
    %159 = vector.broadcast %cst_66 : f32 to vector<12x512xf32>
    %160 = arith.subf %159, %156 : vector<12x512xf32>
    %161 = arith.select %158, %156, %160 : vector<12x512xi1>, vector<12x512xf32>
    %cst_67 = arith.constant 1.000000e+00 : f32
    %162 = vector.broadcast %cst_67 : f32 to vector<12x512xf32>
    %163 = arith.addf %162, %161 : vector<12x512xf32>
    %164 = arith.mulf %126, %163 : vector<12x512xf32>
    %165 = arith.truncf %164 : vector<12x512xf32> to vector<12x512xbf16>
    %c2432 = arith.constant 2432 : index
    %c0_68 = arith.constant 0 : index
    %166 = vector.load %arg4[%c2432, %c0_68] : memref<3584x128xbf16, #tpu.memory_space<vmem>>, vector<512x128xbf16>
    %cst_69 = arith.constant dense<0.000000e+00> : vector<12x128xf32>
    %167 = tpu.matmul %165, %166, %cst_69 {dimension_numbers = #tpu.dot_dimension_numbers<[1], [0], [0], [1], [0, 0, 1, 1], [], []>} : vector<12x512xbf16>, vector<512x128xbf16>, vector<12x128xf32> -> vector<12x128xf32>
    %c12 = arith.constant 12 : index
    %c0_70 = arith.constant 0 : index
    %168 = vector.load %arg7[%c12, %c0_70] : memref<25x512xf32, #tpu.memory_space<vmem>>, vector<1x128xf32>
    %169 = vector.broadcast %168 : vector<1x128xf32> to vector<12x128xf32>
    %170 = arith.addf %167, %169 : vector<12x128xf32>
    %171 = arith.addf %170, %117 : vector<12x128xf32>
    %c13 = arith.constant 13 : index
    %c0_71 = arith.constant 0 : index
    %172 = vector.load %arg7[%c13, %c0_71] : memref<25x512xf32, #tpu.memory_space<vmem>>, vector<1x128xf32>
    %c14 = arith.constant 14 : index
    %c0_72 = arith.constant 0 : index
    %173 = vector.load %arg7[%c14, %c0_72] : memref<25x512xf32, #tpu.memory_space<vmem>>, vector<1x128xf32>
    %cst_73 = arith.constant dense<0.000000e+00> : vector<12xf32>
    %174 = vector.multi_reduction <add>, %171, %cst_73 [1] : vector<12x128xf32> to vector<12xf32>
    %175 = vector.shape_cast %174 : vector<12xf32> to vector<12x1xf32>
    %cst_74 = arith.constant 1.280000e+02 : f32
    %176 = vector.broadcast %cst_74 : f32 to vector<12x1xf32>
    %177 = arith.divf %175, %176 : vector<12x1xf32>
    %178 = vector.broadcast %177 : vector<12x1xf32> to vector<12x128xf32>
    %179 = arith.subf %171, %178 : vector<12x128xf32>
    %180 = arith.mulf %179, %179 : vector<12x128xf32>
    %cst_75 = arith.constant dense<0.000000e+00> : vector<12xf32>
    %181 = vector.multi_reduction <add>, %180, %cst_75 [1] : vector<12x128xf32> to vector<12xf32>
    %182 = vector.shape_cast %181 : vector<12xf32> to vector<12x1xf32>
    %cst_76 = arith.constant 1.280000e+02 : f32
    %183 = vector.broadcast %cst_76 : f32 to vector<12x1xf32>
    %184 = arith.divf %182, %183 : vector<12x1xf32>
    %cst_77 = arith.constant 9.99999996E-13 : f32
    %185 = vector.broadcast %cst_77 : f32 to vector<12x1xf32>
    %186 = arith.addf %184, %185 : vector<12x1xf32>
    %187 = math.rsqrt %186 : vector<12x1xf32>
    %188 = vector.broadcast %187 : vector<12x1xf32> to vector<12x128xf32>
    %189 = arith.mulf %179, %188 : vector<12x128xf32>
    %190 = vector.broadcast %172 : vector<1x128xf32> to vector<12x128xf32>
    %191 = arith.mulf %189, %190 : vector<12x128xf32>
    %192 = vector.broadcast %173 : vector<1x128xf32> to vector<12x128xf32>
    %193 = arith.addf %191, %192 : vector<12x128xf32>
    %194 = arith.truncf %193 : vector<12x128xf32> to vector<12x128xbf16>
    %c1_78 = arith.constant 1 : index
    %c0_79 = arith.constant 0 : index
    %c0_80 = arith.constant 0 : index
    %195 = vector.load %arg5[%c1_78, %c0_79, %c0_80] : memref<2x128x384xbf16, #tpu.memory_space<vmem>>, vector<1x128x384xbf16>
    %196 = vector.shape_cast %195 : vector<1x128x384xbf16> to vector<128x384xbf16>
    %cst_81 = arith.constant dense<0.000000e+00> : vector<12x384xf32>
    %197 = tpu.matmul %194, %196, %cst_81 {dimension_numbers = #tpu.dot_dimension_numbers<[1], [0], [0], [1], [0, 0, 1, 1], [], []>} : vector<12x128xbf16>, vector<128x384xbf16>, vector<12x384xf32> -> vector<12x384xf32>
    %198 = vector.extract_strided_slice %197 {offsets = [0, 0], sizes = [12, 128], strides = [1, 1]} : vector<12x384xf32> to vector<12x128xf32>
    %c15 = arith.constant 15 : index
    %c0_82 = arith.constant 0 : index
    %199 = vector.load %arg7[%c15, %c0_82] : memref<25x512xf32, #tpu.memory_space<vmem>>, vector<1x128xf32>
    %200 = vector.broadcast %199 : vector<1x128xf32> to vector<12x128xf32>
    %201 = arith.addf %198, %200 : vector<12x128xf32>
    %cst_83 = arith.constant 1.250000e-01 : f32
    %202 = vector.broadcast %cst_83 : f32 to vector<12x128xf32>
    %203 = arith.mulf %201, %202 : vector<12x128xf32>
    %204 = arith.truncf %203 : vector<12x128xf32> to vector<12x128xbf16>
    %205 = vector.extract_strided_slice %197 {offsets = [0, 128], sizes = [12, 128], strides = [1, 1]} : vector<12x384xf32> to vector<12x128xf32>
    %c16 = arith.constant 16 : index
    %c0_84 = arith.constant 0 : index
    %206 = vector.load %arg7[%c16, %c0_84] : memref<25x512xf32, #tpu.memory_space<vmem>>, vector<1x128xf32>
    %207 = vector.broadcast %206 : vector<1x128xf32> to vector<12x128xf32>
    %208 = arith.addf %205, %207 : vector<12x128xf32>
    %209 = arith.truncf %208 : vector<12x128xf32> to vector<12x128xbf16>
    %210 = vector.extract_strided_slice %197 {offsets = [0, 256], sizes = [12, 128], strides = [1, 1]} : vector<12x384xf32> to vector<12x128xf32>
    %c17 = arith.constant 17 : index
    %c0_85 = arith.constant 0 : index
    %211 = vector.load %arg7[%c17, %c0_85] : memref<25x512xf32, #tpu.memory_space<vmem>>, vector<1x128xf32>
    %212 = vector.broadcast %211 : vector<1x128xf32> to vector<12x128xf32>
    %213 = arith.addf %210, %212 : vector<12x128xf32>
    %214 = arith.truncf %213 : vector<12x128xf32> to vector<12x128xbf16>
    %c18 = arith.constant 18 : index
    %c0_86 = arith.constant 0 : index
    %215 = vector.load %arg7[%c18, %c0_86] : memref<25x512xf32, #tpu.memory_space<vmem>>, vector<1x128xf32>
    %216 = vector.extract_strided_slice %204 {offsets = [0, 0], sizes = [12, 64], strides = [1, 1]} : vector<12x128xbf16> to vector<12x64xbf16>
    %217 = vector.extract_strided_slice %209 {offsets = [0, 0], sizes = [12, 64], strides = [1, 1]} : vector<12x128xbf16> to vector<12x64xbf16>
    %218 = vector.extract_strided_slice %214 {offsets = [0, 0], sizes = [12, 64], strides = [1, 1]} : vector<12x128xbf16> to vector<12x64xbf16>
    %cst_87 = arith.constant dense<0.000000e+00> : vector<12x12xf32>
    %219 = tpu.matmul %216, %217, %cst_87 {dimension_numbers = #tpu.dot_dimension_numbers<[1], [1], [0], [0], [0, 0, 1, 0], [], []>} : vector<12x64xbf16>, vector<12x64xbf16>, vector<12x12xf32> -> vector<12x12xf32>
    %220 = arith.addf %219, %0 : vector<12x12xf32>
    %cst_88 = arith.constant dense<0xFF800000> : vector<12xf32>
    %221 = vector.multi_reduction <maximumf>, %220, %cst_88 [1] : vector<12x12xf32> to vector<12xf32>
    %222 = vector.shape_cast %221 : vector<12xf32> to vector<12x1xf32>
    %223 = vector.broadcast %222 : vector<12x1xf32> to vector<12x12xf32>
    %224 = arith.subf %220, %223 : vector<12x12xf32>
    %225 = math.exp %224 : vector<12x12xf32>
    %cst_89 = arith.constant dense<0.000000e+00> : vector<12xf32>
    %226 = vector.multi_reduction <add>, %225, %cst_89 [1] : vector<12x12xf32> to vector<12xf32>
    %227 = vector.shape_cast %226 : vector<12xf32> to vector<12x1xf32>
    %228 = tpu.reciprocal %227 {approx = true} : vector<12x1xf32> -> vector<12x1xf32>
    %229 = vector.broadcast %228 : vector<12x1xf32> to vector<12x12xf32>
    %230 = arith.mulf %225, %229 : vector<12x12xf32>
    %231 = arith.truncf %230 : vector<12x12xf32> to vector<12x12xbf16>
    %cst_90 = arith.constant dense<0.000000e+00> : vector<12x64xf32>
    %232 = tpu.matmul %231, %218, %cst_90 {dimension_numbers = #tpu.dot_dimension_numbers<[1], [0], [0], [1], [0, 0, 1, 1], [], []>} : vector<12x12xbf16>, vector<12x64xbf16>, vector<12x64xf32> -> vector<12x64xf32>
    %233 = arith.truncf %232 : vector<12x64xf32> to vector<12x64xbf16>
    %c2944 = arith.constant 2944 : index
    %c0_91 = arith.constant 0 : index
    %234 = vector.load %arg4[%c2944, %c0_91] : memref<3584x128xbf16, #tpu.memory_space<vmem>>, vector<64x128xbf16>
    %cst_92 = arith.constant dense<0.000000e+00> : vector<12x128xf32>
    %235 = tpu.matmul %233, %234, %cst_92 {dimension_numbers = #tpu.dot_dimension_numbers<[1], [0], [0], [1], [0, 0, 1, 1], [], []>} : vector<12x64xbf16>, vector<64x128xbf16>, vector<12x128xf32> -> vector<12x128xf32>
    %236 = vector.broadcast %215 : vector<1x128xf32> to vector<12x128xf32>
    %237 = arith.addf %236, %235 : vector<12x128xf32>
    %238 = vector.extract_strided_slice %204 {offsets = [0, 64], sizes = [12, 64], strides = [1, 1]} : vector<12x128xbf16> to vector<12x64xbf16>
    %239 = vector.extract_strided_slice %209 {offsets = [0, 64], sizes = [12, 64], strides = [1, 1]} : vector<12x128xbf16> to vector<12x64xbf16>
    %240 = vector.extract_strided_slice %214 {offsets = [0, 64], sizes = [12, 64], strides = [1, 1]} : vector<12x128xbf16> to vector<12x64xbf16>
    %cst_93 = arith.constant dense<0.000000e+00> : vector<12x12xf32>
    %241 = tpu.matmul %238, %239, %cst_93 {dimension_numbers = #tpu.dot_dimension_numbers<[1], [1], [0], [0], [0, 0, 1, 0], [], []>} : vector<12x64xbf16>, vector<12x64xbf16>, vector<12x12xf32> -> vector<12x12xf32>
    %242 = arith.addf %241, %0 : vector<12x12xf32>
    %cst_94 = arith.constant dense<0xFF800000> : vector<12xf32>
    %243 = vector.multi_reduction <maximumf>, %242, %cst_94 [1] : vector<12x12xf32> to vector<12xf32>
    %244 = vector.shape_cast %243 : vector<12xf32> to vector<12x1xf32>
    %245 = vector.broadcast %244 : vector<12x1xf32> to vector<12x12xf32>
    %246 = arith.subf %242, %245 : vector<12x12xf32>
    %247 = math.exp %246 : vector<12x12xf32>
    %cst_95 = arith.constant dense<0.000000e+00> : vector<12xf32>
    %248 = vector.multi_reduction <add>, %247, %cst_95 [1] : vector<12x12xf32> to vector<12xf32>
    %249 = vector.shape_cast %248 : vector<12xf32> to vector<12x1xf32>
    %250 = tpu.reciprocal %249 {approx = true} : vector<12x1xf32> -> vector<12x1xf32>
    %251 = vector.broadcast %250 : vector<12x1xf32> to vector<12x12xf32>
    %252 = arith.mulf %247, %251 : vector<12x12xf32>
    %253 = arith.truncf %252 : vector<12x12xf32> to vector<12x12xbf16>
    %cst_96 = arith.constant dense<0.000000e+00> : vector<12x64xf32>
    %254 = tpu.matmul %253, %240, %cst_96 {dimension_numbers = #tpu.dot_dimension_numbers<[1], [0], [0], [1], [0, 0, 1, 1], [], []>} : vector<12x12xbf16>, vector<12x64xbf16>, vector<12x64xf32> -> vector<12x64xf32>
    %255 = arith.truncf %254 : vector<12x64xf32> to vector<12x64xbf16>
    %c3008 = arith.constant 3008 : index
    %c0_97 = arith.constant 0 : index
    %256 = vector.load %arg4[%c3008, %c0_97] : memref<3584x128xbf16, #tpu.memory_space<vmem>>, vector<64x128xbf16>
    %cst_98 = arith.constant dense<0.000000e+00> : vector<12x128xf32>
    %257 = tpu.matmul %255, %256, %cst_98 {dimension_numbers = #tpu.dot_dimension_numbers<[1], [0], [0], [1], [0, 0, 1, 1], [], []>} : vector<12x64xbf16>, vector<64x128xbf16>, vector<12x128xf32> -> vector<12x128xf32>
    %258 = arith.addf %237, %257 : vector<12x128xf32>
    %259 = arith.addf %258, %193 : vector<12x128xf32>
    %c19 = arith.constant 19 : index
    %c0_99 = arith.constant 0 : index
    %260 = vector.load %arg7[%c19, %c0_99] : memref<25x512xf32, #tpu.memory_space<vmem>>, vector<1x128xf32>
    %c20 = arith.constant 20 : index
    %c0_100 = arith.constant 0 : index
    %261 = vector.load %arg7[%c20, %c0_100] : memref<25x512xf32, #tpu.memory_space<vmem>>, vector<1x128xf32>
    %cst_101 = arith.constant dense<0.000000e+00> : vector<12xf32>
    %262 = vector.multi_reduction <add>, %259, %cst_101 [1] : vector<12x128xf32> to vector<12xf32>
    %263 = vector.shape_cast %262 : vector<12xf32> to vector<12x1xf32>
    %cst_102 = arith.constant 1.280000e+02 : f32
    %264 = vector.broadcast %cst_102 : f32 to vector<12x1xf32>
    %265 = arith.divf %263, %264 : vector<12x1xf32>
    %266 = vector.broadcast %265 : vector<12x1xf32> to vector<12x128xf32>
    %267 = arith.subf %259, %266 : vector<12x128xf32>
    %268 = arith.mulf %267, %267 : vector<12x128xf32>
    %cst_103 = arith.constant dense<0.000000e+00> : vector<12xf32>
    %269 = vector.multi_reduction <add>, %268, %cst_103 [1] : vector<12x128xf32> to vector<12xf32>
    %270 = vector.shape_cast %269 : vector<12xf32> to vector<12x1xf32>
    %cst_104 = arith.constant 1.280000e+02 : f32
    %271 = vector.broadcast %cst_104 : f32 to vector<12x1xf32>
    %272 = arith.divf %270, %271 : vector<12x1xf32>
    %cst_105 = arith.constant 9.99999996E-13 : f32
    %273 = vector.broadcast %cst_105 : f32 to vector<12x1xf32>
    %274 = arith.addf %272, %273 : vector<12x1xf32>
    %275 = math.rsqrt %274 : vector<12x1xf32>
    %276 = vector.broadcast %275 : vector<12x1xf32> to vector<12x128xf32>
    %277 = arith.mulf %267, %276 : vector<12x128xf32>
    %278 = vector.broadcast %260 : vector<1x128xf32> to vector<12x128xf32>
    %279 = arith.mulf %277, %278 : vector<12x128xf32>
    %280 = vector.broadcast %261 : vector<1x128xf32> to vector<12x128xf32>
    %281 = arith.addf %279, %280 : vector<12x128xf32>
    %282 = arith.truncf %281 : vector<12x128xf32> to vector<12x128xbf16>
    %c1_106 = arith.constant 1 : index
    %c0_107 = arith.constant 0 : index
    %c0_108 = arith.constant 0 : index
    %283 = vector.load %arg6[%c1_106, %c0_107, %c0_108] : memref<2x128x512xbf16, #tpu.memory_space<vmem>>, vector<1x128x512xbf16>
    %284 = vector.shape_cast %283 : vector<1x128x512xbf16> to vector<128x512xbf16>
    %cst_109 = arith.constant dense<0.000000e+00> : vector<12x512xf32>
    %285 = tpu.matmul %282, %284, %cst_109 {dimension_numbers = #tpu.dot_dimension_numbers<[1], [0], [0], [1], [0, 0, 1, 1], [], []>} : vector<12x128xbf16>, vector<128x512xbf16>, vector<12x512xf32> -> vector<12x512xf32>
    %c21 = arith.constant 21 : index
    %c0_110 = arith.constant 0 : index
    %286 = vector.load %arg7[%c21, %c0_110] : memref<25x512xf32, #tpu.memory_space<vmem>>, vector<1x512xf32>
    %287 = vector.broadcast %286 : vector<1x512xf32> to vector<12x512xf32>
    %288 = arith.addf %285, %287 : vector<12x512xf32>
    %cst_111 = arith.constant 5.000000e-01 : f32
    %289 = vector.broadcast %cst_111 : f32 to vector<12x512xf32>
    %290 = arith.mulf %289, %288 : vector<12x512xf32>
    %cst_112 = arith.constant 0.707106769 : f32
    %291 = vector.broadcast %cst_112 : f32 to vector<12x512xf32>
    %292 = arith.mulf %288, %291 : vector<12x512xf32>
    %293 = math.absf %292 : vector<12x512xf32>
    %cst_113 = arith.constant 0.327591091 : f32
    %294 = vector.broadcast %cst_113 : f32 to vector<12x512xf32>
    %295 = arith.mulf %294, %293 : vector<12x512xf32>
    %cst_114 = arith.constant 1.000000e+00 : f32
    %296 = vector.broadcast %cst_114 : f32 to vector<12x512xf32>
    %297 = arith.addf %296, %295 : vector<12x512xf32>
    %cst_115 = arith.constant 1.000000e+00 : f32
    %298 = vector.broadcast %cst_115 : f32 to vector<12x512xf32>
    %299 = arith.divf %298, %297 : vector<12x512xf32>
    %cst_116 = arith.constant 1.06140542 : f32
    %300 = vector.broadcast %cst_116 : f32 to vector<12x512xf32>
    %301 = arith.mulf %300, %299 : vector<12x512xf32>
    %cst_117 = arith.constant -1.45315206 : f32
    %302 = vector.broadcast %cst_117 : f32 to vector<12x512xf32>
    %303 = arith.addf %301, %302 : vector<12x512xf32>
    %304 = arith.mulf %303, %299 : vector<12x512xf32>
    %cst_118 = arith.constant 1.42141378 : f32
    %305 = vector.broadcast %cst_118 : f32 to vector<12x512xf32>
    %306 = arith.addf %304, %305 : vector<12x512xf32>
    %307 = arith.mulf %306, %299 : vector<12x512xf32>
    %cst_119 = arith.constant -0.284496725 : f32
    %308 = vector.broadcast %cst_119 : f32 to vector<12x512xf32>
    %309 = arith.addf %307, %308 : vector<12x512xf32>
    %310 = arith.mulf %309, %299 : vector<12x512xf32>
    %cst_120 = arith.constant 0.254829586 : f32
    %311 = vector.broadcast %cst_120 : f32 to vector<12x512xf32>
    %312 = arith.addf %310, %311 : vector<12x512xf32>
    %313 = arith.mulf %312, %299 : vector<12x512xf32>
    %cst_121 = arith.constant 0.000000e+00 : f32
    %314 = vector.broadcast %cst_121 : f32 to vector<12x512xf32>
    %315 = arith.subf %314, %293 : vector<12x512xf32>
    %316 = arith.mulf %315, %293 : vector<12x512xf32>
    %317 = math.exp %316 : vector<12x512xf32>
    %318 = arith.mulf %313, %317 : vector<12x512xf32>
    %cst_122 = arith.constant 1.000000e+00 : f32
    %319 = vector.broadcast %cst_122 : f32 to vector<12x512xf32>
    %320 = arith.subf %319, %318 : vector<12x512xf32>
    %cst_123 = arith.constant 0.000000e+00 : f32
    %321 = vector.broadcast %cst_123 : f32 to vector<12x512xf32>
    %322 = arith.cmpf oge, %292, %321 : vector<12x512xf32>
    %cst_124 = arith.constant 0.000000e+00 : f32
    %323 = vector.broadcast %cst_124 : f32 to vector<12x512xf32>
    %324 = arith.subf %323, %320 : vector<12x512xf32>
    %325 = arith.select %322, %320, %324 : vector<12x512xi1>, vector<12x512xf32>
    %cst_125 = arith.constant 1.000000e+00 : f32
    %326 = vector.broadcast %cst_125 : f32 to vector<12x512xf32>
    %327 = arith.addf %326, %325 : vector<12x512xf32>
    %328 = arith.mulf %290, %327 : vector<12x512xf32>
    %329 = arith.truncf %328 : vector<12x512xf32> to vector<12x512xbf16>
    %c3072 = arith.constant 3072 : index
    %c0_126 = arith.constant 0 : index
    %330 = vector.load %arg4[%c3072, %c0_126] : memref<3584x128xbf16, #tpu.memory_space<vmem>>, vector<512x128xbf16>
    %cst_127 = arith.constant dense<0.000000e+00> : vector<12x128xf32>
    %331 = tpu.matmul %329, %330, %cst_127 {dimension_numbers = #tpu.dot_dimension_numbers<[1], [0], [0], [1], [0, 0, 1, 1], [], []>} : vector<12x512xbf16>, vector<512x128xbf16>, vector<12x128xf32> -> vector<12x128xf32>
    %c22 = arith.constant 22 : index
    %c0_128 = arith.constant 0 : index
    %332 = vector.load %arg7[%c22, %c0_128] : memref<25x512xf32, #tpu.memory_space<vmem>>, vector<1x128xf32>
    %333 = vector.broadcast %332 : vector<1x128xf32> to vector<12x128xf32>
    %334 = arith.addf %331, %333 : vector<12x128xf32>
    %335 = arith.addf %334, %281 : vector<12x128xf32>
    %c23 = arith.constant 23 : index
    %c0_129 = arith.constant 0 : index
    %336 = vector.load %arg7[%c23, %c0_129] : memref<25x512xf32, #tpu.memory_space<vmem>>, vector<1x128xf32>
    %c24 = arith.constant 24 : index
    %c0_130 = arith.constant 0 : index
    %337 = vector.load %arg7[%c24, %c0_130] : memref<25x512xf32, #tpu.memory_space<vmem>>, vector<1x128xf32>
    %cst_131 = arith.constant dense<0.000000e+00> : vector<12xf32>
    %338 = vector.multi_reduction <add>, %335, %cst_131 [1] : vector<12x128xf32> to vector<12xf32>
    %339 = vector.shape_cast %338 : vector<12xf32> to vector<12x1xf32>
    %cst_132 = arith.constant 1.280000e+02 : f32
    %340 = vector.broadcast %cst_132 : f32 to vector<12x1xf32>
    %341 = arith.divf %339, %340 : vector<12x1xf32>
    %342 = vector.broadcast %341 : vector<12x1xf32> to vector<12x128xf32>
    %343 = arith.subf %335, %342 : vector<12x128xf32>
    %344 = arith.mulf %343, %343 : vector<12x128xf32>
    %cst_133 = arith.constant dense<0.000000e+00> : vector<12xf32>
    %345 = vector.multi_reduction <add>, %344, %cst_133 [1] : vector<12x128xf32> to vector<12xf32>
    %346 = vector.shape_cast %345 : vector<12xf32> to vector<12x1xf32>
    %cst_134 = arith.constant 1.280000e+02 : f32
    %347 = vector.broadcast %cst_134 : f32 to vector<12x1xf32>
    %348 = arith.divf %346, %347 : vector<12x1xf32>
    %cst_135 = arith.constant 9.99999996E-13 : f32
    %349 = vector.broadcast %cst_135 : f32 to vector<12x1xf32>
    %350 = arith.addf %348, %349 : vector<12x1xf32>
    %351 = math.rsqrt %350 : vector<12x1xf32>
    %352 = vector.broadcast %351 : vector<12x1xf32> to vector<12x128xf32>
    %353 = arith.mulf %343, %352 : vector<12x128xf32>
    %354 = vector.broadcast %336 : vector<1x128xf32> to vector<12x128xf32>
    %355 = arith.mulf %353, %354 : vector<12x128xf32>
    %356 = vector.broadcast %337 : vector<1x128xf32> to vector<12x128xf32>
    %357 = arith.addf %355, %356 : vector<12x128xf32>
    %358 = arith.truncf %357 : vector<12x128xf32> to vector<12x128xbf16>
    %c2048 = arith.constant 2048 : index
    %c0_136 = arith.constant 0 : index
    %359 = vector.load %arg4[%c2048, %c0_136] : memref<3584x128xbf16, #tpu.memory_space<vmem>>, vector<128x128xbf16>
    %cst_137 = arith.constant dense<0.000000e+00> : vector<12x128xf32>
    %360 = tpu.matmul %358, %359, %cst_137 {dimension_numbers = #tpu.dot_dimension_numbers<[1], [0], [0], [1], [0, 0, 1, 1], [], []>} : vector<12x128xbf16>, vector<128x128xbf16>, vector<12x128xf32> -> vector<12x128xf32>
    %c3 = arith.constant 3 : index
    %c0_138 = arith.constant 0 : index
    %361 = vector.load %arg7[%c3, %c0_138] : memref<25x512xf32, #tpu.memory_space<vmem>>, vector<1x128xf32>
    %362 = vector.broadcast %361 : vector<1x128xf32> to vector<12x128xf32>
    %363 = arith.addf %360, %362 : vector<12x128xf32>
    %cst_139 = arith.constant 0.000000e+00 : f32
    %364 = vector.broadcast %cst_139 : f32 to vector<12x128xf32>
    %365 = arith.maximumf %363, %364 : vector<12x128xf32>
    %366 = arith.truncf %365 : vector<12x128xf32> to vector<12x128xbf16>
    %c2176 = arith.constant 2176 : index
    %c0_140 = arith.constant 0 : index
    %367 = vector.load %arg4[%c2176, %c0_140] : memref<3584x128xbf16, #tpu.memory_space<vmem>>, vector<128x128xbf16>
    %cst_141 = arith.constant dense<0.000000e+00> : vector<12x128xf32>
    %368 = tpu.matmul %366, %367, %cst_141 {dimension_numbers = #tpu.dot_dimension_numbers<[1], [0], [0], [1], [0, 0, 1, 1], [], []>} : vector<12x128xbf16>, vector<128x128xbf16>, vector<12x128xf32> -> vector<12x128xf32>
    %c4 = arith.constant 4 : index
    %c0_142 = arith.constant 0 : index
    %369 = vector.load %arg7[%c4, %c0_142] : memref<25x512xf32, #tpu.memory_space<vmem>>, vector<1x128xf32>
    %370 = vector.broadcast %369 : vector<1x128xf32> to vector<12x128xf32>
    %371 = arith.addf %368, %370 : vector<12x128xf32>
    %c0_143 = arith.constant 0 : index
    %c0_144 = arith.constant 0 : index
    %c0_145 = arith.constant 0 : index
    %372 = vector.load %arg8[%c0_143, %c0_144, %c0_145] : memref<1x12x128xf32, #tpu.memory_space<vmem>>, vector<1x12x128xf32>
    %373 = vector.shape_cast %372 : vector<1x12x128xf32> to vector<12x128xf32>
    %374 = vector.shape_cast %371 : vector<12x128xf32> to vector<1x12x128xf32>
    tpu.vector_store %arg8[%c0_143, %c0_144, %c0_145], %374 {strides = array<i32>} : memref<1x12x128xf32, #tpu.memory_space<vmem>>, vector<1x12x128xf32>,
    return
  }
  func.func @transform_0(%arg0: i32) -> (i32, i32, i32) {
    %c0_i32 = arith.constant 0 : i32
    %c0_i32_0 = arith.constant 0 : i32
    %c0_i32_1 = arith.constant 0 : i32
    return %arg0, %c0_i32, %c0_i32_0 : i32, i32, i32
  }
  func.func @transform_1(%arg0: i32) -> (i32, i32, i32) {
    %c0_i32 = arith.constant 0 : i32
    %c0_i32_0 = arith.constant 0 : i32
    %c0_i32_1 = arith.constant 0 : i32
    return %arg0, %c0_i32, %c0_i32_0 : i32, i32, i32
  }
  func.func @transform_2(%arg0: i32) -> (i32, i32) {
    %c0_i32 = arith.constant 0 : i32
    %c0_i32_0 = arith.constant 0 : i32
    %c0_i32_1 = arith.constant 0 : i32
    return %c0_i32, %c0_i32_0 : i32, i32
  }
  func.func @transform_3(%arg0: i32) -> (i32, i32) {
    %c0_i32 = arith.constant 0 : i32
    %c0_i32_0 = arith.constant 0 : i32
    %c0_i32_1 = arith.constant 0 : i32
    return %c0_i32, %c0_i32_0 : i32, i32
  }
  func.func @transform_4(%arg0: i32) -> (i32, i32, i32) {
    %c0_i32 = arith.constant 0 : i32
    %c0_i32_0 = arith.constant 0 : i32
    %c0_i32_1 = arith.constant 0 : i32
    %c0_i32_2 = arith.constant 0 : i32
    return %c0_i32, %c0_i32_0, %c0_i32_1 : i32, i32, i32
  }
  func.func @transform_5(%arg0: i32) -> (i32, i32, i32) {
    %c0_i32 = arith.constant 0 : i32
    %c0_i32_0 = arith.constant 0 : i32
    %c0_i32_1 = arith.constant 0 : i32
    %c0_i32_2 = arith.constant 0 : i32
    return %c0_i32, %c0_i32_0, %c0_i32_1 : i32, i32, i32
  }
  func.func @transform_6(%arg0: i32) -> (i32, i32) {
    %c0_i32 = arith.constant 0 : i32
    %c0_i32_0 = arith.constant 0 : i32
    %c0_i32_1 = arith.constant 0 : i32
    return %c0_i32, %c0_i32_0 : i32, i32
  }
  func.func @transform_7(%arg0: i32) -> (i32, i32, i32) {
    %c0_i32 = arith.constant 0 : i32
    %c0_i32_0 = arith.constant 0 : i32
    %c0_i32_1 = arith.constant 0 : i32
    return %arg0, %c0_i32, %c0_i32_0 : i32, i32, i32
  }
}

</mosaic_0001>

<bundles_post_ra>
// kernel: binary_dist_predictor_trm.1
= control target key start
LH: loop header
LB: loop body
LE: loop exit
PB: predicated region body
PF: predicated region fallthrough
CT: control target
= control target key end

     0   :  { %s6752_s24 = smov 0   ;;  %s8442_s0 = inlined_call_operand.vmem [shape: f32[2,12,1664], index: 0, kind: input, shape index: {}]   ;;  %s8443_s1 = inlined_call_operand.vmem [shape: f32[2,12,128], index: 1, kind: input, shape index: {}]   ;;  %s8444_s2 = inlined_call_operand.vmem [shape: f32[12,12], index: 2, kind: input, shape index: {}]   ;;  %s8445_s3 = inlined_call_operand.vmem [shape: bf16[3584,128], index: 3, kind: input, shape index: {}]   ;;  %s8446_s4 = inlined_call_operand.vmem [shape: bf16[2,128,384], index: 4, kind: input, shape index: {}]   ;;  %s8447_s5 = inlined_call_operand.vmem [shape: bf16[2,128,512], index: 5, kind: input, shape index: {}]   ;;  %s8448_s6 = inlined_call_operand.vmem [shape: f32[25,512], index: 6, kind: input, shape index: {}]   ;;  %s8449_s7 = inlined_call_operand.vmem [shape: f32[2,12,128], index: 7, kind: output, shape index: {}]  }
   0x1 LB: > { %s5213_s25 = sadd.s32 4294967295, %s6706_s24   ;;  %p5217_p0 = scmp.ge.s32.totalorder %s6706_s24, 1  ;;  %s6706_s24 = sphi %s6752_s24, %s17_s24  }
   0x2   : > { %p247_p1 = scmp.lt.s32.totalorder %s6706_s24, 3 }
   0x4   : > { %p248_p2 = pnand %p5217_p0, %p247_p1 }
   0x5   : > { %p284_p3 = scmp.lt.s32.totalorder (!%p248_p2), %s5213_s25, 1  ;;  %s6711_s8 = smov (!%p248_p2), 64  }
   0x6   : > { %251 = sbr.rel (%p248_p2) target bundleno = 6636 (0x19ec), region = 48 }
   0xb   : > { %v6202_v0 = vld [vmem:[%s8445_s3 + $0x78] sm:$0xff]   ;;  %v6206_v4 = vld [vmem:[%s8445_s3 + $0x70] sm:$0xff]   ;;  %v6210_v8 = vld [vmem:[%s8445_s3 + $0x68] sm:$0xff]   ;;  %s8451_s25 = smov (!%p284_p3, %s5213_s25), 1  ;;  %vm6709_vm0 = vmmov 0   ;;  %vm2008_vm1 = vcmask 523264  }
   0xc   : > { %v6203_v1 = vld [vmem:[%s8445_s3 + $0xf8] sm:$0xff]   ;;  %5641 = vmatprep.subr.bf16.mxu0 %v6202_v0  ;;  %v6207_v5 = vld [vmem:[%s8445_s3 + $0xf0] sm:$0xff]   ;;  %v6211_v9 = vld [vmem:[%s8445_s3 + $0xe8] sm:$0xff]   ;;  %s6189_s13 = smul.u32 208, %s8451_s25  ;;  %s5639_s20 = sshll.u32 %s8451_s25, 4  ;;  %vm2084_vm2 = vcmask 1045504  }
   0xd   : > { %v6204_v2 = vld [vmem:[%s8445_s3 + $0x38] sm:$0xff]   ;;  %5663 = vmatprep.subr.bf16.mxu1 %v6203_v1  ;;  %v6208_v6 = vld [vmem:[%s8445_s3 + $0x30] sm:$0xff]   ;;  %v6212_v10 = vld [vmem:[%s8445_s3 + $0x28] sm:$0xff]   ;;  %s293_s30 = scalar_lea.vmem %s8443_s1, %s5639_s20  ;;  %vm2056_vm3 = vcmask 97280   ;;  %vm2060_vm4 = vcmask 93184   ;;  %vm2419_vm5 = vcmask 1043456   ;;  %s298_s12 = scalar_lea.vmem %s8449_s7, %s5639_s20 }
   0xe   : > { %v6205_v3 = vld [vmem:[%s8445_s3 + $0xb8] sm:$0xff]   ;;  %5642 = vmatpush3.bf16.msra.mxu0 %v6204_v2  ;;  %v6209_v7 = vld [vmem:[%s8445_s3 + $0xb0] sm:$0xff]   ;;  %v6213_v11 = vld [vmem:[%s8445_s3 + $0xa8] sm:$0xff]   ;;  %s6860_s26 = scalar_lea.vmem %s8442_s0, %s6189_s13 }
   0xf   : > { %5664 = vmatpush3.bf16.msra.mxu1 %v6205_v3  ;;  %5643 = vmatprep.subr.bf16.mxu0 %v6206_v4  ;;  %v6214_v12 = vld [vmem:[%s8445_s3 + $0x60] sm:$0xff]   ;;  %v6218_v16 = vld [vmem:[%s8445_s3 + $0x58] sm:$0xff]   ;;  %v6222_v20 = vld [vmem:[%s8445_s3 + $0x50] sm:$0xff]  }
  0x10   : > { %5665 = vmatprep.subr.bf16.mxu1 %v6207_v5  ;;  %v6215_v13 = vld [vmem:[%s8445_s3 + $0xe0] sm:$0xff]   ;;  %v6219_v17 = vld [vmem:[%s8445_s3 + $0xd8] sm:$0xff]   ;;  %v6223_v21 = vld [vmem:[%s8445_s3 + $0xd0] sm:$0xff]  }
  0x11   : > { %v6216_v14 = vld [vmem:[%s8445_s3 + $0x20] sm:$0xff]   ;;  %v6220_v18 = vld [vmem:[%s8445_s3 + $0x18] sm:$0xff]   ;;  %v6224_v22 = vld [vmem:[%s8445_s3 + $0x10] sm:$0xff]  }
  0x12   : > { %5644 = vmatpush3.bf16.msra.mxu0 %v6208_v6  ;;  %v6217_v15 = vld [vmem:[%s8445_s3 + $0xa0] sm:$0xff]   ;;  %v6221_v19 = vld [vmem:[%s8445_s3 + $0x98] sm:$0xff]   ;;  %v6225_v23 = vld [vmem:[%s8445_s3 + $0x90] sm:$0xff]  }
  0x13   : > { %5666 = vmatpush3.bf16.msra.mxu1 %v6209_v7  ;;  %5645 = vmatprep.subr.bf16.mxu0 %v6210_v8  ;;  %v6226_v24 = vld [vmem:[%s8445_s3 + $0x48] sm:$0xff]   ;;  %v6230_v28 = vld [vmem:[%s8445_s3 + $0x40] sm:$0xff]   ;;  %v316_v33 = vld [vmem:[%s6860_s26 + $0x70] sm:$0xf] }
  0x14   : > { %5667 = vmatprep.subr.bf16.mxu1 %v6211_v9  ;;  %v6227_v25 = vld [vmem:[%s8445_s3 + $0xc8] sm:$0xff]   ;;  %v6231_v29 = vld [vmem:[%s8445_s3 + $0xc0] sm:$0xff]   ;;  %v305_v34 = vld [vmem:[%s6860_s26 + $0x18] sm:$0xff] }
  0x15   : > { %v6228_v26 = vld [vmem:[%s8445_s3 + $0x8] sm:$0xff]   ;;  %v6232_v30 = vld [vmem:[%s8445_s3] sm:$0xff]   ;;  %v304_v41 = vld [vmem:[%s6860_s26 + $0x10] sm:$0xff] }
  0x16   : > { %5646 = vmatpush3.bf16.msra.mxu0 %v6212_v10  ;;  %v6229_v27 = vld [vmem:[%s8445_s3 + $0x88] sm:$0xff]   ;;  %v6233_v31 = vld [vmem:[%s8445_s3 + $0x80] sm:$0xff]   ;;  %v317_v42 = vld [vmem:[%s6860_s26 + $0x78] sm:$0xf] }
  0x17   : > { %5668 = vmatpush3.bf16.msra.mxu1 %v6213_v11  ;;  %5647 = vmatprep.subr.bf16.mxu0 %v6214_v12  ;;  %v303_v32 = vld [vmem:[%s6860_s26 + $0x8] sm:$0xff]  ;;  %v318_v36 = vld [vmem:[%s6860_s26 + $0x80] sm:$0xf]  ;;  %v330_v43 = vpack.c.bf16 %v317_v42, %v304_v41  ;;  %v6234_v44 = vld [vmem:[%s8445_s3 + $0x178] sm:$0xff]  }
  0x18   : > { %5669 = vmatprep.subr.bf16.mxu1 %v6215_v13  ;;  %v329_v35 = vpack.c.bf16 %v316_v33, %v303_v32  ;;  %v302_v37 = vld [vmem:[%s6860_s26] sm:$0xff]  ;;  %v315_v38 = vld [vmem:[%s6860_s26 + $0x68] sm:$0xf]  ;;  %v331_v39 = vpack.c.bf16 %v318_v36, %v305_v34  ;;  %v6235_v45 = vld [vmem:[%s8445_s3 + $0x1f8] sm:$0xff]  }
  0x19   : > { %v328_v40 = vpack.c.bf16 %v315_v38, %v302_v37  ;;  %v6236_v46 = vld [vmem:[%s8445_s3 + $0x138] sm:$0xff]   ;;  %v6238_v48 = vld [vmem:[%s8445_s3 + $0x170] sm:$0xff]   ;;  %v6242_v52 = vld [vmem:[%s8445_s3 + $0x168] sm:$0xff]  }
  0x1a   : > { %5648 = vmatpush3.bf16.msra.mxu0 %v6216_v14  ;;  %1206 = vmatprep.mubr.bf16.mxu0 %v329_v35  ;;  %v6237_v47 = vld [vmem:[%s8445_s3 + $0x1b8] sm:$0xff]   ;;  %v6239_v49 = vld [vmem:[%s8445_s3 + $0x1f0] sm:$0xff]   ;;  %v6243_v53 = vld [vmem:[%s8445_s3 + $0x1e8] sm:$0xff]  }
  0x1b   : > { %5670 = vmatpush3.bf16.msra.mxu1 %v6217_v15  ;;  %5649 = vmatprep.subr.bf16.mxu0 %v6218_v16  ;;  %v6240_v50 = vld [vmem:[%s8445_s3 + $0x130] sm:$0xff]   ;;  %v6244_v54 = vld [vmem:[%s8445_s3 + $0x128] sm:$0xff]   ;;  %v6246_v56 = vld [vmem:[%s8445_s3 + $0x160] sm:$0xff]  }
  0x1c   : > { %5671 = vmatprep.subr.bf16.mxu1 %v6219_v17  ;;  %1247 = vmatprep.mubr.bf16.mxu1 %v331_v39  ;;  %v6241_v51 = vld [vmem:[%s8445_s3 + $0x1b0] sm:$0xff]   ;;  %v6245_v55 = vld [vmem:[%s8445_s3 + $0x1a8] sm:$0xff]   ;;  %v6247_v57 = vld [vmem:[%s8445_s3 + $0x1e0] sm:$0xff]  }
  0x1d   : > { %v6248_v58 = vld [vmem:[%s8445_s3 + $0x120] sm:$0xff]   ;;  %v6250_v60 = vld [vmem:[%s8445_s3 + $0x158] sm:$0xff]   ;;  %v6254_v0 = vld [vmem:[%s8445_s3 + $0x150] sm:$0xff]  }
  0x1e   : > { %5650 = vmatpush3.bf16.msra.mxu0 %v6220_v18  ;;  %v6249_v59 = vld [vmem:[%s8445_s3 + $0x1a0] sm:$0xff]   ;;  %v6251_v61 = vld [vmem:[%s8445_s3 + $0x1d8] sm:$0xff]   ;;  %v6255_v1 = vld [vmem:[%s8445_s3 + $0x1d0] sm:$0xff]  }
  0x1f   : > { %5672 = vmatpush3.bf16.msra.mxu1 %v6221_v19  ;;  %5651 = vmatprep.subr.bf16.mxu0 %v6222_v20  ;;  %v6252_v62 = vld [vmem:[%s8445_s3 + $0x118] sm:$0xff]   ;;  %v6256_v2 = vld [vmem:[%s8445_s3 + $0x110] sm:$0xff]   ;;  %v6258_v4 = vld [vmem:[%s8445_s3 + $0x148] sm:$0xff]  }
  0x20   : > { %5673 = vmatprep.subr.bf16.mxu1 %v6223_v21  ;;  %v6253_v63 = vld [vmem:[%s8445_s3 + $0x198] sm:$0xff]   ;;  %v6257_v3 = vld [vmem:[%s8445_s3 + $0x190] sm:$0xff]   ;;  %v6259_v5 = vld [vmem:[%s8445_s3 + $0x1c8] sm:$0xff]  }
  0x21   : > { %v6260_v6 = vld [vmem:[%s8445_s3 + $0x108] sm:$0xff]   ;;  %v6262_v8 = vld [vmem:[%s8445_s3 + $0x140] sm:$0xff]   ;;  %v320_v13 = vld [vmem:[%s6860_s26 + $0x90] sm:$0xf] }
  0x22   : > { %5652 = vmatpush3.bf16.msra.mxu0 %v6224_v22  ;;  %v6261_v7 = vld [vmem:[%s8445_s3 + $0x188] sm:$0xff]   ;;  %v6263_v9 = vld [vmem:[%s8445_s3 + $0x1c0] sm:$0xff]   ;;  %v309_v14 = vld [vmem:[%s6860_s26 + $0x38] sm:$0xff] }
  0x23   : > { %5674 = vmatpush3.bf16.msra.mxu1 %v6225_v23  ;;  %5653 = vmatprep.subr.bf16.mxu0 %v6226_v24  ;;  %v6264_v10 = vld [vmem:[%s8445_s3 + $0x100] sm:$0xff]   ;;  %v307_v12 = vld [vmem:[%s6860_s26 + $0x28] sm:$0xff]  ;;  %v308_v20 = vld [vmem:[%s6860_s26 + $0x30] sm:$0xff] }
  0x24   : > { %5675 = vmatprep.subr.bf16.mxu1 %v6227_v25  ;;  %v6265_v11 = vld [vmem:[%s8445_s3 + $0x180] sm:$0xff]   ;;  %v333_v16 = vpack.c.bf16 %v320_v13, %v307_v12  ;;  %v319_v19 = vld [vmem:[%s6860_s26 + $0x88] sm:$0xf]  ;;  %v321_v22 = vld [vmem:[%s6860_s26 + $0x98] sm:$0xf] }
  0x25   : > { %v322_v15 = vld [vmem:[%s6860_s26 + $0xa0] sm:$0xf]  ;;  %v334_v23 = vpack.c.bf16 %v321_v22, %v308_v20  ;;  %v6266_v24 = vld [vmem:[%s8445_s3 + $0x278] sm:$0xff]   ;;  %v6274_v32 = vld [vmem:[%s8445_s3 + $0x268] sm:$0xff]  }
  0x26   : > { %5654 = vmatpush3.bf16.msra.mxu0 %v6228_v26  ;;  %v335_v17 = vpack.c.bf16 %v322_v15, %v309_v14  ;;  %v306_v18 = vld [vmem:[%s6860_s26 + $0x20] sm:$0xff]  ;;  %v6267_v25 = vld [vmem:[%s8445_s3 + $0x2f8] sm:$0xff]   ;;  %v6275_v33 = vld [vmem:[%s8445_s3 + $0x2e8] sm:$0xff]  }
  0x27   : > { %5676 = vmatpush3.bf16.msra.mxu1 %v6229_v27  ;;  %5655 = vmatprep.subr.bf16.mxu0 %v6230_v28  ;;  %v332_v21 = vpack.c.bf16 %v319_v19, %v306_v18  ;;  %v6268_v26 = vld [vmem:[%s8445_s3 + $0x238] sm:$0xff]   ;;  %v6270_v28 = vld [vmem:[%s8445_s3 + $0x270] sm:$0xff]   ;;  %v6276_v34 = vld [vmem:[%s8445_s3 + $0x228] sm:$0xff]  }
  0x28   : > { %5677 = vmatprep.subr.bf16.mxu1 %v6231_v29  ;;  %v6269_v27 = vld [vmem:[%s8445_s3 + $0x2b8] sm:$0xff]   ;;  %v6271_v29 = vld [vmem:[%s8445_s3 + $0x2f0] sm:$0xff]   ;;  %v6277_v35 = vld [vmem:[%s8445_s3 + $0x2a8] sm:$0xff]  }
  0x29   : > { %v6278_v36 = vld [vmem:[%s8445_s3 + $0x260] sm:$0xff]   ;;  %v6283_v41 = vld [vmem:[%s8445_s3 + $0x2d8] sm:$0xff]   ;;  %v6308_v15 = vld [vmem:[%s8445_s3 + $0x310] sm:$0xff]  }
  0x2a   : > { %5656 = vmatpush3.bf16.msra.mxu0 %v6232_v30  ;;  %v6272_v30 = vld [vmem:[%s8445_s3 + $0x230] sm:$0xff]   ;;  %v6279_v37 = vld [vmem:[%s8445_s3 + $0x2e0] sm:$0xff]   ;;  %v6284_v42 = vld [vmem:[%s8445_s3 + $0x218] sm:$0xff]  }
  0x2b   : > { %5678 = vmatpush3.bf16.msra.mxu1 %v6233_v31  ;;  %5685 = vmatprep.subr.bf16.mxu0 %v6234_v44  ;;  %v6273_v31 = vld [vmem:[%s8445_s3 + $0x2b0] sm:$0xff]   ;;  %v6280_v38 = vld [vmem:[%s8445_s3 + $0x220] sm:$0xff]   ;;  %v6306_v13 = vld [vmem:[%s8445_s3 + $0x318] sm:$0xff]  }
  0x2c   : > { %5707 = vmatprep.subr.bf16.mxu1 %v6235_v45  ;;  %v6281_v39 = vld [vmem:[%s8445_s3 + $0x2a0] sm:$0xff]   ;;  %v6286_v44 = vld [vmem:[%s8445_s3 + $0x250] sm:$0xff]   ;;  %v6307_v14 = vld [vmem:[%s8445_s3 + $0x358] sm:$0xff]  }
  0x2d   : > { %1207 = vmatmul.mubr.bf16.vlgmr.msra.gmra.mxu0 %v328_v40  ;;  %v6282_v40 = vld [vmem:[%s8445_s3 + $0x258] sm:$0xff]   ;;  %v6287_v45 = vld [vmem:[%s8445_s3 + $0x2d0] sm:$0xff]   ;;  %v6305_v12 = vld [vmem:[%s8445_s3 + $0x360] sm:$0xff]  }
  0x2e   : > { %1248 = vmatmul.mubr.bf16.vlgmr.msra.gmra.mxu1 %v330_v43  ;;  %5686 = vmatpush3.bf16.msra.mxu0 %v6236_v46  ;;  %v6285_v43 = vld [vmem:[%s8445_s3 + $0x298] sm:$0xff]   ;;  %v6288_v46 = vld [vmem:[%s8445_s3 + $0x210] sm:$0xff]   ;;  %v6311_v18 = vld [vmem:[%s8445_s3 + $0x348] sm:$0xff]  }
  0x2f   : > { %5708 = vmatpush3.bf16.msra.mxu1 %v6237_v47  ;;  %5687 = vmatprep.subr.bf16.mxu0 %v6238_v48  ;;  %v6289_v47 = vld [vmem:[%s8445_s3 + $0x290] sm:$0xff]   ;;  %v6290_v48 = vld [vmem:[%s8445_s3 + $0x248] sm:$0xff]   ;;  %v6312_v19 = vld [vmem:[%s8445_s3 + $0x300] sm:$0xff]  }
  0x30   : > { %5709 = vmatprep.subr.bf16.mxu1 %v6239_v49  ;;  %1288 = vmatprep.mubr.bf16.mxu0 %v333_v16  ;;  %v6291_v49 = vld [vmem:[%s8445_s3 + $0x2c8] sm:$0xff]   ;;  %v6309_v16 = vld [vmem:[%s8445_s3 + $0x350] sm:$0xff]   ;;  %v6313_v20 = vld [vmem:[%s8445_s3 + $0x340] sm:$0xff]  }
  0x31   : > { %1329 = vmatprep.mubr.bf16.mxu1 %v335_v17  ;;  %v6310_v17 = vld [vmem:[%s8445_s3 + $0x308] sm:$0xff]  }
  0x32   : > { %5688 = vmatpush3.bf16.msra.mxu0 %v6240_v50  ;;  %v6292_v50 = vld [vmem:[%s8445_s3 + $0x208] sm:$0xff]  }
  0x33   : > { %5710 = vmatpush3.bf16.msra.mxu1 %v6241_v51  ;;  %5689 = vmatprep.subr.bf16.mxu0 %v6242_v52  ;;  %v6293_v51 = vld [vmem:[%s8445_s3 + $0x288] sm:$0xff]   ;;  %v6294_v52 = vld [vmem:[%s8445_s3 + $0x240] sm:$0xff]  }
  0x34   : > { %5711 = vmatprep.subr.bf16.mxu1 %v6243_v53  ;;  %v6295_v53 = vld [vmem:[%s8445_s3 + $0x2c0] sm:$0xff]   ;;  %v327_v22 = vld [vmem:[%s6860_s26 + $0xc8] sm:$0xf] }
  0x36   : > { %5690 = vmatpush3.bf16.msra.mxu0 %v6244_v54  ;;  %v6296_v54 = vld [vmem:[%s8445_s3 + $0x200] sm:$0xff]  }
  0x37   : > { %5712 = vmatpush3.bf16.msra.mxu1 %v6245_v55  ;;  %5691 = vmatprep.subr.bf16.mxu0 %v6246_v56  ;;  %v6297_v55 = vld [vmem:[%s8445_s3 + $0x280] sm:$0xff]   ;;  %v311_v56 = vld [vmem:[%s6860_s26 + $0x48] sm:$0xff] }
  0x38   : > { %5713 = vmatprep.subr.bf16.mxu1 %v6247_v57  ;;  %v324_v57 = vld [vmem:[%s6860_s26 + $0xb0] sm:$0xf] }
  0x3a   : > { %5692 = vmatpush3.bf16.msra.mxu0 %v6248_v58  ;;  %v337_v58 = vpack.c.bf16 %v324_v57, %v311_v56 }
  0x3b   : > { %5714 = vmatpush3.bf16.msra.mxu1 %v6249_v59  ;;  %5693 = vmatprep.subr.bf16.mxu0 %v6250_v60  ;;  %v313_v59 = vld [vmem:[%s6860_s26 + $0x58] sm:$0xff]  ;;  %v326_v60 = vld [vmem:[%s6860_s26 + $0xc0] sm:$0xf] }
  0x3c   : > { %5715 = vmatprep.subr.bf16.mxu1 %v6251_v61  ;;  %v310_v61 = vld [vmem:[%s6860_s26 + $0x40] sm:$0xff] }
  0x3e   : > { %5694 = vmatpush3.bf16.msra.mxu0 %v6252_v62  ;;  %v339_v62 = vpack.c.bf16 %v326_v60, %v313_v59 }
  0x3f   : > { %5716 = vmatpush3.bf16.msra.mxu1 %v6253_v63  ;;  %5695 = vmatprep.subr.bf16.mxu0 %v6254_v0  ;;  %v323_v63 = vld [vmem:[%s6860_s26 + $0xa8] sm:$0xf]  ;;  %v312_v0 = vld [vmem:[%s6860_s26 + $0x50] sm:$0xff] }
  0x40   : > { %5717 = vmatprep.subr.bf16.mxu1 %v6255_v1  ;;  %v325_v1 = vld [vmem:[%s6860_s26 + $0xb8] sm:$0xf] }
  0x42   : > { %5696 = vmatpush3.bf16.msra.mxu0 %v6256_v2  ;;  %v6708_v2 = vmov 0.0  }
  0x43   : > { %5718 = vmatpush3.bf16.msra.mxu1 %v6257_v3  ;;  %5697 = vmatprep.subr.bf16.mxu0 %v6258_v4  ;;  %v336_v3 = vpack.c.bf16 %v323_v63, %v310_v61  ;;  %v338_v4 = vpack.c.bf16 %v325_v1, %v312_v0 }
  0x44   : > { %5719 = vmatprep.subr.bf16.mxu1 %v6259_v5  ;;  %v6298_v5 = vld [vmem:[%s8445_s3 + $0x338] sm:$0xff]  }
  0x46   : > { %5698 = vmatpush3.bf16.msra.mxu0 %v6260_v6  ;;  %v6299_v6 = vld [vmem:[%s8445_s3 + $0x378] sm:$0xff]  }
  0x47   : > { %5720 = vmatpush3.bf16.msra.mxu1 %v6261_v7  ;;  %5699 = vmatprep.subr.bf16.mxu0 %v6262_v8  ;;  %v6300_v7 = vld [vmem:[%s8445_s3 + $0x330] sm:$0xff]  }
  0x48   : > { %5721 = vmatprep.subr.bf16.mxu1 %v6263_v9  ;;  %v6301_v8 = vld [vmem:[%s8445_s3 + $0x370] sm:$0xff]   ;;  %v6302_v9 = vld [vmem:[%s8445_s3 + $0x328] sm:$0xff]  }
  0x4a   : > { %5700 = vmatpush3.bf16.msra.mxu0 %v6264_v10  ;;  %v6303_v10 = vld [vmem:[%s8445_s3 + $0x368] sm:$0xff]  }
  0x4b   : > { %5722 = vmatpush3.bf16.msra.mxu1 %v6265_v11  ;;  %5729 = vmatprep.subr.bf16.mxu0 %v6266_v24  ;;  %v6304_v11 = vld [vmem:[%s8445_s3 + $0x320] sm:$0xff]   ;;  %v1464_v24 = vld [vmem:[%s293_s30 + $0x8] sm:$0xf] }
  0x4c   : > { %5751 = vmatprep.subr.bf16.mxu1 %v6267_v25 }
  0x4d   : > { %1289 = vmatmul.mubr.bf16.vlgmr.msra.gmra.mxu0 %v332_v21  ;;  %v314_v21 = vld [vmem:[%s6860_s26 + $0x60] sm:$0xff] }
  0x4e   : > { %1330 = vmatmul.mubr.bf16.vlgmr.msra.gmra.mxu1 %v334_v23  ;;  %5730 = vmatpush3.bf16.msra.mxu0 %v6268_v26  ;;  %v1463_v23 = vld [vmem:[%s293_s30] sm:$0xff]  ;;  %v340_v25 = vpack.c.bf16 %v327_v22, %v314_v21 }
  0x4f   : > { %5752 = vmatpush3.bf16.msra.mxu1 %v6269_v27  ;;  %5731 = vmatprep.subr.bf16.mxu0 %v6270_v28  ;;  %v1465_v26 = vpack.c.bf16 %v1464_v24, %v1463_v23  ;;  %v6314_v27 = vld [vmem:[%s8445_s3 + $0x3f8] sm:$0xff]  }
  0x50   : > { %5753 = vmatprep.subr.bf16.mxu1 %v6271_v29  ;;  %1370 = vmatprep.mubr.bf16.mxu0 %v337_v58  ;;  %v6315_v28 = vld [vmem:[%s8445_s3 + $0x3b8] sm:$0xff]   ;;  %v6316_v29 = vld [vmem:[%s8445_s3 + $0x3f0] sm:$0xff]  }
  0x51   : > { %1411 = vmatprep.mubr.bf16.mxu1 %v339_v62 }
  0x52   : > { %5732 = vmatpush3.bf16.msra.mxu0 %v6272_v30  ;;  %v6317_v30 = vld [vmem:[%s8445_s3 + $0x3b0] sm:$0xff]  }
  0x53   : > { %5754 = vmatpush3.bf16.msra.mxu1 %v6273_v31  ;;  %5733 = vmatprep.subr.bf16.mxu0 %v6274_v32  ;;  %v6318_v31 = vld [vmem:[%s8445_s3 + $0x3e8] sm:$0xff]  }
  0x54   : > { %5755 = vmatprep.subr.bf16.mxu1 %v6275_v33  ;;  %v6319_v32 = vld [vmem:[%s8445_s3 + $0x3a8] sm:$0xff]   ;;  %v6320_v33 = vld [vmem:[%s8445_s3 + $0x3e0] sm:$0xff]  }
  0x56   : > { %5734 = vmatpush3.bf16.msra.mxu0 %v6276_v34  ;;  %v6321_v34 = vld [vmem:[%s8445_s3 + $0x3a0] sm:$0xff]  }
  0x57   : > { %5756 = vmatpush3.bf16.msra.mxu1 %v6277_v35  ;;  %5735 = vmatprep.subr.bf16.mxu0 %v6278_v36  ;;  %v6322_v35 = vld [vmem:[%s8445_s3 + $0x3d8] sm:$0xff]  }
  0x58   : > { %5757 = vmatprep.subr.bf16.mxu1 %v6279_v37  ;;  %v6323_v36 = vld [vmem:[%s8445_s3 + $0x398] sm:$0xff]   ;;  %v6324_v37 = vld [vmem:[%s8445_s3 + $0x3d0] sm:$0xff]  }
  0x5a   : > { %5736 = vmatpush3.bf16.msra.mxu0 %v6280_v38  ;;  %v6325_v38 = vld [vmem:[%s8445_s3 + $0x390] sm:$0xff]  }
  0x5b   : > { %5758 = vmatpush3.bf16.msra.mxu1 %v6281_v39  ;;  %5737 = vmatprep.subr.bf16.mxu0 %v6282_v40  ;;  %v6326_v39 = vld [vmem:[%s8445_s3 + $0x3c8] sm:$0xff]  }
  0x5c   : > { %5759 = vmatprep.subr.bf16.mxu1 %v6283_v41  ;;  %v6327_v40 = vld [vmem:[%s8445_s3 + $0x388] sm:$0xff]   ;;  %v6328_v41 = vld [vmem:[%s8445_s3 + $0x3c0] sm:$0xff]  }
  0x5e   : > { %5738 = vmatpush3.bf16.msra.mxu0 %v6284_v42  ;;  %v6329_v42 = vld [vmem:[%s8445_s3 + $0x380] sm:$0xff]  }
  0x5f   : > { %5760 = vmatpush3.bf16.msra.mxu1 %v6285_v43  ;;  %5739 = vmatprep.subr.bf16.mxu0 %v6286_v44  ;;  %v6330_v43 = vld [vmem:[%s8446_s4 + $0xa8] ss:$12 sps:$4 sm:$0xff]   ;;  %v6332_v44 = vld [vmem:[%s8446_s4 + $0xac] ss:$12 sps:$4 sm:$0xff]  }
  0x60   : > { %5761 = vmatprep.subr.bf16.mxu1 %v6287_v45  ;;  %v6336_v45 = vld [vmem:[%s8446_s4 + $0x94] ss:$12 sps:$4 sm:$0xff]  }
  0x62   : > { %5740 = vmatpush3.bf16.msra.mxu0 %v6288_v46  ;;  %v6334_v46 = vld [vmem:[%s8446_s4 + $0x90] ss:$12 sps:$4 sm:$0xff]  }
  0x63   : > { %5762 = vmatpush3.bf16.msra.mxu1 %v6289_v47  ;;  %5741 = vmatprep.subr.bf16.mxu0 %v6290_v48  ;;  %v6340_v47 = vld [vmem:[%s8446_s4 + $0x7c] ss:$12 sps:$4 sm:$0xff]   ;;  %v6338_v48 = vld [vmem:[%s8446_s4 + $0x78] ss:$12 sps:$4 sm:$0xff]  }
  0x64   : > { %5763 = vmatprep.subr.bf16.mxu1 %v6291_v49  ;;  %v6344_v49 = vld [vmem:[%s8446_s4 + $0x64] ss:$12 sps:$4 sm:$0xff]  }
  0x66   : > { %5742 = vmatpush3.bf16.msra.mxu0 %v6292_v50  ;;  %v6342_v50 = vld [vmem:[%s8446_s4 + $0x60] ss:$12 sps:$4 sm:$0xff]  }
  0x67   : > { %5764 = vmatpush3.bf16.msra.mxu1 %v6293_v51  ;;  %5743 = vmatprep.subr.bf16.mxu0 %v6294_v52  ;;  %v6346_v51 = vld [vmem:[%s8446_s4 + $0x48] ss:$12 sps:$4 sm:$0xff]   ;;  %v6348_v52 = vld [vmem:[%s8446_s4 + $0x4c] ss:$12 sps:$4 sm:$0xff]  }
  0x68   : > { %5765 = vmatprep.subr.bf16.mxu1 %v6295_v53 }
  0x6a   : > { %5744 = vmatpush3.bf16.msra.mxu0 %v6296_v54 }
  0x6b   : > { %5766 = vmatpush3.bf16.msra.mxu1 %v6297_v55  ;;  %5973 = vmatprep.subr.bf16.mxu0 %v6708_v2 }
  0x6c   : > { %5993 = vmatprep.subr.bf16.mxu1 %v6708_v2 }
  0x6d   : > { %1371 = vmatmul.mubr.bf16.vlgmr.msra.gmra.mxu0 %v336_v3 }
  0x6e   : > { %1412 = vmatmul.mubr.bf16.vlgmr.msra.gmra.mxu1 %v338_v4  ;;  %5974 = vmatpush3.bf16.msra.mxu0 %v6298_v5 }
  0x6f   : > { %5994 = vmatpush3.bf16.msra.mxu1 %v6299_v6  ;;  %5975 = vmatprep.subr.bf16.mxu0 %v6708_v2 }
  0x70   : > { %5995 = vmatprep.subr.bf16.mxu1 %v6708_v2  ;;  %5989 = vmatprep.mubr.msk.bf16.mxu0 %vm6709_vm0, %v6708_v2 }
  0x71   : > { %6009 = vmatprep.mubr.msk.bf16.mxu1 %vm6709_vm0, %v6708_v2 }
  0x72   : > { %5976 = vmatpush3.bf16.msra.mxu0 %v6300_v7  ;;  %v549_v7 = vld [vmem:[%s8448_s6] ss:$0 sm:$0xff] }
  0x73   : > { %5996 = vmatpush3.bf16.msra.mxu1 %v6301_v8  ;;  %5977 = vmatprep.subr.bf16.mxu0 %v6708_v2 }
  0x74   : > { %5997 = vmatprep.subr.bf16.mxu1 %v6708_v2 }
  0x76   : > { %5978 = vmatpush3.bf16.msra.mxu0 %v6302_v9 }
  0x77   : > { %5998 = vmatpush3.bf16.msra.mxu1 %v6303_v10  ;;  %5979 = vmatprep.subr.bf16.mxu0 %v6708_v2 }
  0x78   : > { %5999 = vmatprep.subr.bf16.mxu1 %v6708_v2 }
  0x7a   : > { %5980 = vmatpush3.bf16.msra.mxu0 %v6304_v11 }
  0x7b   : > { %6000 = vmatpush3.bf16.msra.mxu1 %v6305_v12  ;;  %5981 = vmatprep.subr.bf16.mxu0 %v6708_v2 }
  0x7c   : > { %6001 = vmatprep.subr.bf16.mxu1 %v6708_v2 }
  0x7e   : > { %5982 = vmatpush3.bf16.msra.mxu0 %v6306_v13 }
  0x7f   : > { %6002 = vmatpush3.bf16.msra.mxu1 %v6307_v14  ;;  %5983 = vmatprep.subr.bf16.mxu0 %v6708_v2 }
  0x80   : > { %6003 = vmatprep.subr.bf16.mxu1 %v6708_v2 }
  0x82   : > { %5984 = vmatpush3.bf16.msra.mxu0 %v6308_v15 }
  0x83   : > { %6004 = vmatpush3.bf16.msra.mxu1 %v6309_v16  ;;  %5985 = vmatprep.subr.bf16.mxu0 %v6708_v2 }
  0x84   : > { %6005 = vmatprep.subr.bf16.mxu1 %v6708_v2 }
  0x86   : > { %5986 = vmatpush3.bf16.msra.mxu0 %v6310_v17 }
  0x87   : > { %6006 = vmatpush3.bf16.msra.mxu1 %v6311_v18  ;;  %5987 = vmatprep.subr.bf16.mxu0 %v6708_v2 }
  0x88   : > { %6007 = vmatprep.subr.bf16.mxu1 %v6708_v2 }
  0x8a   : > { %5988 = vmatpush3.bf16.msra.mxu0 %v6312_v19 }
  0x8b   : > { %6008 = vmatpush3.bf16.msra.mxu1 %v6313_v20  ;;  %5791 = vmatprep.subr.bf16.mxu0 %v6314_v27 }
  0x8c   : > { %1909 = vmatprep.subr.bf16.mxu1 %v6332_v44 }
  0x8d   : > { %5990 = vmatmul.mubr.bf16.vlgmr.msra.gmra.mxu0 %v340_v25 }
  0x8e   : > { %6010 = vmatmul.mubr.bf16.vlgmr.msra.gmra.mxu1 %v1465_v26  ;;  %5792 = vmatpush3.bf16.msra.mxu0 %v6315_v28 }
  0x8f   : > { %5793 = vmatprep.subr.bf16.mxu0 %v6316_v29  ;;  %1910 = vmatpush1.bf16.msra.mxu1 %v6330_v43 }
  0x90   : > { %1911 = vmatprep.subr.bf16.mxu1 %v6336_v45 }
  0x92   : > { %5794 = vmatpush3.bf16.msra.mxu0 %v6317_v30 }
  0x93   : > { %5795 = vmatprep.subr.bf16.mxu0 %v6318_v31  ;;  %1912 = vmatpush1.bf16.msra.mxu1 %v6334_v46 }
  0x94   : > { %1913 = vmatprep.subr.bf16.mxu1 %v6340_v47 }
  0x96   : > { %5796 = vmatpush3.bf16.msra.mxu0 %v6319_v32 }
  0x97   : > { %5797 = vmatprep.subr.bf16.mxu0 %v6320_v33  ;;  %1914 = vmatpush1.bf16.msra.mxu1 %v6338_v48 }
  0x98   : > { %1915 = vmatprep.subr.bf16.mxu1 %v6344_v49 }
  0x9a   : > { %5798 = vmatpush3.bf16.msra.mxu0 %v6321_v34 }
  0x9b   : > { %5799 = vmatprep.subr.bf16.mxu0 %v6322_v35  ;;  %1916 = vmatpush1.bf16.msra.mxu1 %v6342_v50 }
  0x9c   : > { %1917 = vmatprep.subr.bf16.mxu1 %v6348_v52 }
  0x9e   : > { %5800 = vmatpush3.bf16.msra.mxu0 %v6323_v36 }
  0x9f   : > { %5801 = vmatprep.subr.bf16.mxu0 %v6324_v37  ;;  %1918 = vmatpush1.bf16.msra.mxu1 %v6346_v51  ;;  %v1482_v37 = vld [vmem:[%s8448_s6 + $0x1] ss:$0 sm:$0xff] }
  0xa2   : > { %5802 = vmatpush3.bf16.msra.mxu0 %v6325_v38 }
  0xa3   : > { %5803 = vmatprep.subr.bf16.mxu0 %v6326_v39 }
  0xa6   : > { %5804 = vmatpush3.bf16.msra.mxu0 %v6327_v40 }
  0xa7   : > { %5805 = vmatprep.subr.bf16.mxu0 %v6328_v41 }
  0xaa   : > { %5806 = vmatpush3.bf16.msra.mxu0 %v6329_v42 }
  0xab   : > { %6013 = vmatprep.subr.bf16.mxu0 %v6708_v2 }
  0xed   : > { %v5657_v53 = vpop.f32.mrf.mxu0 }
  0xee   : > { %v5679_v55 = vpop.f32.mrf.mxu1 }
  0xef   : > { %v5658_v54 = vpop.f32.mrf.mxu0 }
  0xf0   : > { %v5680_v57 = vpop.f32.mrf.mxu1  ;;  %v5659_v6 = vadd.f32 %v5658_v54, %v5657_v53 }
  0xf1   : > { %v5660_v56 = vpop.f32.mrf.mxu0  ;;  %v5681_v13 = vadd.f32 %v5680_v57, %v5679_v55 }
  0xf2   : > { %v5682_v59 = vpop.f32.mrf.mxu1  ;;  %v1209_v11 = vadd.f32 %v5659_v6, %v549_v7  ;;  %v6360_v6 = vld [vmem:[%s8446_s4 + $0x4] ss:$12 sps:$4 sm:$0xff]  }
  0xf3   : > { %v5661_v58 = vpop.f32.mrf.mxu0 }
  0xf4   : > { %v5683_v61 = vpop.f32.mrf.mxu1  ;;  %v5662_v8 = vadd.f32 %v5661_v58, %v5660_v56  ;;  %v1250_v17 = vadd.f32 %v5681_v13, %v1209_v11  ;;  %v6333_v58 = vld [vmem:[%s8446_s4 + $0xb0] ss:$12 sps:$4 sm:$0xff]   ;;  %v1608_v13 = vld [vmem:[%s8448_s6 + $0x2] ss:$0 sm:$0xff] }
  0xf5   : > { %v5684_v18 = vadd.f32 %v5683_v61, %v5682_v59  ;;  %v6337_v59 = vld [vmem:[%s8446_s4 + $0x98] ss:$12 sps:$4 sm:$0xff]   ;;  %v6345_v61 = vld [vmem:[%s8446_s4 + $0x68] ss:$12 sps:$4 sm:$0xff]  }
  0xf6   : > { %v1212_v14 = vadd.f32 %v5662_v8, %v549_v7  ;;  %v6358_v7 = vld [vmem:[%s8446_s4] ss:$12 sps:$4 sm:$0xff]   ;;  %v6361_v8 = vld [vmem:[%s8446_s4 + $0x8] ss:$12 sps:$4 sm:$0xff]  }
  0xf8   : > { %v1253_v21 = vadd.f32 %v5684_v18, %v1212_v14 }
 0x10d   : > { %v5701_v60 = vpop.f32.mrf.mxu0 }
 0x10e   : > { %v5723_v63 = vpop.f32.mrf.mxu1 }
 0x10f   : > { %v5702_v62 = vpop.f32.mrf.mxu0 }
 0x110   : > { %v5724_v1 = vpop.f32.mrf.mxu1  ;;  %v5703_v15 = vadd.f32 %v5702_v62, %v5701_v60  ;;  %v6341_v60 = vld [vmem:[%s8446_s4 + $0x80] ss:$12 sps:$4 sm:$0xff]   ;;  %v6349_v62 = vld [vmem:[%s8446_s4 + $0x50] ss:$12 sps:$4 sm:$0xff]  }
 0x111   : > { %v5704_v0 = vpop.f32.mrf.mxu0  ;;  %v5725_v24 = vadd.f32 %v5724_v1, %v5723_v63  ;;  %v6352_v63 = vld [vmem:[%s8446_s4 + $0x34] ss:$12 sps:$4 sm:$0xff]   ;;  %v6353_v1 = vld [vmem:[%s8446_s4 + $0x38] ss:$12 sps:$4 sm:$0xff]  }
 0x112   : > { %v5726_v4 = vpop.f32.mrf.mxu1  ;;  %v1291_v22 = vadd.f32 %v5703_v15, %v1250_v17  ;;  %1919 = vmatprep.subr.bf16.mxu1 %v6352_v63 }
 0x113   : > { %v5705_v3 = vpop.f32.mrf.mxu0 }
 0x114   : > { %v5727_v9 = vpop.f32.mrf.mxu1  ;;  %v5706_v19 = vadd.f32 %v5705_v3, %v5704_v0  ;;  %v1332_v28 = vadd.f32 %v5725_v24, %v1291_v22  ;;  %v6350_v0 = vld [vmem:[%s8446_s4 + $0x30] ss:$12 sps:$4 sm:$0xff]  }
 0x115   : > { %v5728_v29 = vadd.f32 %v5727_v9, %v5726_v4  ;;  %1920 = vmatpush1.bf16.msra.mxu1 %v6350_v0  ;;  %v6356_v3 = vld [vmem:[%s8446_s4 + $0x1c] ss:$12 sps:$4 sm:$0xff]   ;;  %v6354_v4 = vld [vmem:[%s8446_s4 + $0x18] ss:$12 sps:$4 sm:$0xff]   ;;  %v6710_v9 = vmov 0  }
 0x116   : > { %v1294_v25 = vadd.f32 %v5706_v19, %v1253_v21  ;;  %1921 = vmatprep.subr.bf16.mxu1 %v6356_v3  ;;  %1941 = vmatprep.mubr.bf16.mxu1 %v6710_v9 }
 0x118   : > { %v1335_v31 = vadd.f32 %v5728_v29, %v1294_v25 }
 0x119   : > { %1922 = vmatpush1.bf16.msra.mxu1 %v6354_v4 }
 0x11a   : > { %1923 = vmatprep.subr.bf16.mxu1 %v6360_v6 }
 0x11d   : > { %1924 = vmatpush1.bf16.msra.mxu1 %v6358_v7 }
 0x11e   : > { %6033 = vmatprep.subr.bf16.mxu1 %v6708_v2 }
 0x12d   : > { %v5745_v5 = vpop.f32.mrf.mxu0 }
 0x12e   : > { %v5767_v12 = vpop.f32.mrf.mxu1 }
 0x12f   : > { %v5746_v10 = vpop.f32.mrf.mxu0 }
 0x130   : > { %v5768_v20 = vpop.f32.mrf.mxu1  ;;  %v5747_v26 = vadd.f32 %v5746_v10, %v5745_v5  ;;  %v6357_v5 = vld [vmem:[%s8446_s4 + $0x20] ss:$12 sps:$4 sm:$0xff]  }
 0x131   : > { %v5748_v16 = vpop.f32.mrf.mxu0  ;;  %v5769_v34 = vadd.f32 %v5768_v20, %v5767_v12 }
 0x132   : > { %v5770_v27 = vpop.f32.mrf.mxu1  ;;  %v1373_v32 = vadd.f32 %v5747_v26, %v1332_v28  ;;  %v1999_v26 = vld [vmem:[%s8448_s6 + $0x6] ss:$0 sm:$0xff] }
 0x133   : > { %v5749_v23 = vpop.f32.mrf.mxu0 }
 0x134   : > { %v5750_v30 = vadd.f32 %v5749_v23, %v5748_v16  ;;  %v5771_v33 = vpop.f32.mrf.mxu1  ;;  %v1414_v40 = vadd.f32 %v5769_v34, %v1373_v32 }
 0x135   : > { %v5772_v39 = vadd.f32 %v5771_v33, %v5770_v27  ;;  %v1993_v33 = vld [vmem:[%s8448_s6 + $0x5] ss:$0 sm:$0xff] }
 0x136   : > { %v1376_v35 = vadd.f32 %v5750_v30, %v1335_v31 }
 0x138   : > { %v1417_v45 = vadd.f32 %v5772_v39, %v1376_v35 }
 0x14d   : > { %v1454_v36 = vpop.f32.mrf.mxu0 }
 0x14e   : > { %v1565_v38 = vpop.f32.mrf.mxu1  ;;  %v1455_v43 = vadd.f32 %v1454_v36, %v1414_v40  ;;  %v2003_v36 = vld [vmem:[%s8448_s6 + $0x7] ss:$0 sm:$0xff] }
 0x14f   : > { %v5991_v41 = vpop.f32.mrf.mxu0  ;;  %v1566_v44 = vadd.f32 %v1565_v38, %v1482_v37 }
 0x150   : > { %v6011_v42 = vpop.f32.mrf.mxu1  ;;  %v1461_v52 = vmax.f32 %v1455_v43, 0.0 }
 0x151   : > { %v1457_v46 = vpop.f32.mrf.mxu0  ;;  %v1572_v53 = vmax.f32 %v1566_v44, 0.0 }
 0x152   : > { %v1568_v47 = vpop.f32.mrf.mxu1  ;;  %v1458_v48 = vadd.f32 %v1457_v46, %v1417_v45  ;;  %v7338_v46 = vld [vmem:[%s8444_s2] sm:$0xff] }
 0x153   : > { %v1569_v49 = vadd.f32 %v1568_v47, %v1482_v37  ;;  %v5992_v50 = vpop.f32.mrf.mxu0 }
 0x154   : > { %v6012_v51 = vpop.f32.mrf.mxu1  ;;  %v1462_v54 = vmax.f32 %v1458_v48, 0.0  ;;  %v7344_v50 = vld [vmem:[%s8444_s2 + $0x8] sm:$0xf] }
 0x155   : > { %v1573_v55 = vmax.f32 %v1569_v49, 0.0 }
 0x156   : > { %v1574_v56 = vpack.c.bf16 %v1462_v54, %v1461_v52 }
 0x157   : > { %v1575_v57 = vpack.c.bf16 %v1573_v55, %v1572_v53 }
 0x159   : > { %1737 = vmatprep.mubr.bf16.mxu0 %v1575_v57 }
 0x15a   : > { %1738 = vmatmul.mubr.bf16.vlgmr.msra.gmra.mxu0 %v1574_v56 }
 0x15b   : > { %6014 = vmatpush3.bf16.msra.mxu0 %v6333_v58  ;;  %6029 = vmatprep.mubr.msk.bf16.mxu0 %vm6709_vm0, %v6708_v2 }
 0x15c   : > { %6015 = vmatprep.subr.bf16.mxu0 %v6708_v2 }
 0x15f   : > { %6016 = vmatpush3.bf16.msra.mxu0 %v6337_v59 }
 0x160   : > { %6017 = vmatprep.subr.bf16.mxu0 %v6708_v2 }
 0x163   : > { %6018 = vmatpush3.bf16.msra.mxu0 %v6341_v60 }
 0x164   : > { %6019 = vmatprep.subr.bf16.mxu0 %v6708_v2 }
 0x167   : > { %6020 = vmatpush3.bf16.msra.mxu0 %v6345_v61 }
 0x168   : > { %6021 = vmatprep.subr.bf16.mxu0 %v6708_v2 }
 0x16b   : > { %6022 = vmatpush3.bf16.msra.mxu0 %v6349_v62 }
 0x16c   : > { %6023 = vmatprep.subr.bf16.mxu0 %v6708_v2 }
 0x16f   : > { %6024 = vmatpush3.bf16.msra.mxu0 %v6353_v1 }
 0x170   : > { %6025 = vmatprep.subr.bf16.mxu0 %v6708_v2 }
 0x173   : > { %6026 = vmatpush3.bf16.msra.mxu0 %v6357_v5 }
 0x174   : > { %6027 = vmatprep.subr.bf16.mxu0 %v6708_v2 }
 0x177   : > { %6028 = vmatpush3.bf16.msra.mxu0 %v6361_v8 }
 0x178   : > { %6069 = vmatprep.subr.bf16.mxu0 %v6708_v2 }
 0x21a   : > { %v5807_v10 = vpop.f32.mrf.mxu0 }
 0x21c   : > { %v5808_v11 = vpop.f32.mrf.mxu0 }
 0x21d   : > { %v5809_v12 = vadd.f32 %v5808_v11, %v5807_v10  ;;  %v6362_v10 = vld [vmem:[%s8445_s3 + $0x498] sm:$0xff]  }
 0x21e   : > { %v5810_v14 = vpop.f32.mrf.mxu0 }
 0x21f   : > { %v7302_v16 = vadd.f32 %v5809_v12, %v1608_v13  ;;  %v6363_v12 = vld [vmem:[%s8445_s3 + $0x490] sm:$0xff]  }
 0x220   : > { %v5811_v15 = vpop.f32.mrf.mxu0 }
 0x221   : > { %v5812_v17 = vadd.f32 %v5811_v15, %v5810_v14  ;;  %v1746_v19 = vmax.f32 %v7302_v16, 0.0  ;;  %v6365_v14 = vld [vmem:[%s8445_s3 + $0x480] sm:$0xff]  }
 0x223   : > { %v7304_v18 = vadd.f32 %v5812_v17, %v1608_v13  ;;  %v6364_v13 = vld [vmem:[%s8445_s3 + $0x488] sm:$0xff]  }
 0x225   : > { %v1747_v20 = vmax.f32 %v7304_v18, 0.0  ;;  %v6373_v18 = vld [vmem:[%s8447_s5 + $0xe8] ss:$16 sps:$4 sm:$0xff]  }
 0x227   : > { %v1748_v21 = vpack.c.bf16 %v1747_v20, %v1746_v19 }
 0x229   : > { %1942 = vmatmul.mubr.bf16.vlgmr.msra.gmra.mxu1 %v1748_v21  ;;  %6030 = vmatmul.mubr.bf16.vlgmr.msra.gmra.mxu0 %v1748_v21 }
 0x22a   : > { %6035 = vmatprep.mubr.msk.bf16.mxu1 %vm6709_vm0, %v6708_v2  ;;  %6077 = vmatprep.mubr.msk.bf16.mxu0 %vm6709_vm0, %v6708_v2 }
 0x2e9   : > { %v1943_v22 = vpop.f32.mrf.mxu1  ;;  %v1986_v23 = vpop.f32.mrf.mxu0 }
 0x2ea   : > { %v1994_v37 = vadd.f32 %v1993_v33, %v1943_v22  ;;  %v2004_v40 = vadd.f32 %v2003_v36, %v1986_v23 }
 0x2eb   : > { %v1945_v24 = vpop.f32.mrf.mxu1  ;;  %v6031_v25 = vpop.f32.mrf.mxu0 }
 0x2ec   : > { %v2000_v31 = vadd.f32 %v1999_v26, %v1945_v24  ;;  %v1996_v42 = vmul.f32 0.125, %v1994_v37 }
 0x2ed   : > { %v1947_v27 = vpop.f32.mrf.mxu1  ;;  %v1989_v28 = vpop.f32.mrf.mxu0 }
 0x2ee   : > { %v1995_v34 = vadd.f32 %v1993_v33, %v1947_v27  ;;  %v2005_v38 = vadd.f32 %v2003_v36, %v1989_v28 }
 0x2ef   : > { %v1949_v29 = vpop.f32.mrf.mxu1  ;;  %v6032_v30 = vpop.f32.mrf.mxu0 }
 0x2f0   : > { %v2001_v32 = vadd.f32 %v1999_v26, %v1949_v29  ;;  %v1997_v41 = vmul.f32 0.125, %v1995_v34  ;;  %v7327_v43 = vpack.c.bf16 %v2005_v38, %v2004_v40 }
 0x2f2   : > { %v2002_v35 = vpack.c.bf16 %v2001_v32, %v2000_v31  ;;  %v1998_v44 = vpack.c.bf16 %v1997_v41, %v1996_v42  ;;  %v2086_v45 = vsel %vm2084_vm2, %v7327_v43, 0 }
 0x2f4   : > { %v2013_v39 = vsel %vm2008_vm1, %v2002_v35, 0 }
 0x2f5   : > { %6034 = vmatpush3.bf16.xpose.msra.mxu1 %v2013_v39 }
 0x2f6   : > { %6039 = vmatprep.subr.bf16.mxu1 %v6708_v2 }
 0x2fc   : > { %6036 = vmatmul.mubr.msk.bf16.vlgmr.msra.gmra.mxu1 %vm2008_vm1, %v1998_v44 }
 0x2fd   : > { %6040 = vmatpush3.bf16.msra.mxu1 %v2086_v45  ;;  %6041 = vmatprep.mubr.msk.bf16.mxu1 %vm6709_vm0, %v6708_v2 }
 0x2fe   : > { %6045 = vmatprep.subr.bf16.mxu1 %v6708_v2 }
 0x3bc   : > { %v2049_v47 = vpop.f32.mrf.mxu1 }
 0x3bd   : > { %v2050_v48 = vadd.f32 %v2049_v47, %v7338_v46 }
 0x3be   : > { %v6037_v49 = vpop.f32.mrf.mxu1 }
 0x3bf   : > { %v2057_v51 = vsel %vm2056_vm3, %v2050_v48, -inf }
 0x3c0   : > { %2058 = vmax.xlane.f32.xlu0 %v2057_v51  ;;  %v2052_v52 = vpop.f32.mrf.mxu1  ;;  %v6367_v51 = vld [vmem:[%s8445_s3 + $0x4b0] sm:$0xff]  }
 0x3c1   : > { %v2053_v53 = vadd.f32 %v2052_v52, %v7344_v50 }
 0x3c2   : > { %v6038_v54 = vpop.f32.mrf.mxu1 }
 0x3c3   : > { %v2061_v55 = vsel %vm2060_vm4, %v2053_v53, -inf }
 0x3c4   : > { %2062 = vmax.xlane.f32.xlu0 %v2061_v55 }
 0x3da   : > { %2212 = vrot.lane.b32.xlu0 %v2002_v35, %s6711_s8 }
 0x449   : > { %v2059_v56 = vpop.xlane.xlu0 %2058 }
 0x44a   : > { %v2064_v57 = vsub.f32 %v2050_v48, %v2059_v56 }
 0x44c   : > { %v2066_v58 = vmul.f32 1.442695, %v2064_v57 }
 0x44d   : > { %v2063_v59 = vpop.xlane.xlu0 %2062 }
 0x44e   : > { %6586 = vpow2.f32 %v2066_v58  ;;  %v2065_v60 = vsub.f32 %v2053_v53, %v2063_v59 }
 0x450   : > { %v2068_v61 = vmul.f32 1.442695, %v2065_v60  ;;  %v6368_v60 = vld [vmem:[%s8445_s3 + $0x4a8] sm:$0xff]  }
 0x451   : > { %v2213_v21 = vpop.permute.xlu0 %2212 }
 0x452   : > { %6588 = vpow2.f32 %v2068_v61  ;;  %v2218_v25 = vsel %vm2008_vm1, %v2213_v21, 0  ;;  %v6369_v61 = vld [vmem:[%s8445_s3 + $0x4a0] sm:$0xff]  }
 0x453   : > { %v6370_v21 = vld [vmem:[%s8447_s5 + $0xe0] ss:$16 sps:$4 sm:$0xff]  }
 0x45b   : > { %v6587_v62 = vpop.eup %6586 }
 0x45c   : > { %v2070_v63 = vsel %vm2056_vm3, %v6587_v62, 0.0 }
 0x45d   : > { %2071 = vadd.xlane.f32.xlu1 %v2070_v63 }
 0x45f   : > { %v6589_v0 = vpop.eup %6588 }
 0x460   : > { %v2073_v1 = vsel %vm2060_vm4, %v6589_v0, 0.0 }
 0x461   : > { %2074 = vadd.xlane.f32.xlu1 %v2073_v1 }
 0x472   : > { %2209 = vrot.lane.b32.xlu1 %v1998_v44, %s6711_s8 }
 0x4e6   : > { %v2072_v3 = vpop.xlane.xlu1 %2071 }
 0x4e7   : > { %6590 = vrcp.f32 %v2072_v3 }
 0x4ea   : > { %v2075_v4 = vpop.xlane.xlu1 %2074 }
 0x4eb   : > { %6592 = vrcp.f32 %v2075_v4 }
 0x4ee   : > { %v2210_v26 = vpop.permute.xlu1 %2209 }
 0x4f4   : > { %v6591_v5 = vpop.eup %6590 }
 0x4f5   : > { %v2078_v7 = vmul.f32 %v6591_v5, %v6587_v62  ;;  %v2007_v5 = vld [vmem:[%s8448_s6 + $0x20] ss:$0 sm:$0xff] }
 0x4f8   : > { %v6593_v6 = vpop.eup %6592 }
 0x4f9   : > { %v2079_v8 = vmul.f32 %v6593_v6, %v6589_v0 }
 0x4fb   : > { %v2080_v11 = vpack.c.bf16 %v2079_v8, %v2078_v7 }
 0x4fd   : > { %6042 = vmatmul.mubr.msk.bf16.vlgmr.msra.gmra.mxu1 %vm2056_vm3, %v2080_v11 }
 0x4fe   : > { %6046 = vmatpush3.bf16.msra.mxu1 %v6362_v10  ;;  %6053 = vmatprep.mubr.msk.bf16.mxu1 %vm6709_vm0, %v6708_v2 }
 0x4ff   : > { %6047 = vmatprep.subr.bf16.mxu1 %v6708_v2 }
 0x502   : > { %6048 = vmatpush3.bf16.msra.mxu1 %v6363_v12 }
 0x503   : > { %6049 = vmatprep.subr.bf16.mxu1 %v6708_v2 }
 0x506   : > { %6050 = vmatpush3.bf16.msra.mxu1 %v6364_v13 }
 0x507   : > { %6051 = vmatprep.subr.bf16.mxu1 %v6708_v2 }
 0x50a   : > { %6052 = vmatpush3.bf16.msra.mxu1 %v6365_v14 }
 0x50b   : > { %6057 = vmatprep.subr.bf16.mxu1 %v6708_v2 }
 0x5bd   : > { %v2122_v15 = vpop.f32.mrf.mxu1 }
 0x5bf   : > { %v6043_v17 = vpop.f32.mrf.mxu1 }
 0x5c1   : > { %v2125_v22 = vpop.f32.mrf.mxu1 }
 0x5c2   : > { %v2129_v23 = vpack.c.bf16 %v2125_v22, %v2122_v15  ;;  %v6372_v22 = vld [vmem:[%s8447_s5 + $0xe4] ss:$16 sps:$4 sm:$0xff]  }
 0x5c3   : > { %v6044_v24 = vpop.f32.mrf.mxu1 }
 0x5c4   : > { %6054 = vmatmul.mubr.msk.bf16.vlgmr.msra.gmra.mxu1 %vm2008_vm1, %v2129_v23 }
 0x5c5   : > { %6058 = vmatpush3.bf16.xpose.msra.mxu1 %v2218_v25  ;;  %6059 = vmatprep.mubr.msk.bf16.mxu1 %vm6709_vm0, %v6708_v2 }
 0x5c6   : > { %6063 = vmatprep.subr.bf16.mxu1 %v6708_v2 }
 0x5cc   : > { %6060 = vmatmul.mubr.msk.bf16.vlgmr.msra.gmra.mxu1 %vm2008_vm1, %v2210_v26 }
 0x5cd   : > { %6065 = vmatprep.mubr.msk.bf16.mxu1 %vm6709_vm0, %v6708_v2 }
 0x684   : > { %v7380_v27 = vpop.f32.mrf.mxu1 }
 0x685   : > { %v2206_v11 = vadd.f32 %v7380_v27, %v2007_v5 }
 0x686   : > { %v6055_v28 = vpop.f32.mrf.mxu1 }
 0x688   : > { %v2202_v29 = vpop.f32.mrf.mxu1 }
 0x689   : > { %v2207_v7 = vadd.f32 %v2202_v29, %v2007_v5 }
 0x68a   : > { %v6056_v30 = vpop.f32.mrf.mxu1 }
 0x68b   : > { %v6378_v30 = vld [vmem:[%s8447_s5 + $0xc4] ss:$16 sps:$4 sm:$0xff]  }
 0x68c   : > { %v2254_v31 = vpop.f32.mrf.mxu1 }
 0x68d   : > { %v2255_v32 = vadd.f32 %v2254_v31, %v7338_v46  ;;  %v6381_v31 = vld [vmem:[%s8447_s5 + $0xcc] ss:$16 sps:$4 sm:$0xff]  }
 0x68e   : > { %v6061_v33 = vpop.f32.mrf.mxu1 }
 0x68f   : > { %v2261_v34 = vsel %vm2056_vm3, %v2255_v32, -inf  ;;  %v6379_v33 = vld [vmem:[%s8447_s5 + $0xc8] ss:$16 sps:$4 sm:$0xff]  }
 0x690   : > { %2262 = vmax.xlane.f32.xlu1 %v2261_v34  ;;  %v2257_v35 = vpop.f32.mrf.mxu1  ;;  %v6384_v34 = vld [vmem:[%s8447_s5 + $0xa4] ss:$16 sps:$4 sm:$0xff]  }
 0x691   : > { %v2258_v36 = vadd.f32 %v2257_v35, %v7344_v50  ;;  %v6366_v50 = vld [vmem:[%s8445_s3 + $0x4b8] sm:$0xff]  }
 0x692   : > { %v6062_v37 = vpop.f32.mrf.mxu1  ;;  %6070 = vmatpush3.bf16.msra.mxu0 %v6366_v50  ;;  %v6387_v35 = vld [vmem:[%s8447_s5 + $0xac] ss:$16 sps:$4 sm:$0xff]   ;;  %v6403_v50 = vld [vmem:[%s8447_s5 + $0x48] ss:$16 sps:$4 sm:$0xff]  }
 0x693   : > { %v2264_v38 = vsel %vm2060_vm4, %v2258_v36, -inf  ;;  %6071 = vmatprep.subr.bf16.mxu0 %v6708_v2  ;;  %v6385_v37 = vld [vmem:[%s8447_s5 + $0xa8] ss:$16 sps:$4 sm:$0xff]  }
 0x694   : > { %2265 = vmax.xlane.f32.xlu0 %v2264_v38  ;;  %v6388_v38 = vld [vmem:[%s8447_s5 + $0x80] ss:$16 sps:$4 sm:$0xff]  }
 0x696   : > { %6072 = vmatpush3.bf16.msra.mxu0 %v6367_v51  ;;  %v6408_v51 = vld [vmem:[%s8447_s5 + $0x24] ss:$16 sps:$4 sm:$0xff]  }
 0x697   : > { %6073 = vmatprep.subr.bf16.mxu0 %v6708_v2 }
 0x69a   : > { %6074 = vmatpush3.bf16.msra.mxu0 %v6368_v60 }
 0x69b   : > { %6075 = vmatprep.subr.bf16.mxu0 %v6708_v2 }
 0x69e   : > { %6076 = vmatpush3.bf16.msra.mxu0 %v6369_v61 }
 0x719   : > { %v2263_v39 = vpop.xlane.xlu1 %2262 }
 0x71a   : > { %v2267_v40 = vsub.f32 %v2255_v32, %v2263_v39  ;;  %v6376_v32 = vld [vmem:[%s8447_s5 + $0xc0] ss:$16 sps:$4 sm:$0xff]   ;;  %v6390_v39 = vld [vmem:[%s8447_s5 + $0x84] ss:$16 sps:$4 sm:$0xff]  }
 0x71c   : > { %v2269_v41 = vmul.f32 1.442695, %v2267_v40  ;;  %v6391_v40 = vld [vmem:[%s8447_s5 + $0x88] ss:$16 sps:$4 sm:$0xff]  }
 0x71d   : > { %v2266_v42 = vpop.xlane.xlu0 %2265 }
 0x71e   : > { %6594 = vpow2.f32 %v2269_v41  ;;  %v2268_v44 = vsub.f32 %v2258_v36, %v2266_v42  ;;  %v6382_v36 = vld [vmem:[%s8447_s5 + $0xa0] ss:$16 sps:$4 sm:$0xff]   ;;  %v6393_v41 = vld [vmem:[%s8447_s5 + $0x8c] ss:$16 sps:$4 sm:$0xff]   ;;  %v6396_v42 = vld [vmem:[%s8447_s5 + $0x64] ss:$16 sps:$4 sm:$0xff]  }
 0x720   : > { %v2271_v45 = vmul.f32 1.442695, %v2268_v44  ;;  %v6399_v44 = vld [vmem:[%s8447_s5 + $0x6c] ss:$16 sps:$4 sm:$0xff]  }
 0x722   : > { %6596 = vpow2.f32 %v2271_v45  ;;  %v6394_v45 = vld [vmem:[%s8447_s5 + $0x60] ss:$16 sps:$4 sm:$0xff]  }
 0x72b   : > { %v6595_v46 = vpop.eup %6594 }
 0x72c   : > { %v2273_v47 = vsel %vm2056_vm3, %v6595_v46, 0.0 }
 0x72d   : > { %2274 = vadd.xlane.f32.xlu0 %v2273_v47  ;;  %v6402_v47 = vld [vmem:[%s8447_s5 + $0x44] ss:$16 sps:$4 sm:$0xff]  }
 0x72f   : > { %v6597_v48 = vpop.eup %6596 }
 0x730   : > { %v2276_v49 = vsel %vm2060_vm4, %v6597_v48, 0.0 }
 0x731   : > { %2277 = vadd.xlane.f32.xlu1 %v2276_v49  ;;  %v6400_v49 = vld [vmem:[%s8447_s5 + $0x40] ss:$16 sps:$4 sm:$0xff]  }
 0x743   : > { %2285 = vrot.lane.b32.xlu0 %v7327_v43, %s6711_s8 }
 0x7b6   : > { %v2275_v52 = vpop.xlane.xlu0 %2274 }
 0x7b7   : > { %6598 = vrcp.f32 %v2275_v52  ;;  %v6411_v52 = vld [vmem:[%s8447_s5 + $0x2c] ss:$16 sps:$4 sm:$0xff]  }
 0x7ba   : > { %v2278_v53 = vpop.xlane.xlu1 %2277  ;;  %v2286_v54 = vpop.permute.xlu0 %2285 }
 0x7bb   : > { %6600 = vrcp.f32 %v2278_v53  ;;  %v2291_v43 = vsel %vm2084_vm2, %v2286_v54, 0  ;;  %v6406_v53 = vld [vmem:[%s8447_s5 + $0x20] ss:$16 sps:$4 sm:$0xff]   ;;  %v6409_v54 = vld [vmem:[%s8447_s5 + $0x28] ss:$16 sps:$4 sm:$0xff]  }
 0x7bc   : > { %6064 = vmatpush3.bf16.msra.mxu1 %v2291_v43  ;;  %v6414_v43 = vld [vmem:[%s8447_s5 + $0x4] ss:$16 sps:$4 sm:$0xff]  }
 0x7bd   : > { %2663 = vmatprep.subr.bf16.mxu1 %v6372_v22  ;;  %v6423_v22 = vld [vmem:[%s8445_s3 + $0x5b0] sm:$0xff]  }
 0x7c4   : > { %v6599_v55 = vpop.eup %6598 }
 0x7c5   : > { %v2281_v57 = vmul.f32 %v6599_v55, %v6595_v46  ;;  %v6397_v46 = vld [vmem:[%s8447_s5 + $0x68] ss:$16 sps:$4 sm:$0xff]   ;;  %v6417_v55 = vld [vmem:[%s8447_s5 + $0xc] ss:$16 sps:$4 sm:$0xff]  }
 0x7c8   : > { %v6601_v56 = vpop.eup %6600 }
 0x7c9   : > { %v2282_v58 = vmul.f32 %v6601_v56, %v6597_v48  ;;  %v6405_v48 = vld [vmem:[%s8447_s5 + $0x4c] ss:$16 sps:$4 sm:$0xff]   ;;  %v6412_v56 = vld [vmem:[%s8447_s5] ss:$16 sps:$4 sm:$0xff]  }
 0x7cb   : > { %v2283_v59 = vpack.c.bf16 %v2282_v58, %v2281_v57  ;;  %v6415_v57 = vld [vmem:[%s8447_s5 + $0x8] ss:$16 sps:$4 sm:$0xff]  }
 0x7cd   : > { %6066 = vmatmul.mubr.msk.bf16.vlgmr.msra.gmra.mxu1 %vm2056_vm3, %v2283_v59 }
 0x7ce   : > { %2695 = vmatprep.mubr.bf16.mxu1 %v6710_v9  ;;  %2664 = vmatpush1.bf16.msra.mxu1 %v6370_v21  ;;  %v6422_v21 = vld [vmem:[%s8445_s3 + $0x530] sm:$0xff]  }
 0x7cf   : > { %2665 = vmatprep.subr.bf16.mxu1 %v6378_v30  ;;  %v6435_v30 = vld [vmem:[%s8445_s3 + $0x598] sm:$0xff]  }
 0x7d2   : > { %2666 = vmatpush1.bf16.msra.mxu1 %v6376_v32  ;;  %v6437_v32 = vld [vmem:[%s8445_s3 + $0x558] sm:$0xff]  }
 0x7d3   : > { %2667 = vmatprep.subr.bf16.mxu1 %v6384_v34  ;;  %v6439_v34 = vld [vmem:[%s8445_s3 + $0x590] sm:$0xff]  }
 0x7d6   : > { %2668 = vmatpush1.bf16.msra.mxu1 %v6382_v36  ;;  %v6441_v36 = vld [vmem:[%s8445_s3 + $0x550] sm:$0xff]  }
 0x7d7   : > { %2669 = vmatprep.subr.bf16.mxu1 %v6390_v39  ;;  %v6444_v39 = vld [vmem:[%s8445_s3 + $0x4c8] sm:$0xff]  }
 0x7da   : > { %2670 = vmatpush1.bf16.msra.mxu1 %v6388_v38  ;;  %v6443_v38 = vld [vmem:[%s8445_s3 + $0x588] sm:$0xff]  }
 0x7db   : > { %2671 = vmatprep.subr.bf16.mxu1 %v6396_v42  ;;  %v6447_v42 = vld [vmem:[%s8445_s3 + $0x580] sm:$0xff]  }
 0x7de   : > { %2672 = vmatpush1.bf16.msra.mxu1 %v6394_v45  ;;  %v6449_v45 = vld [vmem:[%s8445_s3 + $0x540] sm:$0xff]  }
 0x7df   : > { %2673 = vmatprep.subr.bf16.mxu1 %v6402_v47 }
 0x7e2   : > { %2674 = vmatpush1.bf16.msra.mxu1 %v6400_v49 }
 0x7e3   : > { %2675 = vmatprep.subr.bf16.mxu1 %v6408_v51 }
 0x7e6   : > { %2676 = vmatpush1.bf16.msra.mxu1 %v6406_v53 }
 0x7e7   : > { %2677 = vmatprep.subr.bf16.mxu1 %v6414_v43 }
 0x7ea   : > { %2678 = vmatpush1.bf16.msra.mxu1 %v6412_v56 }
 0x88d   : > { %v2327_v62 = vpop.f32.mrf.mxu1 }
 0x88f   : > { %v6067_v63 = vpop.f32.mrf.mxu1 }
 0x891   : > { %v2330_v0 = vpop.f32.mrf.mxu1 }
 0x892   : > { %v2334_v1 = vpack.c.bf16 %v2330_v0, %v2327_v62 }
 0x893   : > { %v6068_v3 = vpop.f32.mrf.mxu1 }
 0x894   : > { %6078 = vmatmul.mubr.msk.bf16.vlgmr.msra.gmra.mxu0 %vm2008_vm1, %v2334_v1  ;;  %v2415_v3 = vld [vmem:[%s8448_s6 + $0x21] ss:$0 sm:$0xff] }
 0x895   : > { %2738 = vmatprep.mubr.bf16.mxu0 %v6710_v9 }
 0x954   : > { %v2404_v4 = vpop.f32.mrf.mxu0 }
 0x955   : > { %v2411_v14 = vadd.f32 %v2404_v4, %v2206_v11 }
 0x956   : > { %v6079_v6 = vpop.f32.mrf.mxu0 }
 0x957   : > { %v2413_v17 = vadd.f32 %v2411_v14, %v1746_v19  ;;  %v6419_v14 = vld [vmem:[%s8445_s3 + $0x5b8] sm:$0xff]  }
 0x958   : > { %v2407_v8 = vpop.f32.mrf.mxu0 }
 0x959   : > { %v2412_v10 = vadd.f32 %v2407_v8, %v2207_v7  ;;  %v2416_v7 = vld [vmem:[%s8448_s6 + $0x22] ss:$0 sm:$0xff] }
 0x95a   : > { %v6080_v12 = vpop.f32.mrf.mxu0 }
 0x95b   : > { %v2414_v13 = vadd.f32 %v2412_v10, %v1747_v20  ;;  %v6375_v20 = vld [vmem:[%s8447_s5 + $0xec] ss:$16 sps:$4 sm:$0xff]  }
 0x95c   : > { %2706 = vmatprep.subr.bf16.mxu0 %v6375_v20  ;;  %v6425_v20 = vld [vmem:[%s8445_s3 + $0x570] sm:$0xff]  }
 0x95d   : > { %v2420_v15 = vsel %vm2419_vm5, %v2414_v13, 0.0  ;;  %2707 = vmatpush1.bf16.msra.mxu0 %v6373_v18  ;;  %v6424_v18 = vld [vmem:[%s8445_s3 + $0x4f0] sm:$0xff]  }
 0x95e   : > { %2421 = vadd.xlane.f32.xlu1 %v2420_v15  ;;  %2708 = vmatprep.subr.bf16.mxu0 %v6381_v31  ;;  %v6420_v15 = vld [vmem:[%s8445_s3 + $0x4f8] sm:$0xff]  }
 0x95f   : > { %v6436_v31 = vld [vmem:[%s8445_s3 + $0x4d8] sm:$0xff]  }
 0x961   : > { %2709 = vmatpush1.bf16.msra.mxu0 %v6379_v33  ;;  %v6438_v33 = vld [vmem:[%s8445_s3 + $0x510] sm:$0xff]  }
 0x962   : > { %2417 = vadd.xlane.f32.xlu1 %v2413_v17  ;;  %2710 = vmatprep.subr.bf16.mxu0 %v6387_v35  ;;  %v6440_v35 = vld [vmem:[%s8445_s3 + $0x4d0] sm:$0xff]  }
 0x965   : > { %2711 = vmatpush1.bf16.msra.mxu0 %v6385_v37  ;;  %v6442_v37 = vld [vmem:[%s8445_s3 + $0x508] sm:$0xff]  }
 0x966   : > { %2712 = vmatprep.subr.bf16.mxu0 %v6393_v41  ;;  %v6446_v41 = vld [vmem:[%s8445_s3 + $0x500] sm:$0xff]  }
 0x969   : > { %2713 = vmatpush1.bf16.msra.mxu0 %v6391_v40  ;;  %v6445_v40 = vld [vmem:[%s8445_s3 + $0x548] sm:$0xff]  }
 0x96a   : > { %2714 = vmatprep.subr.bf16.mxu0 %v6399_v44  ;;  %v6448_v44 = vld [vmem:[%s8445_s3 + $0x4c0] sm:$0xff]  }
 0x96d   : > { %2715 = vmatpush1.bf16.msra.mxu0 %v6397_v46  ;;  %v2483_v46 = vlaneseq }
 0x96e   : > { %2716 = vmatprep.subr.bf16.mxu0 %v6405_v48 }
 0x96f   : > { %v7635_v47 = vshrl.u32 %v2483_v46, 7 }
 0x971   : > { %2717 = vmatpush1.bf16.msra.mxu0 %v6403_v50  ;;  %v2485_v48 = vsub.s32 0, %v7635_v47  ;;  %v2493_v49 = vsub.s32 2, %v7635_v47  ;;  %v5389_v50 = vld [vmem:[%s8448_s6 + $0x23] ss:$8 sm:$0xf]  ;;  %v2489_v51 = vsub.s32 1, %v7635_v47 }
 0x972   : > { %2718 = vmatprep.subr.bf16.mxu0 %v6411_v52  ;;  %v2497_v52 = vsub.s32 3, %v7635_v47 }
 0x973   : > { %v2486_v53 = vrot.slane %v5389_v50, %v2485_v48  ;;  %v2490_v56 = vrot.slane %v5389_v50, %v2489_v51 }
 0x975   : > { %2719 = vmatpush1.bf16.msra.mxu0 %v6409_v54  ;;  %v2494_v54 = vrot.slane %v5389_v50, %v2493_v49 }
 0x976   : > { %2720 = vmatprep.subr.bf16.mxu0 %v6417_v55 }
 0x979   : > { %2721 = vmatpush1.bf16.msra.mxu0 %v6415_v57  ;;  %v2498_v57 = vrot.slane %v5389_v50, %v2497_v52 }
 0x97a   : > { %5862 = vmatprep.subr.bf16.mxu0 %v6419_v14 }
 0x9e7   : > { %v2422_v16 = vpop.xlane.xlu1 %2421 }
 0x9e8   : > { %v2425_v19 = vmul.f32 0.0078125, %v2422_v16  ;;  %v6426_v16 = vld [vmem:[%s8445_s3 + $0x528] sm:$0xff]  }
 0x9ea   : > { %v7431_v25 = vsub.f32 %v2414_v13, %v2425_v19  ;;  %v6418_v13 = vld [vmem:[%s8445_s3 + $0x538] sm:$0xff]   ;;  %v6427_v19 = vld [vmem:[%s8445_s3 + $0x5a8] sm:$0xff]  }
 0x9eb   : > { %v2418_v23 = vpop.xlane.xlu1 %2417  ;;  %5840 = vmatprep.subr.bf16.mxu1 %v6418_v13 }
 0x9ec   : > { %v2424_v24 = vmul.f32 0.0078125, %v2418_v23  ;;  %v2429_v28 = vmul.f32 %v7431_v25, %v7431_v25  ;;  %v6428_v23 = vld [vmem:[%s8445_s3 + $0x4e8] sm:$0xff]  }
 0x9ee   : > { %v7433_v26 = vsub.f32 %v2413_v17, %v2424_v24  ;;  %v2432_v29 = vsel %vm2419_vm5, %v2429_v28, 0.0  ;;  %v6421_v17 = vld [vmem:[%s8445_s3 + $0x578] sm:$0xff]   ;;  %v6429_v24 = vld [vmem:[%s8445_s3 + $0x568] sm:$0xff]   ;;  %v6433_v28 = vld [vmem:[%s8445_s3 + $0x560] sm:$0xff]  }
 0x9f0   : > { %v2428_v27 = vmul.f32 %v7433_v26, %v7433_v26 }
 0x9f2   : > { %2430 = vadd.xlane.f32.xlu1 %v2428_v27  ;;  %v6432_v27 = vld [vmem:[%s8445_s3 + $0x4e0] sm:$0xff]  }
 0x9f6   : > { %2433 = vadd.xlane.f32.xlu1 %v2432_v29  ;;  %v6434_v29 = vld [vmem:[%s8445_s3 + $0x518] sm:$0xff]  }
 0xa7b   : > { %v2431_v58 = vpop.xlane.xlu1 %2430 }
 0xa7c   : > { %v2435_v59 = vmul.f32 0.0078125, %v2431_v58 }
 0xa7e   : > { %v2437_v60 = vadd.f32 1e-12, %v2435_v59 }
 0xa7f   : > { %v2434_v61 = vpop.xlane.xlu1 %2433 }
 0xa80   : > { %6602 = vrsqrt.f32 %v2437_v60  ;;  %v2436_v62 = vmul.f32 0.0078125, %v2434_v61 }
 0xa82   : > { %v2438_v63 = vadd.f32 1e-12, %v2436_v62 }
 0xa84   : > { %6604 = vrsqrt.f32 %v2438_v63 }
 0xa8d   : > { %v6603_v0 = vpop.eup %6602 }
 0xa8e   : > { %v2441_v1 = vmul.f32 %v6603_v0, %v7433_v26  ;;  %v6431_v26 = vld [vmem:[%s8445_s3 + $0x5a0] sm:$0xff]  }
 0xa90   : > { %v2443_v6 = vmul.f32 %v2441_v1, %v2415_v3 }
 0xa91   : > { %v6605_v4 = vpop.eup %6604 }
 0xa92   : > { %v2442_v5 = vmul.f32 %v6605_v4, %v7431_v25  ;;  %v7532_v10 = vadd.f32 %v2443_v6, %v2416_v7  ;;  %v6430_v25 = vld [vmem:[%s8445_s3 + $0x520] sm:$0xff]  }
 0xa94   : > { %v2444_v8 = vmul.f32 %v2442_v5, %v2415_v3 }
 0xa96   : > { %v7534_v11 = vadd.f32 %v2444_v8, %v2416_v7 }
 0xa98   : > { %v2447_v12 = vpack.c.bf16 %v7534_v11, %v7532_v10 }
 0xa9a   : > { %2696 = vmatmul.mubr.bf16.vlgmr.msra.gmra.mxu1 %v2447_v12  ;;  %2739 = vmatmul.mubr.bf16.vlgmr.msra.gmra.mxu0 %v2447_v12 }
 0xa9b   : > { %5841 = vmatpush3.bf16.msra.mxu1 %v6420_v15  ;;  %5863 = vmatpush3.bf16.msra.mxu0 %v6421_v17 }
 0xa9c   : > { %5842 = vmatprep.subr.bf16.mxu1 %v6422_v21  ;;  %5864 = vmatprep.subr.bf16.mxu0 %v6423_v22 }
 0xa9f   : > { %5843 = vmatpush3.bf16.msra.mxu1 %v6424_v18  ;;  %5865 = vmatpush3.bf16.msra.mxu0 %v6425_v20 }
 0xaa0   : > { %5844 = vmatprep.subr.bf16.mxu1 %v6426_v16  ;;  %5866 = vmatprep.subr.bf16.mxu0 %v6427_v19 }
 0xaa3   : > { %5845 = vmatpush3.bf16.msra.mxu1 %v6428_v23  ;;  %5867 = vmatpush3.bf16.msra.mxu0 %v6429_v24 }
 0xaa4   : > { %5846 = vmatprep.subr.bf16.mxu1 %v6430_v25  ;;  %5868 = vmatprep.subr.bf16.mxu0 %v6431_v26 }
 0xaa7   : > { %5847 = vmatpush3.bf16.msra.mxu1 %v6432_v27  ;;  %5869 = vmatpush3.bf16.msra.mxu0 %v6433_v28 }
 0xaa8   : > { %5848 = vmatprep.subr.bf16.mxu1 %v6434_v29  ;;  %5870 = vmatprep.subr.bf16.mxu0 %v6435_v30 }
 0xaab   : > { %5849 = vmatpush3.bf16.msra.mxu1 %v6436_v31  ;;  %5871 = vmatpush3.bf16.msra.mxu0 %v6437_v32 }
 0xaac   : > { %5850 = vmatprep.subr.bf16.mxu1 %v6438_v33  ;;  %5872 = vmatprep.subr.bf16.mxu0 %v6439_v34 }
 0xaaf   : > { %5851 = vmatpush3.bf16.msra.mxu1 %v6440_v35  ;;  %5873 = vmatpush3.bf16.msra.mxu0 %v6441_v36 }
 0xab0   : > { %5852 = vmatprep.subr.bf16.mxu1 %v6442_v37  ;;  %5874 = vmatprep.subr.bf16.mxu0 %v6443_v38 }
 0xab3   : > { %5853 = vmatpush3.bf16.msra.mxu1 %v6444_v39  ;;  %5875 = vmatpush3.bf16.msra.mxu0 %v6445_v40 }
 0xab4   : > { %5854 = vmatprep.subr.bf16.mxu1 %v6446_v41  ;;  %5876 = vmatprep.subr.bf16.mxu0 %v6447_v42 }
 0xab7   : > { %5855 = vmatpush3.bf16.msra.mxu1 %v6448_v44  ;;  %5877 = vmatpush3.bf16.msra.mxu0 %v6449_v45 }
 0xab8   : > { %6081 = vmatprep.subr.bf16.mxu0 %v6708_v2 }
 0xb5a   : > { %v2697_v43 = vpop.f32.mrf.mxu1  ;;  %v2740_v55 = vpop.f32.mrf.mxu0 }
 0xb5b   : > { %v7652_v58 = vadd.f32 %v2697_v43, %v2486_v53  ;;  %v7654_v59 = vadd.f32 %v2740_v55, %v2494_v54 }
 0xb5c   : > { %v2699_v60 = vpop.f32.mrf.mxu1  ;;  %v2742_v61 = vpop.f32.mrf.mxu0 }
 0xb5d   : > { %v7657_v62 = vmul.f32 0.70710677, %v7652_v58  ;;  %v7660_v63 = vmul.f32 0.70710677, %v7654_v59  ;;  %v7662_v0 = vadd.f32 %v2699_v60, %v2490_v56  ;;  %v7664_v1 = vadd.f32 %v2742_v61, %v2498_v57 }
 0xb5e   : > { %v2701_v12 = vpop.f32.mrf.mxu1  ;;  %v2744_v20 = vpop.f32.mrf.mxu0 }
 0xb5f   : > { %v2765_v3 = vand.u32 2147483647, %v7657_v62  ;;  %v2767_v4 = vand.u32 2147483647, %v7660_v63  ;;  %v7669_v5 = vmul.f32 0.70710677, %v7662_v0  ;;  %v7676_v18 = vadd.f32 %v2701_v12, %v2486_v53 }
 0xb60   : > { %v7672_v6 = vmul.f32 0.70710677, %v7664_v1  ;;  %v2703_v16 = vpop.f32.mrf.mxu1  ;;  %v7681_v25 = vadd.f32 %v2744_v20, %v2494_v54  ;;  %v2746_v28 = vpop.f32.mrf.mxu0  ;;  %vm2925_vm7 = vcmp.ge.f32.partialorder %v7657_v62, 0.0  ;;  %vm2927_vm9 = vcmp.ge.f32.partialorder %v7660_v63, 0.0 }
 0xb61   : > { %v2773_v7 = vmul.f32 0.3275911, %v2765_v3  ;;  %v2775_v8 = vmul.f32 0.3275911, %v2767_v4  ;;  %v2766_v13 = vand.u32 2147483647, %v7669_v5  ;;  %v7683_v26 = vadd.f32 %v2703_v16, %v2490_v56 }
 0xb62   : > { %v2768_v14 = vand.u32 2147483647, %v7672_v6  ;;  %v7679_v24 = vmul.f32 0.70710677, %v7676_v18  ;;  %v7687_v29 = vmul.f32 0.70710677, %v7681_v25  ;;  %v7693_v33 = vadd.f32 %v2746_v28, %v2498_v57 }
 0xb63   : > { %v2781_v15 = vadd.f32 1.0, %v2773_v7  ;;  %v2783_v17 = vadd.f32 1.0, %v2775_v8  ;;  %v2774_v21 = vmul.f32 0.3275911, %v2766_v13  ;;  %v7690_v31 = vmul.f32 0.70710677, %v7683_v26 }
 0xb64   : > { %v2776_v22 = vmul.f32 0.3275911, %v2768_v14  ;;  %v2769_v27 = vand.u32 2147483647, %v7679_v24  ;;  %v2771_v32 = vand.u32 2147483647, %v7687_v29 }
 0xb65   : > { %6606 = vrcp.f32 %v2781_v15  ;;  %v2782_v19 = vadd.f32 1.0, %v2774_v21  ;;  %v2877_v34 = vsub.f32 0.0, %v2765_v3  ;;  %v2770_v36 = vand.u32 2147483647, %v7690_v31 }
 0xb66   : > { %6608 = vrcp.f32 %v2783_v17  ;;  %v2784_v23 = vadd.f32 1.0, %v2776_v22  ;;  %v2777_v30 = vmul.f32 0.3275911, %v2769_v27  ;;  %v2779_v37 = vmul.f32 0.3275911, %v2771_v32 }
 0xb67   : > { %6610 = vrcp.f32 %v2782_v19  ;;  %v7697_v38 = vmul.f32 0.70710677, %v7693_v33  ;;  %v2879_v39 = vsub.f32 0.0, %v2767_v4  ;;  %v2778_v40 = vmul.f32 0.3275911, %v2770_v36 }
 0xb68   : > { %6612 = vrcp.f32 %v2784_v23  ;;  %v2785_v35 = vadd.f32 1.0, %v2777_v30  ;;  %v2878_v41 = vsub.f32 0.0, %v2766_v13  ;;  %v2787_v42 = vadd.f32 1.0, %v2779_v37 }
 0xb69   : > { %v7700_v44 = vand.u32 2147483647, %v7697_v38  ;;  %v2885_v45 = vmul.f32 %v2877_v34, %v2765_v3  ;;  %v2786_v46 = vadd.f32 1.0, %v2778_v40  ;;  %v2880_v53 = vsub.f32 0.0, %v2768_v14 }
 0xb6a   : > { %6614 = vrcp.f32 %v2785_v35  ;;  %v2887_v56 = vmul.f32 %v2879_v39, %v2767_v4  ;;  %v2886_v60 = vmul.f32 %v2878_v41, %v2766_v13  ;;  %v2881_v61 = vsub.f32 0.0, %v2769_v27 }
 0xb6b   : > { %6616 = vrcp.f32 %v2787_v42  ;;  %v2780_v54 = vmul.f32 0.3275911, %v7700_v44  ;;  %v2893_v3 = vmul.f32 1.442695, %v2885_v45  ;;  %v2888_v17 = vmul.f32 %v2880_v53, %v2768_v14 }
 0xb6c   : > { %6618 = vrcp.f32 %v2786_v46  ;;  %v2883_v21 = vsub.f32 0.0, %v2771_v32  ;;  %v2897_v20 = vmul.f32 1.442695, %v2887_v56  ;;  %v2895_v13 = vmul.f32 1.442695, %v2886_v60 }
 0xb6d   : > { %v2788_v7 = vadd.f32 1.0, %v2780_v54  ;;  %v2889_v23 = vmul.f32 %v2881_v61, %v2769_v27  ;;  %v2882_v28 = vsub.f32 0.0, %v2770_v36  ;;  %v2899_v37 = vmul.f32 1.442695, %v2888_v17 }
 0xb6e   : > { %v2891_v39 = vmul.f32 %v2883_v21, %v2771_v32  ;;  %v2884_v60 = vsub.f32 0.0, %v7700_v44  ;;  %vm2929_vm6 = vcmp.ge.f32.partialorder %v7679_v24, 0.0  ;;  %vm2926_vm8 = vcmp.ge.f32.partialorder %v7669_v5, 0.0 }
 0xb6f   : > { %6620 = vrcp.f32 %v2788_v7  ;;  %v2901_v27 = vmul.f32 1.442695, %v2889_v23  ;;  %v2890_v53 = vmul.f32 %v2882_v28, %v2770_v36  ;;  %vm2928_vm10 = vcmp.ge.f32.partialorder %v7672_v6, 0.0 }
 0xb70   : > { %6622 = vpow2.f32 %v2893_v3  ;;  %v2905_v32 = vmul.f32 1.442695, %v2891_v39  ;;  %v2892_v28 = vmul.f32 %v2884_v60, %v7700_v44  ;;  %vm2931_vm11 = vcmp.ge.f32.partialorder %v7687_v29, 0.0 }
 0xb71   : > { %6624 = vpow2.f32 %v2897_v20  ;;  %vm2930_vm12 = vcmp.ge.f32.partialorder %v7690_v31, 0.0  ;;  %v2749_v6 = vmul.f32 0.5, %v7652_v58  ;;  %vm2932_vm13 = vcmp.ge.f32.partialorder %v7697_v38, 0.0 }
 0xb72   : > { %v7702_v50 = vpop.eup %6606  ;;  %6626 = vpow2.f32 %v2895_v13  ;;  %v2756_v63 = vmul.f32 0.5, %v7693_v33 }
 0xb73   : > { %v7705_v43 = vpop.eup %6608  ;;  %v2805_v55 = vmul.f32 1.0614054, %v7702_v50  ;;  %6628 = vpow2.f32 %v2899_v37 }
 0xb74   : > { %v2807_v57 = vmul.f32 1.0614054, %v7705_v43  ;;  %v7709_v12 = vpop.eup %6610  ;;  %6630 = vpow2.f32 %v2901_v27 }
 0xb75   : > { %v2813_v8 = vadd.f32 -1.4531521, %v2805_v55  ;;  %v2806_v16 = vmul.f32 1.0614054, %v7709_v12  ;;  %v7713_v4 = vpop.eup %6612  ;;  %6632 = vpow2.f32 %v2905_v32 }
 0xb76   : > { %v2815_v15 = vadd.f32 -1.4531521, %v2807_v57  ;;  %v2808_v35 = vmul.f32 1.0614054, %v7713_v4 }
 0xb77   : > { %v2821_v22 = vmul.f32 %v7702_v50, %v2813_v8  ;;  %v2814_v34 = vadd.f32 -1.4531521, %v2806_v16  ;;  %v7719_v45 = vpop.eup %6614 }
 0xb78   : > { %v2823_v19 = vmul.f32 %v7705_v43, %v2815_v15  ;;  %v2816_v42 = vadd.f32 -1.4531521, %v2808_v35  ;;  %v2809_v57 = vmul.f32 1.0614054, %v7719_v45  ;;  %v7725_v61 = vpop.eup %6616 }
 0xb79   : > { %v2829_v30 = vadd.f32 1.4214138, %v2821_v22  ;;  %v2822_v41 = vmul.f32 %v7709_v12, %v2814_v34  ;;  %v7729_v17 = vpop.eup %6618  ;;  %v2811_v21 = vmul.f32 1.0614054, %v7725_v61 }
 0xb7a   : > { %v2831_v14 = vadd.f32 1.4214138, %v2823_v19  ;;  %v2824_v56 = vmul.f32 %v7713_v4, %v2816_v42  ;;  %v2817_v15 = vadd.f32 -1.4531521, %v2809_v57  ;;  %v2903_v19 = vmul.f32 1.442695, %v2890_v53 }
 0xb7b   : > { %v2837_v40 = vmul.f32 %v7702_v50, %v2829_v30  ;;  %v2830_v55 = vadd.f32 1.4214138, %v2822_v41  ;;  %v2819_v13 = vadd.f32 -1.4531521, %v2811_v21  ;;  %v2810_v23 = vmul.f32 1.0614054, %v7729_v17 }
 0xb7c   : > { %v2839_v46 = vmul.f32 %v7705_v43, %v2831_v14  ;;  %v2832_v3 = vadd.f32 1.4214138, %v2824_v56  ;;  %v2825_v16 = vmul.f32 %v7719_v45, %v2817_v15  ;;  %v7736_v30 = vpop.eup %6620  ;;  %6634 = vpow2.f32 %v2903_v19 }
 0xb7d   : > { %v2845_v54 = vadd.f32 -0.28449672, %v2837_v40  ;;  %v2838_v8 = vmul.f32 %v7709_v12, %v2830_v55  ;;  %v2827_v40 = vmul.f32 %v7725_v61, %v2819_v13  ;;  %v2818_v41 = vadd.f32 -1.4531521, %v2810_v23  ;;  %v6623_v57 = vpop.eup %6622 }
 0xb7e   : > { %v2847_v36 = vadd.f32 -0.28449672, %v2839_v46  ;;  %v2840_v20 = vmul.f32 %v7713_v4, %v2832_v3  ;;  %v2833_v37 = vadd.f32 1.4214138, %v2825_v16  ;;  %v2812_v42 = vmul.f32 1.0614054, %v7736_v30  ;;  %v6625_v3 = vpop.eup %6624 }
 0xb7f   : > { %v2853_v7 = vmul.f32 %v7702_v50, %v2845_v54  ;;  %v2846_v22 = vadd.f32 -0.28449672, %v2838_v8  ;;  %v2835_v44 = vadd.f32 1.4214138, %v2827_v40  ;;  %v2826_v54 = vmul.f32 %v7729_v17, %v2818_v41 }
 0xb80   : > { %v2848_v14 = vadd.f32 -0.28449672, %v2840_v20  ;;  %v2855_v39 = vmul.f32 %v7705_v43, %v2847_v36  ;;  %v2841_v53 = vmul.f32 %v7719_v45, %v2833_v37  ;;  %v2820_v55 = vadd.f32 -1.4531521, %v2812_v42  ;;  %v6627_v20 = vpop.eup %6626 }
 0xb81   : > { %v2861_v34 = vadd.f32 0.2548296, %v2853_v7  ;;  %v2854_v35 = vmul.f32 %v7709_v12, %v2846_v22  ;;  %v2907_v56 = vmul.f32 1.442695, %v2892_v28  ;;  %v2843_v36 = vmul.f32 %v7725_v61, %v2835_v44 }
 0xb82   : > { %v2856_v27 = vmul.f32 %v7713_v4, %v2848_v14  ;;  %v2849_v8 = vadd.f32 -0.28449672, %v2841_v53  ;;  %v2863_v15 = vadd.f32 0.2548296, %v2855_v39  ;;  %v2834_v21 = vadd.f32 1.4214138, %v2826_v54 }
 0xb83   : > { %v2862_v46 = vadd.f32 0.2548296, %v2854_v35  ;;  %v2869_v32 = vmul.f32 %v7702_v50, %v2861_v34  ;;  %v2828_v22 = vmul.f32 %v7736_v30, %v2820_v55  ;;  %v2851_v13 = vadd.f32 -0.28449672, %v2843_v36  ;;  %v6629_v50 = vpop.eup %6628 }
 0xb84   : > { %v2864_v7 = vadd.f32 0.2548296, %v2856_v27  ;;  %v2857_v16 = vmul.f32 %v7719_v45, %v2849_v8  ;;  %v2842_v23 = vmul.f32 %v7729_v17, %v2834_v21  ;;  %6636 = vpow2.f32 %v2907_v56  ;;  %v6631_v40 = vpop.eup %6630 }
 0xb85   : > { %v2870_v60 = vmul.f32 %v7709_v12, %v2862_v46  ;;  %v2836_v28 = vadd.f32 1.4214138, %v2828_v22  ;;  %v2909_v34 = vmul.f32 %v6623_v57, %v2869_v32  ;;  %v2871_v14 = vmul.f32 %v7705_v43, %v2863_v15  ;;  %v6633_v44 = vpop.eup %6632 }
 0xb86   : > { %v2872_v12 = vmul.f32 %v7713_v4, %v2864_v7  ;;  %v2865_v35 = vadd.f32 0.2548296, %v2857_v16  ;;  %v2859_v37 = vmul.f32 %v7725_v61, %v2851_v13  ;;  %v2850_v39 = vadd.f32 -0.28449672, %v2842_v23 }
 0xb87   : > { %v2910_v19 = vmul.f32 %v6627_v20, %v2870_v60  ;;  %v2844_v53 = vmul.f32 %v7736_v30, %v2836_v28  ;;  %v2917_v54 = vsub.f32 1.0, %v2909_v34  ;;  %v2911_v57 = vmul.f32 %v6625_v3, %v2871_v14 }
 0xb88   : > { %v2873_v41 = vmul.f32 %v7719_v45, %v2865_v35  ;;  %v2867_v46 = vadd.f32 0.2548296, %v2859_v37  ;;  %v2858_v27 = vmul.f32 %v7729_v17, %v2850_v39  ;;  %v2912_v55 = vmul.f32 %v6629_v50, %v2872_v12 }
 0xb89   : > { %v2918_v42 = vsub.f32 1.0, %v2910_v19  ;;  %v2852_v32 = vadd.f32 -0.28449672, %v2844_v53  ;;  %v6635_v7 = vpop.eup %6634  ;;  %v2933_v36 = vsub.f32 0.0, %v2917_v54  ;;  %v2919_v16 = vsub.f32 1.0, %v2911_v57 }
 0xb8a   : > { %v2913_v4 = vmul.f32 %v6631_v40, %v2873_v41  ;;  %v2875_v56 = vmul.f32 %v7725_v61, %v2867_v46  ;;  %v2866_v43 = vadd.f32 0.2548296, %v2858_v27  ;;  %v2920_v21 = vsub.f32 1.0, %v2912_v55 }
 0xb8b   : > { %v2934_v8 = vsub.f32 0.0, %v2918_v42  ;;  %v2860_v20 = vmul.f32 %v7736_v30, %v2852_v32  ;;  %v2941_v50 = vsel %vm2925_vm7, %v2917_v54, %v2933_v36  ;;  %v2750_v34 = vmul.f32 0.5, %v7662_v0 }
 0xb8c   : > { %v2921_v60 = vsub.f32 1.0, %v2913_v4  ;;  %v2915_v15 = vmul.f32 %v6633_v44, %v2875_v56  ;;  %v2874_v45 = vmul.f32 %v7729_v17, %v2866_v43  ;;  %v2936_v12 = vsub.f32 0.0, %v2920_v21 }
 0xb8d   : > { %v2868_v13 = vadd.f32 0.2548296, %v2860_v20  ;;  %v2942_v23 = vsel %vm2926_vm8, %v2918_v42, %v2934_v8  ;;  %v2935_v14 = vsub.f32 0.0, %v2919_v16  ;;  %v2949_v40 = vadd.f32 1.0, %v2941_v50 }
 0xb8e   : > { %v2937_v22 = vsub.f32 0.0, %v2921_v60  ;;  %v2923_v19 = vsub.f32 1.0, %v2915_v15  ;;  %v2914_v3 = vmul.f32 %v6635_v7, %v2874_v45  ;;  %v2950_v5 = vadd.f32 1.0, %v2942_v23 }
 0xb8f   : > { %v2876_v35 = vmul.f32 %v7736_v30, %v2868_v13  ;;  %v2753_v41 = vmul.f32 0.5, %v7676_v18  ;;  %v2944_v46 = vsel %vm2928_vm10, %v2920_v21, %v2936_v12  ;;  %v2754_v30 = vmul.f32 0.5, %v7683_v26 }
 0xb90   : > { %v2945_v61 = vsel %vm2929_vm6, %v2921_v60, %v2937_v22  ;;  %v2939_v17 = vsub.f32 0.0, %v2923_v19  ;;  %v2922_v28 = vsub.f32 1.0, %v2914_v3  ;;  %v2943_v44 = vsel %vm2927_vm9, %v2919_v16, %v2935_v14  ;;  %v3033_v3 = vld [vmem:[%s8448_s6 + $0x24] ss:$0 sm:$0xff] }
 0xb91   : > { %v6637_v24 = vpop.eup %6636  ;;  %v2953_v62 = vadd.f32 1.0, %v2945_v61  ;;  %v2958_v29 = vmul.f32 %v2950_v5, %v2750_v34  ;;  %v2957_v57 = vmul.f32 %v2949_v40, %v2749_v6  ;;  %v2952_v56 = vadd.f32 1.0, %v2944_v46  ;;  %v6452_v5 = vld [vmem:[%s8446_s4 + $0x16c] ss:$12 sps:$4 sm:$0xff]   ;;  %v6454_v6 = vld [vmem:[%s8446_s4 + $0x150] ss:$12 sps:$4 sm:$0xff]  }
 0xb92   : > { %v2938_v37 = vsub.f32 0.0, %v2922_v28  ;;  %v2916_v39 = vmul.f32 %v6637_v24, %v2876_v35  ;;  %v2947_v42 = vsel %vm2931_vm11, %v2923_v19, %v2939_v17  ;;  %v2951_v18 = vadd.f32 1.0, %v2943_v44  ;;  %3502 = vmatprep.subr.bf16.mxu1 %v6452_v5  ;;  %v6457_v44 = vld [vmem:[%s8446_s4 + $0x158] ss:$12 sps:$4 sm:$0xff]  }
 0xb93   : > { %v2961_v54 = vmul.f32 %v2953_v62, %v2753_v41  ;;  %v2955_v55 = vadd.f32 1.0, %v2947_v42  ;;  %v2755_v43 = vmul.f32 0.5, %v7681_v25  ;;  %v2752_v60 = vmul.f32 0.5, %v7664_v1 }
 0xb94   : > { %v2946_v0 = vsel %vm2930_vm12, %v2922_v28, %v2938_v37  ;;  %v2924_v53 = vsub.f32 1.0, %v2916_v39  ;;  %v2751_v8 = vmul.f32 0.5, %v7654_v59  ;;  %v6450_v37 = vld [vmem:[%s8446_s4 + $0x168] ss:$12 sps:$4 sm:$0xff]   ;;  %v6453_v39 = vld [vmem:[%s8446_s4 + $0x170] ss:$12 sps:$4 sm:$0xff]  }
 0xb95   : > { %v2954_v27 = vadd.f32 1.0, %v2946_v0  ;;  %v2965_v58 = vpack.c.bf16 %v2961_v54, %v2957_v57  ;;  %v2963_v15 = vmul.f32 %v2955_v55, %v2755_v43  ;;  %v2960_v45 = vmul.f32 %v2952_v56, %v2752_v60  ;;  %v6460_v54 = vld [vmem:[%s8446_s4 + $0x13c] ss:$12 sps:$4 sm:$0xff]   ;;  %v6461_v55 = vld [vmem:[%s8446_s4 + $0x140] ss:$12 sps:$4 sm:$0xff]  }
 0xb96   : > { %v2940_v4 = vsub.f32 0.0, %v2924_v53  ;;  %v2959_v21 = vmul.f32 %v2951_v18, %v2751_v8  ;;  %v6465_v57 = vld [vmem:[%s8446_s4 + $0x128] ss:$12 sps:$4 sm:$0xff]   ;;  %v6468_v56 = vld [vmem:[%s8446_s4 + $0x10c] ss:$12 sps:$4 sm:$0xff]  }
 0xb97   : > { %v2962_v31 = vmul.f32 %v2954_v27, %v2754_v30  ;;  %v6466_v18 = vld [vmem:[%s8446_s4 + $0x108] ss:$12 sps:$4 sm:$0xff]   ;;  %v6469_v43 = vld [vmem:[%s8446_s4 + $0x110] ss:$12 sps:$4 sm:$0xff]   ;;  %v6473_v60 = vld [vmem:[%s8446_s4 + $0xf8] ss:$12 sps:$4 sm:$0xff]  }
 0xb98   : > { %v2948_v26 = vsel %vm2932_vm13, %v2924_v53, %v2940_v4  ;;  %v2967_v25 = vpack.c.bf16 %v2963_v15, %v2959_v21  ;;  %v6456_v53 = vld [vmem:[%s8446_s4 + $0x154] ss:$12 sps:$4 sm:$0xff]   ;;  %v6480_v8 = vld [vmem:[%s8446_s4 + $0xc4] ss:$12 sps:$4 sm:$0xff]  }
 0xb99   : > { %v2966_v32 = vpack.c.bf16 %v2962_v31, %v2958_v29  ;;  %v2956_v7 = vadd.f32 1.0, %v2948_v26  ;;  %v6458_v29 = vld [vmem:[%s8446_s4 + $0x138] ss:$12 sps:$4 sm:$0xff]   ;;  %v6462_v4 = vld [vmem:[%s8446_s4 + $0x120] ss:$12 sps:$4 sm:$0xff]  }
 0xb9a   : > { %v6464_v31 = vld [vmem:[%s8446_s4 + $0x124] ss:$12 sps:$4 sm:$0xff]   ;;  %v6472_v26 = vld [vmem:[%s8446_s4 + $0xf4] ss:$12 sps:$4 sm:$0xff]  }
 0xb9b   : > { %3258 = vmatprep.mubr.bf16.mxu1 %v2966_v32  ;;  %v2964_v36 = vmul.f32 %v2956_v7, %v2756_v63  ;;  %v6470_v32 = vld [vmem:[%s8446_s4 + $0xf0] ss:$12 sps:$4 sm:$0xff]   ;;  %v6474_v63 = vld [vmem:[%s8446_s4 + $0xd8] ss:$12 sps:$4 sm:$0xff]   ;;  %v6477_v7 = vld [vmem:[%s8446_s4 + $0xe0] ss:$12 sps:$4 sm:$0xff]  }
 0xb9c   : > { %3259 = vmatmul.mubr.bf16.vlgmr.msra.gmra.mxu1 %v2965_v58  ;;  %v6476_v58 = vld [vmem:[%s8446_s4 + $0xdc] ss:$12 sps:$4 sm:$0xff]   ;;  %v6478_v15 = vld [vmem:[%s8446_s4 + $0xc0] ss:$12 sps:$4 sm:$0xff]  }
 0xb9d   : > { %3534 = vmatprep.mubr.bf16.mxu1 %v6710_v9  ;;  %v2968_v38 = vpack.c.bf16 %v2964_v36, %v2960_v45  ;;  %3503 = vmatpush1.bf16.msra.mxu1 %v6450_v37  ;;  %v6481_v45 = vld [vmem:[%s8446_s4 + $0xc8] ss:$12 sps:$4 sm:$0xff]  }
 0xb9e   : > { %3504 = vmatprep.subr.bf16.mxu1 %v6456_v53 }
 0xb9f   : > { %3299 = vmatprep.mubr.bf16.mxu0 %v2968_v38 }
 0xba0   : > { %3300 = vmatmul.mubr.bf16.vlgmr.msra.gmra.mxu0 %v2967_v25 }
 0xba1   : > { %6097 = vmatprep.mubr.msk.bf16.mxu0 %vm6709_vm0, %v6708_v2  ;;  %6082 = vmatpush3.bf16.msra.mxu0 %v6453_v39 }
 0xba2   : > { %6083 = vmatprep.subr.bf16.mxu0 %v6708_v2  ;;  %3505 = vmatpush1.bf16.msra.mxu1 %v6454_v6 }
 0xba3   : > { %3506 = vmatprep.subr.bf16.mxu1 %v6460_v54 }
 0xba5   : > { %6084 = vmatpush3.bf16.msra.mxu0 %v6457_v44 }
 0xba6   : > { %6085 = vmatprep.subr.bf16.mxu0 %v6708_v2  ;;  %3507 = vmatpush1.bf16.msra.mxu1 %v6458_v29 }
 0xba7   : > { %3508 = vmatprep.subr.bf16.mxu1 %v6464_v31  ;;  %v7919_v31 = vld [vmem:[%s8444_s2] sm:$0xff] }
 0xba9   : > { %6086 = vmatpush3.bf16.msra.mxu0 %v6461_v55 }
 0xbaa   : > { %6087 = vmatprep.subr.bf16.mxu0 %v6708_v2  ;;  %3509 = vmatpush1.bf16.msra.mxu1 %v6462_v4 }
 0xbab   : > { %3510 = vmatprep.subr.bf16.mxu1 %v6468_v56 }
 0xbad   : > { %6088 = vmatpush3.bf16.msra.mxu0 %v6465_v57 }
 0xbae   : > { %6089 = vmatprep.subr.bf16.mxu0 %v6708_v2  ;;  %3511 = vmatpush1.bf16.msra.mxu1 %v6466_v18 }
 0xbaf   : > { %3512 = vmatprep.subr.bf16.mxu1 %v6472_v26 }
 0xbb1   : > { %6090 = vmatpush3.bf16.msra.mxu0 %v6469_v43  ;;  %v7926_v43 = vld [vmem:[%s8444_s2 + $0x8] sm:$0xf] }
 0xbb2   : > { %6091 = vmatprep.subr.bf16.mxu0 %v6708_v2  ;;  %3513 = vmatpush1.bf16.msra.mxu1 %v6470_v32 }
 0xbb3   : > { %3514 = vmatprep.subr.bf16.mxu1 %v6476_v58 }
 0xbb5   : > { %6092 = vmatpush3.bf16.msra.mxu0 %v6473_v60 }
 0xbb6   : > { %6093 = vmatprep.subr.bf16.mxu0 %v6708_v2  ;;  %3515 = vmatpush1.bf16.msra.mxu1 %v6474_v63 }
 0xbb7   : > { %3516 = vmatprep.subr.bf16.mxu1 %v6480_v8 }
 0xbb9   : > { %6094 = vmatpush3.bf16.msra.mxu0 %v6477_v7 }
 0xbba   : > { %6095 = vmatprep.subr.bf16.mxu0 %v6708_v2  ;;  %3517 = vmatpush1.bf16.msra.mxu1 %v6478_v15 }
 0xbbb   : > { %6101 = vmatprep.subr.bf16.mxu1 %v6708_v2 }
 0xbbd   : > { %6096 = vmatpush3.bf16.msra.mxu0 %v6481_v45 }
 0xbbe   : > { %6113 = vmatprep.subr.bf16.mxu0 %v6708_v2 }
 0xc5c   : > { %v5856_v1 = vpop.f32.mrf.mxu1 }
 0xc5e   : > { %v5857_v33 = vpop.f32.mrf.mxu1 }
 0xc5f   : > { %v5858_v61 = vadd.f32 %v5857_v33, %v5856_v1 }
 0xc60   : > { %v5859_v22 = vpop.f32.mrf.mxu1  ;;  %v5878_v20 = vpop.f32.mrf.mxu0 }
 0xc61   : > { %v3261_v50 = vadd.f32 %v5858_v61, %v3033_v3  ;;  %v3311_v61 = vld [vmem:[%s8448_s6 + $0x26] ss:$0 sm:$0xff] }
 0xc62   : > { %v5860_v59 = vpop.f32.mrf.mxu1  ;;  %v5879_v16 = vpop.f32.mrf.mxu0 }
 0xc63   : > { %v5861_v19 = vadd.f32 %v5860_v59, %v5859_v22  ;;  %v5880_v12 = vadd.f32 %v5879_v16, %v5878_v20  ;;  %v3310_v20 = vld [vmem:[%s8448_s6 + $0x25] ss:$0 sm:$0xff] }
 0xc64   : > { %v5881_v13 = vpop.f32.mrf.mxu0 }
 0xc65   : > { %v3264_v23 = vadd.f32 %v5861_v19, %v3033_v3  ;;  %v3302_v24 = vadd.f32 %v5880_v12, %v3261_v50 }
 0xc66   : > { %v5882_v17 = vpop.f32.mrf.mxu0 }
 0xc67   : > { %v5883_v28 = vadd.f32 %v5882_v17, %v5881_v13  ;;  %v3308_v62 = vadd.f32 %v3302_v24, %v7532_v10 }
 0xc69   : > { %v3305_v34 = vadd.f32 %v5883_v28, %v3264_v23 }
 0xc6b   : > { %v3309_v35 = vadd.f32 %v3305_v34, %v7534_v11  ;;  %v3586_v34 = vld [vmem:[%s8448_s6 + $0x27] ss:$0 sm:$0xff] }
 0xc6d   : > { %v3314_v14 = vsel %vm2419_vm5, %v3309_v35, 0.0 }
 0xc6e   : > { %3315 = vadd.xlane.f32.xlu1 %v3314_v14 }
 0xc72   : > { %3312 = vadd.xlane.f32.xlu1 %v3308_v62 }
 0xcf7   : > { %v3316_v11 = vpop.xlane.xlu1 %3315 }
 0xcf8   : > { %v3318_v10 = vmul.f32 0.0078125, %v3316_v11 }
 0xcfa   : > { %v7798_v40 = vsub.f32 %v3309_v35, %v3318_v10 }
 0xcfb   : > { %v3313_v41 = vpop.xlane.xlu1 %3312 }
 0xcfc   : > { %v3317_v42 = vmul.f32 0.0078125, %v3313_v41  ;;  %v3322_v0 = vmul.f32 %v7798_v40, %v7798_v40 }
 0xcfe   : > { %v7802_v46 = vsub.f32 %v3308_v62, %v3317_v42  ;;  %v3325_v30 = vsel %vm2419_vm5, %v3322_v0, 0.0  ;;  %v3592_v62 = vld [vmem:[%s8448_s6 + $0x40] ss:$0 sm:$0xff] }
 0xcff   : > { %3326 = vadd.xlane.f32.xlu1 %v3325_v30 }
 0xd00   : > { %v3321_v27 = vmul.f32 %v7802_v46, %v7802_v46 }
 0xd02   : > { %3323 = vadd.xlane.f32.xlu0 %v3321_v27  ;;  %v3596_v27 = vld [vmem:[%s8448_s6 + $0x41] ss:$0 sm:$0xff] }
 0xd88   : > { %v3327_v36 = vpop.xlane.xlu1 %3326 }
 0xd89   : > { %v3329_v21 = vmul.f32 0.0078125, %v3327_v36 }
 0xd8b   : > { %v3331_v38 = vadd.f32 1e-12, %v3329_v21  ;;  %v3324_v25 = vpop.xlane.xlu0 %3323 }
 0xd8c   : > { %v3328_v1 = vmul.f32 0.0078125, %v3324_v25 }
 0xd8d   : > { %6638 = vrsqrt.f32 %v3331_v38 }
 0xd8e   : > { %v3330_v33 = vadd.f32 1e-12, %v3328_v1  ;;  %v6482_v1 = vld [vmem:[%s8445_s3 + $0x5d8] sm:$0xff]  }
 0xd90   : > { %6640 = vrsqrt.f32 %v3330_v33  ;;  %v6483_v33 = vld [vmem:[%s8445_s3 + $0x5d0] sm:$0xff]  }
 0xd9a   : > { %v6639_v22 = vpop.eup %6638 }
 0xd9b   : > { %v3335_v59 = vmul.f32 %v6639_v22, %v7798_v40 }
 0xd9d   : > { %v6641_v16 = vpop.eup %6640  ;;  %v3337_v3 = vmul.f32 %v3335_v59, %v3310_v20 }
 0xd9e   : > { %v3334_v19 = vmul.f32 %v6641_v16, %v7802_v46 }
 0xd9f   : > { %v7888_v17 = vadd.f32 %v3337_v3, %v3311_v61 }
 0xda0   : > { %v3336_v13 = vmul.f32 %v3334_v19, %v3310_v20 }
 0xda2   : > { %v7886_v23 = vadd.f32 %v3336_v13, %v3311_v61 }
 0xda4   : > { %v3340_v28 = vpack.c.bf16 %v7888_v17, %v7886_v23 }
 0xda6   : > { %3535 = vmatmul.mubr.bf16.vlgmr.msra.gmra.mxu1 %v3340_v28  ;;  %6098 = vmatmul.mubr.bf16.vlgmr.msra.gmra.mxu0 %v3340_v28 }
 0xda7   : > { %6103 = vmatprep.mubr.msk.bf16.mxu1 %vm6709_vm0, %v6708_v2  ;;  %6121 = vmatprep.mubr.msk.bf16.mxu0 %vm6709_vm0, %v6708_v2 }
 0xda8   : > { %6114 = vmatpush3.bf16.msra.mxu0 %v6482_v1 }
 0xda9   : > { %6115 = vmatprep.subr.bf16.mxu0 %v6708_v2 }
 0xdac   : > { %6116 = vmatpush3.bf16.msra.mxu0 %v6483_v33 }
 0xdad   : > { %6117 = vmatprep.subr.bf16.mxu0 %v6708_v2 }
 0xe66   : > { %v3536_v50 = vpop.f32.mrf.mxu1  ;;  %v3579_v12 = vpop.f32.mrf.mxu0 }
 0xe67   : > { %v3587_v14 = vadd.f32 %v3586_v34, %v3536_v50  ;;  %v3597_v44 = vadd.f32 %v3596_v27, %v3579_v12  ;;  %v6485_v12 = vld [vmem:[%s8445_s3 + $0x5c0] sm:$0xff]  }
 0xe68   : > { %v3538_v35 = vpop.f32.mrf.mxu1  ;;  %v6099_v24 = vpop.f32.mrf.mxu0 }
 0xe69   : > { %v3589_v40 = vmul.f32 0.125, %v3587_v14  ;;  %v3593_v41 = vadd.f32 %v3592_v62, %v3538_v35 }
 0xe6a   : > { %v3540_v37 = vpop.f32.mrf.mxu1  ;;  %v3582_v5 = vpop.f32.mrf.mxu0 }
 0xe6b   : > { %v3588_v39 = vadd.f32 %v3586_v34, %v3540_v37  ;;  %v3598_v53 = vadd.f32 %v3596_v27, %v3582_v5  ;;  %v6484_v34 = vld [vmem:[%s8445_s3 + $0x5c8] sm:$0xff]  }
 0xe6c   : > { %v3542_v11 = vpop.f32.mrf.mxu1  ;;  %v6100_v10 = vpop.f32.mrf.mxu0  ;;  %6118 = vmatpush3.bf16.msra.mxu0 %v6484_v34 }
 0xe6d   : > { %v3590_v42 = vmul.f32 0.125, %v3588_v39  ;;  %v3594_v0 = vadd.f32 %v3592_v62, %v3542_v11  ;;  %v7908_v54 = vpack.c.bf16 %v3598_v53, %v3597_v44  ;;  %6119 = vmatprep.subr.bf16.mxu0 %v6708_v2 }
 0xe6f   : > { %v3591_v46 = vpack.c.bf16 %v3590_v42, %v3589_v40  ;;  %v3595_v30 = vpack.c.bf16 %v3594_v0, %v3593_v41  ;;  %v3675_v29 = vsel %vm2084_vm2, %v7908_v54, 0 }
 0xe70   : > { %6120 = vmatpush3.bf16.msra.mxu0 %v6485_v12 }
 0xe71   : > { %3798 = vrot.lane.b32.xlu0 %v3591_v46, %s6711_s8  ;;  %v3605_v6 = vsel %vm2008_vm1, %v3595_v30, 0  ;;  %6137 = vmatprep.subr.bf16.mxu0 %v6708_v2 }
 0xe72   : > { %6102 = vmatpush3.bf16.xpose.msra.mxu1 %v3605_v6 }
 0xe73   : > { %6107 = vmatprep.subr.bf16.mxu1 %v6708_v2 }
 0xe79   : > { %6104 = vmatmul.mubr.msk.bf16.vlgmr.msra.gmra.mxu1 %vm2008_vm1, %v3591_v46 }
 0xe7a   : > { %6108 = vmatpush3.bf16.msra.mxu1 %v3675_v29  ;;  %6109 = vmatprep.mubr.msk.bf16.mxu1 %vm6709_vm0, %v6708_v2 }
 0xe7b   : > { %6125 = vmatprep.subr.bf16.mxu1 %v6708_v2 }
 0xee3   : > { %v3799_v50 = vpop.permute.xlu0 %3798 }
 0xf39   : > { %v3641_v55 = vpop.f32.mrf.mxu1 }
 0xf3a   : > { %v3642_v4 = vadd.f32 %v7919_v31, %v3641_v55 }
 0xf3b   : > { %v6105_v57 = vpop.f32.mrf.mxu1 }
 0xf3c   : > { %v3648_v56 = vsel %vm2056_vm3, %v3642_v4, -inf }
 0xf3d   : > { %3649 = vmax.xlane.f32.xlu1 %v3648_v56  ;;  %v3644_v18 = vpop.f32.mrf.mxu1 }
 0xf3e   : > { %v3645_v26 = vadd.f32 %v7926_v43, %v3644_v18  ;;  %v6486_v18 = vld [vmem:[%s8445_s3 + $0x5f8] sm:$0xff]  }
 0xf3f   : > { %v6106_v32 = vpop.f32.mrf.mxu1 }
 0xf40   : > { %v3651_v60 = vsel %vm2060_vm4, %v3645_v26, -inf }
 0xf41   : > { %3652 = vmax.xlane.f32.xlu1 %v3651_v60 }
 0xfc6   : > { %v3650_v58 = vpop.xlane.xlu1 %3649 }
 0xfc7   : > { %v3654_v63 = vsub.f32 %v3642_v4, %v3650_v58 }
 0xfc9   : > { %v3656_v7 = vmul.f32 1.442695, %v3654_v63 }
 0xfca   : > { %v3653_v8 = vpop.xlane.xlu1 %3652 }
 0xfcb   : > { %6642 = vpow2.f32 %v3656_v7  ;;  %v3655_v15 = vsub.f32 %v3645_v26, %v3653_v8  ;;  %v6487_v26 = vld [vmem:[%s8445_s3 + $0x5f0] sm:$0xff]  }
 0xfcd   : > { %v3658_v45 = vmul.f32 1.442695, %v3655_v15 }
 0xfcf   : > { %6644 = vpow2.f32 %v3658_v45 }
 0xfd8   : > { %v6643_v36 = vpop.eup %6642 }
 0xfd9   : > { %v3660_v21 = vsel %vm2056_vm3, %v6643_v36, 0.0 }
 0xfda   : > { %3661 = vadd.xlane.f32.xlu1 %v3660_v21  ;;  %v6488_v21 = vld [vmem:[%s8445_s3 + $0x5e8] sm:$0xff]  }
 0xfdc   : > { %v6645_v38 = vpop.eup %6644 }
 0xfdd   : > { %v3663_v25 = vsel %vm2060_vm4, %v6645_v38, 0.0 }
 0xfde   : > { %3664 = vadd.xlane.f32.xlu1 %v3663_v25 }
 0xfef   : > { %3801 = vrot.lane.b32.xlu1 %v3595_v30, %s6711_s8 }
0x1063   : > { %v3662_v22 = vpop.xlane.xlu1 %3661 }
0x1064   : > { %6646 = vrcp.f32 %v3662_v22 }
0x1067   : > { %v3665_v20 = vpop.xlane.xlu1 %3664 }
0x1068   : > { %6648 = vrcp.f32 %v3665_v20 }
0x106b   : > { %v3802_v61 = vpop.permute.xlu1 %3801 }
0x106c   : > { %v3807_v28 = vsel %vm2008_vm1, %v3802_v61, 0 }
0x1071   : > { %v6647_v59 = vpop.eup %6646 }
0x1072   : > { %v3668_v19 = vmul.f32 %v6647_v59, %v6643_v36 }
0x1075   : > { %v6649_v16 = vpop.eup %6648 }
0x1076   : > { %v3669_v3 = vmul.f32 %v6649_v16, %v6645_v38  ;;  %v6489_v38 = vld [vmem:[%s8445_s3 + $0x5e0] sm:$0xff]  }
0x1077   : > { %v3600_v16 = vld [vmem:[%s8448_s6 + $0x42] ss:$0 sm:$0xff] }
0x1078   : > { %v3670_v13 = vpack.c.bf16 %v3669_v3, %v3668_v19 }
0x107a   : > { %6110 = vmatmul.mubr.msk.bf16.vlgmr.msra.gmra.mxu1 %vm2056_vm3, %v3670_v13 }
0x107b   : > { %6126 = vmatpush3.bf16.xpose.msra.mxu1 %v3807_v28  ;;  %6127 = vmatprep.mubr.msk.bf16.mxu1 %vm6709_vm0, %v6708_v2 }
0x107c   : > { %6131 = vmatprep.subr.bf16.mxu1 %v6708_v2 }
0x1082   : > { %6128 = vmatmul.mubr.msk.bf16.vlgmr.msra.gmra.mxu1 %vm2008_vm1, %v3799_v50 }
0x1083   : > { %6133 = vmatprep.mubr.msk.bf16.mxu1 %vm6709_vm0, %v6708_v2 }
0x113a   : > { %v3711_v35 = vpop.f32.mrf.mxu1 }
0x113c   : > { %v6111_v24 = vpop.f32.mrf.mxu1 }
0x113e   : > { %v3714_v14 = vpop.f32.mrf.mxu1 }
0x113f   : > { %v3718_v62 = vpack.c.bf16 %v3714_v14, %v3711_v35  ;;  %v6492_v14 = vld [vmem:[%s8447_s5 + $0x1e4] ss:$16 sps:$4 sm:$0xff]  }
0x1140   : > { %v6112_v37 = vpop.f32.mrf.mxu1 }
0x1141   : > { %6122 = vmatmul.mubr.msk.bf16.vlgmr.msra.gmra.mxu0 %vm2008_vm1, %v3718_v62  ;;  %v6493_v62 = vld [vmem:[%s8447_s5 + $0x1e8] ss:$16 sps:$4 sm:$0xff]  }
0x1142   : > { %v3843_v5 = vpop.f32.mrf.mxu1  ;;  %6145 = vmatprep.mubr.msk.bf16.mxu0 %vm6709_vm0, %v6708_v2  ;;  %6138 = vmatpush3.bf16.msra.mxu0 %v6486_v18  ;;  %v6519_v18 = vld [vmem:[%s8447_s5 + $0x16c] ss:$16 sps:$4 sm:$0xff]  }
0x1143   : > { %v3844_v39 = vadd.f32 %v7919_v31, %v3843_v5  ;;  %6139 = vmatprep.subr.bf16.mxu0 %v6708_v2 }
0x1144   : > { %v6129_v11 = vpop.f32.mrf.mxu1 }
0x1145   : > { %v3850_v10 = vsel %vm2056_vm3, %v3844_v39, -inf }
0x1146   : > { %3851 = vmax.xlane.f32.xlu1 %v3850_v10  ;;  %v3846_v40 = vpop.f32.mrf.mxu1  ;;  %6140 = vmatpush3.bf16.msra.mxu0 %v6487_v26  ;;  %v6517_v26 = vld [vmem:[%s8447_s5 + $0x168] ss:$16 sps:$4 sm:$0xff]  }
0x1147   : > { %v3847_v41 = vadd.f32 %v7926_v43, %v3846_v40  ;;  %6141 = vmatprep.subr.bf16.mxu0 %v6708_v2 }
0x1148   : > { %v6130_v42 = vpop.f32.mrf.mxu1 }
0x1149   : > { %v3853_v0 = vsel %vm2060_vm4, %v3847_v41, -inf }
0x114a   : > { %3854 = vmax.xlane.f32.xlu0 %v3853_v0  ;;  %6142 = vmatpush3.bf16.msra.mxu0 %v6488_v21  ;;  %v6498_v0 = vld [vmem:[%s8447_s5 + $0x1c4] ss:$16 sps:$4 sm:$0xff]   ;;  %v6532_v21 = vld [vmem:[%s8447_s5 + $0x100] ss:$16 sps:$4 sm:$0xff]  }
0x114b   : > { %6143 = vmatprep.subr.bf16.mxu0 %v6708_v2 }
0x114e   : > { %6144 = vmatpush3.bf16.msra.mxu0 %v6489_v38  ;;  %v6535_v38 = vld [vmem:[%s8447_s5 + $0x108] ss:$16 sps:$4 sm:$0xff]  }
0x11cf   : > { %v3852_v46 = vpop.xlane.xlu1 %3851 }
0x11d0   : > { %v3856_v30 = vsub.f32 %v3844_v39, %v3852_v46  ;;  %v6501_v46 = vld [vmem:[%s8447_s5 + $0x1cc] ss:$16 sps:$4 sm:$0xff]  }
0x11d2   : > { %v3858_v27 = vmul.f32 1.442695, %v3856_v30  ;;  %v6496_v30 = vld [vmem:[%s8447_s5 + $0x1c0] ss:$16 sps:$4 sm:$0xff]  }
0x11d3   : > { %v3855_v53 = vpop.xlane.xlu0 %3854 }
0x11d4   : > { %6650 = vpow2.f32 %v3858_v27  ;;  %v3857_v6 = vsub.f32 %v3847_v41, %v3855_v53  ;;  %v6499_v27 = vld [vmem:[%s8447_s5 + $0x1c8] ss:$16 sps:$4 sm:$0xff]   ;;  %v6504_v53 = vld [vmem:[%s8447_s5 + $0x1a4] ss:$16 sps:$4 sm:$0xff]  }
0x11d6   : > { %v3860_v44 = vmul.f32 1.442695, %v3857_v6  ;;  %v6507_v6 = vld [vmem:[%s8447_s5 + $0x1ac] ss:$16 sps:$4 sm:$0xff]  }
0x11d8   : > { %6652 = vpow2.f32 %v3860_v44  ;;  %v6502_v44 = vld [vmem:[%s8447_s5 + $0x1a0] ss:$16 sps:$4 sm:$0xff]  }
0x11e1   : > { %v6651_v29 = vpop.eup %6650 }
0x11e2   : > { %v3862_v55 = vsel %vm2056_vm3, %v6651_v29, 0.0 }
0x11e3   : > { %3863 = vadd.xlane.f32.xlu1 %v3862_v55  ;;  %v6510_v55 = vld [vmem:[%s8447_s5 + $0x184] ss:$16 sps:$4 sm:$0xff]  }
0x11e5   : > { %v6653_v31 = vpop.eup %6652 }
0x11e6   : > { %v3865_v4 = vsel %vm2060_vm4, %v6653_v31, 0.0 }
0x11e7   : > { %3866 = vadd.xlane.f32.xlu1 %v3865_v4  ;;  %v6511_v4 = vld [vmem:[%s8447_s5 + $0x188] ss:$16 sps:$4 sm:$0xff]  }
0x11f8   : > { %3874 = vrot.lane.b32.xlu1 %v7908_v54, %s6711_s8 }
0x1201   : > { %v3788_v57 = vpop.f32.mrf.mxu0 }
0x1202   : > { %v3795_v28 = vadd.f32 %v3788_v57, %v3600_v16  ;;  %v6513_v57 = vld [vmem:[%s8447_s5 + $0x18c] ss:$16 sps:$4 sm:$0xff]  }
0x1203   : > { %v6123_v56 = vpop.f32.mrf.mxu0 }
0x1204   : > { %v6516_v56 = vld [vmem:[%s8447_s5 + $0x164] ss:$16 sps:$4 sm:$0xff]  }
0x1205   : > { %v3791_v43 = vpop.f32.mrf.mxu0 }
0x1206   : > { %v3796_v3 = vadd.f32 %v3791_v43, %v3600_v16  ;;  %v6514_v43 = vld [vmem:[%s8447_s5 + $0x160] ss:$16 sps:$4 sm:$0xff]  }
0x1207   : > { %v6124_v32 = vpop.f32.mrf.mxu0 }
0x1208   : > { %v6522_v32 = vld [vmem:[%s8447_s5 + $0x144] ss:$16 sps:$4 sm:$0xff]  }
0x126c   : > { %v3864_v60 = vpop.xlane.xlu1 %3863 }
0x126d   : > { %6654 = vrcp.f32 %v3864_v60  ;;  %v6525_v60 = vld [vmem:[%s8447_s5 + $0x14c] ss:$16 sps:$4 sm:$0xff]  }
0x1270   : > { %v3867_v54 = vpop.xlane.xlu1 %3866 }
0x1271   : > { %6656 = vrcp.f32 %v3867_v54  ;;  %v6520_v54 = vld [vmem:[%s8447_s5 + $0x140] ss:$16 sps:$4 sm:$0xff]  }
0x1274   : > { %v3875_v58 = vpop.permute.xlu1 %3874 }
0x1275   : > { %v3880_v63 = vsel %vm2084_vm2, %v3875_v58, 0  ;;  %v6523_v58 = vld [vmem:[%s8447_s5 + $0x148] ss:$16 sps:$4 sm:$0xff]  }
0x1276   : > { %6132 = vmatpush3.bf16.msra.mxu1 %v3880_v63  ;;  %v6528_v63 = vld [vmem:[%s8447_s5 + $0x124] ss:$16 sps:$4 sm:$0xff]  }
0x1277   : > { %4251 = vmatprep.subr.bf16.mxu1 %v6492_v14  ;;  %v6539_v14 = vld [vmem:[%s8445_s3 + $0x6f8] sm:$0xff]  }
0x127a   : > { %v6655_v7 = vpop.eup %6654 }
0x127b   : > { %v3870_v15 = vmul.f32 %v6655_v7, %v6651_v29  ;;  %v6505_v29 = vld [vmem:[%s8447_s5 + $0x1a8] ss:$16 sps:$4 sm:$0xff]   ;;  %v6531_v7 = vld [vmem:[%s8447_s5 + $0x12c] ss:$16 sps:$4 sm:$0xff]  }
0x127e   : > { %v6657_v8 = vpop.eup %6656 }
0x127f   : > { %v3871_v45 = vmul.f32 %v6657_v8, %v6653_v31  ;;  %v6508_v31 = vld [vmem:[%s8447_s5 + $0x180] ss:$16 sps:$4 sm:$0xff]  }
0x1280   : > { %v6526_v8 = vld [vmem:[%s8447_s5 + $0x120] ss:$16 sps:$4 sm:$0xff]  }
0x1281   : > { %v3872_v36 = vpack.c.bf16 %v3871_v45, %v3870_v15  ;;  %v6529_v15 = vld [vmem:[%s8447_s5 + $0x128] ss:$16 sps:$4 sm:$0xff]   ;;  %v6534_v45 = vld [vmem:[%s8447_s5 + $0x104] ss:$16 sps:$4 sm:$0xff]  }
0x1283   : > { %6134 = vmatmul.mubr.msk.bf16.vlgmr.msra.gmra.mxu1 %vm2056_vm3, %v3872_v36  ;;  %v6537_v36 = vld [vmem:[%s8447_s5 + $0x10c] ss:$16 sps:$4 sm:$0xff]  }
0x1284   : > { %4283 = vmatprep.mubr.bf16.mxu1 %v6710_v9 }
0x1343   : > { %v3916_v25 = vpop.f32.mrf.mxu1 }
0x1345   : > { %v6135_v1 = vpop.f32.mrf.mxu1 }
0x1347   : > { %v3919_v33 = vpop.f32.mrf.mxu1 }
0x1348   : > { %v3923_v22 = vpack.c.bf16 %v3919_v33, %v3916_v25 }
0x1349   : > { %v6136_v20 = vpop.f32.mrf.mxu1 }
0x134a   : > { %6146 = vmatmul.mubr.msk.bf16.vlgmr.msra.gmra.mxu0 %vm2008_vm1, %v3923_v22 }
0x134b   : > { %4326 = vmatprep.mubr.bf16.mxu0 %v6710_v9  ;;  %v6490_v9 = vld [vmem:[%s8447_s5 + $0x1e0] ss:$16 sps:$4 sm:$0xff]  }
0x134c   : > { %4252 = vmatpush1.bf16.msra.mxu1 %v6490_v9  ;;  %v6538_v9 = vld [vmem:[%s8445_s3 + $0x678] sm:$0xff]  }
0x134d   : > { %4253 = vmatprep.subr.bf16.mxu1 %v6498_v0  ;;  %v6551_v0 = vld [vmem:[%s8445_s3 + $0x6e0] sm:$0xff]  }
0x1350   : > { %4254 = vmatpush1.bf16.msra.mxu1 %v6496_v30  ;;  %v6553_v30 = vld [vmem:[%s8445_s3 + $0x6a0] sm:$0xff]  }
0x1351   : > { %4255 = vmatprep.subr.bf16.mxu1 %v6504_v53  ;;  %v6555_v53 = vld [vmem:[%s8445_s3 + $0x6d8] sm:$0xff]  }
0x1354   : > { %4256 = vmatpush1.bf16.msra.mxu1 %v6502_v44  ;;  %v6557_v44 = vld [vmem:[%s8445_s3 + $0x698] sm:$0xff]  }
0x1355   : > { %4257 = vmatprep.subr.bf16.mxu1 %v6510_v55  ;;  %v6559_v55 = vld [vmem:[%s8445_s3 + $0x6d0] sm:$0xff]  }
0x1358   : > { %4258 = vmatpush1.bf16.msra.mxu1 %v6508_v31  ;;  %v6560_v31 = vld [vmem:[%s8445_s3 + $0x610] sm:$0xff]  }
0x1359   : > { %4259 = vmatprep.subr.bf16.mxu1 %v6516_v56  ;;  %v6563_v56 = vld [vmem:[%s8445_s3 + $0x6c8] sm:$0xff]  }
0x135c   : > { %4260 = vmatpush1.bf16.msra.mxu1 %v6514_v43  ;;  %v6565_v43 = vld [vmem:[%s8445_s3 + $0x688] sm:$0xff]  }
0x135d   : > { %4261 = vmatprep.subr.bf16.mxu1 %v6522_v32  ;;  %v6567_v32 = vld [vmem:[%s8445_s3 + $0x6c0] sm:$0xff]  }
0x1360   : > { %4262 = vmatpush1.bf16.msra.mxu1 %v6520_v54  ;;  %v6569_v54 = vld [vmem:[%s8445_s3 + $0x680] sm:$0xff]  }
0x1361   : > { %4263 = vmatprep.subr.bf16.mxu1 %v6528_v63 }
0x1364   : > { %4264 = vmatpush1.bf16.msra.mxu1 %v6526_v8 }
0x1365   : > { %4265 = vmatprep.subr.bf16.mxu1 %v6534_v45 }
0x1368   : > { %4266 = vmatpush1.bf16.msra.mxu1 %v6532_v21 }
0x1369   : > { %5911 = vmatprep.subr.bf16.mxu1 %v6538_v9 }
0x140a   : > { %v3993_v59 = vpop.f32.mrf.mxu0 }
0x140b   : > { %v4000_v12 = vadd.f32 %v3993_v59, %v3795_v28 }
0x140c   : > { %v6147_v19 = vpop.f32.mrf.mxu0 }
0x140d   : > { %v4002_v24 = vadd.f32 %v4000_v12, %v7886_v23 }
0x140e   : > { %v3996_v61 = vpop.f32.mrf.mxu0 }
0x140f   : > { %v4001_v13 = vadd.f32 %v3996_v61, %v3796_v3  ;;  %v4004_v3 = vld [vmem:[%s8448_s6 + $0x43] ss:$0 sm:$0xff] }
0x1410   : > { %v6148_v50 = vpop.f32.mrf.mxu0 }
0x1411   : > { %v4003_v34 = vadd.f32 %v4001_v13, %v7888_v17  ;;  %v6495_v17 = vld [vmem:[%s8447_s5 + $0x1ec] ss:$16 sps:$4 sm:$0xff]   ;;  %v4005_v50 = vld [vmem:[%s8448_s6 + $0x44] ss:$0 sm:$0xff] }
0x1412   : > { %4294 = vmatprep.subr.bf16.mxu0 %v6495_v17  ;;  %v6541_v17 = vld [vmem:[%s8445_s3 + $0x6b8] sm:$0xff]  }
0x1413   : > { %v4008_v35 = vsel %vm2419_vm5, %v4003_v34, 0.0  ;;  %4295 = vmatpush1.bf16.msra.mxu0 %v6493_v62  ;;  %v6540_v62 = vld [vmem:[%s8445_s3 + $0x638] sm:$0xff]  }
0x1414   : > { %4009 = vadd.xlane.f32.xlu0 %v4008_v35  ;;  %4296 = vmatprep.subr.bf16.mxu0 %v6501_v46  ;;  %v6552_v46 = vld [vmem:[%s8445_s3 + $0x620] sm:$0xff]  }
0x1417   : > { %4297 = vmatpush1.bf16.msra.mxu0 %v6499_v27  ;;  %v6554_v27 = vld [vmem:[%s8445_s3 + $0x658] sm:$0xff]  }
0x1418   : > { %4006 = vadd.xlane.f32.xlu0 %v4002_v24  ;;  %4298 = vmatprep.subr.bf16.mxu0 %v6507_v6  ;;  %v6556_v6 = vld [vmem:[%s8445_s3 + $0x618] sm:$0xff]  }
0x141b   : > { %4299 = vmatpush1.bf16.msra.mxu0 %v6505_v29  ;;  %v6558_v29 = vld [vmem:[%s8445_s3 + $0x650] sm:$0xff]  }
0x141c   : > { %4300 = vmatprep.subr.bf16.mxu0 %v6513_v57  ;;  %v6562_v57 = vld [vmem:[%s8445_s3 + $0x648] sm:$0xff]  }
0x141f   : > { %4301 = vmatpush1.bf16.msra.mxu0 %v6511_v4  ;;  %v6561_v4 = vld [vmem:[%s8445_s3 + $0x690] sm:$0xff]  }
0x1420   : > { %4302 = vmatprep.subr.bf16.mxu0 %v6519_v18  ;;  %v6564_v18 = vld [vmem:[%s8445_s3 + $0x608] sm:$0xff]  }
0x1423   : > { %4303 = vmatpush1.bf16.msra.mxu0 %v6517_v26  ;;  %v6566_v26 = vld [vmem:[%s8445_s3 + $0x640] sm:$0xff]  }
0x1424   : > { %4304 = vmatprep.subr.bf16.mxu0 %v6525_v60  ;;  %v6568_v60 = vld [vmem:[%s8445_s3 + $0x600] sm:$0xff]  }
0x1427   : > { %4305 = vmatpush1.bf16.msra.mxu0 %v6523_v58  ;;  %v5556_v58 = vld [vmem:[%s8448_s6 + $0x45] ss:$8 sm:$0xf] }
0x1428   : > { %4306 = vmatprep.subr.bf16.mxu0 %v6531_v7  ;;  %v4074_v63 = vrot.slane %v5556_v58, %v2485_v48  ;;  %v4082_v7 = vrot.slane %v5556_v58, %v2493_v49  ;;  %v4078_v45 = vrot.slane %v5556_v58, %v2489_v51 }
0x142b   : > { %4307 = vmatpush1.bf16.msra.mxu0 %v6529_v15 }
0x142c   : > { %4308 = vmatprep.subr.bf16.mxu0 %v6537_v36  ;;  %v4086_v36 = vrot.slane %v5556_v58, %v2497_v52 }
0x142f   : > { %4309 = vmatpush1.bf16.msra.mxu0 %v6535_v38 }
0x1430   : > { %5933 = vmatprep.subr.bf16.mxu0 %v6539_v14 }
0x149d   : > { %v4010_v23 = vpop.xlane.xlu0 %4009 }
0x149e   : > { %v4012_v37 = vmul.f32 0.0078125, %v4010_v23  ;;  %v6542_v23 = vld [vmem:[%s8445_s3 + $0x670] sm:$0xff]  }
0x14a0   : > { %v8006_v11 = vsub.f32 %v4003_v34, %v4012_v37  ;;  %v6543_v37 = vld [vmem:[%s8445_s3 + $0x6f0] sm:$0xff]  }
0x14a1   : > { %v4007_v5 = vpop.xlane.xlu0 %4006 }
0x14a2   : > { %v4011_v39 = vmul.f32 0.0078125, %v4007_v5  ;;  %v4016_v41 = vmul.f32 %v8006_v11, %v8006_v11  ;;  %v6544_v5 = vld [vmem:[%s8445_s3 + $0x630] sm:$0xff]  }
0x14a4   : > { %v8008_v10 = vsub.f32 %v4002_v24, %v4011_v39  ;;  %v4019_v42 = vsel %vm2419_vm5, %v4016_v41, 0.0  ;;  %v6545_v39 = vld [vmem:[%s8445_s3 + $0x6b0] sm:$0xff]   ;;  %v6549_v41 = vld [vmem:[%s8445_s3 + $0x6a8] sm:$0xff]  }
0x14a6   : > { %v4015_v40 = vmul.f32 %v8008_v10, %v8008_v10 }
0x14a8   : > { %4017 = vadd.xlane.f32.xlu0 %v4015_v40  ;;  %v6548_v40 = vld [vmem:[%s8445_s3 + $0x628] sm:$0xff]  }
0x14ac   : > { %4020 = vadd.xlane.f32.xlu0 %v4019_v42  ;;  %v6550_v42 = vld [vmem:[%s8445_s3 + $0x660] sm:$0xff]  }
0x1531   : > { %v4018_v25 = vpop.xlane.xlu0 %4017 }
0x1532   : > { %v4022_v1 = vmul.f32 0.0078125, %v4018_v25 }
0x1534   : > { %v4024_v33 = vadd.f32 1e-12, %v4022_v1 }
0x1535   : > { %v4021_v22 = vpop.xlane.xlu0 %4020 }
0x1536   : > { %6658 = vrsqrt.f32 %v4024_v33  ;;  %v4023_v20 = vmul.f32 0.0078125, %v4021_v22 }
0x1538   : > { %v4025_v59 = vadd.f32 1e-12, %v4023_v20 }
0x153a   : > { %6660 = vrsqrt.f32 %v4025_v59 }
0x1543   : > { %v6659_v16 = vpop.eup %6658 }
0x1544   : > { %v4028_v19 = vmul.f32 %v6659_v16, %v8008_v10  ;;  %v6547_v10 = vld [vmem:[%s8445_s3 + $0x6e8] sm:$0xff]  }
0x1546   : > { %v4030_v28 = vmul.f32 %v4028_v19, %v4004_v3 }
0x1547   : > { %v6661_v61 = vpop.eup %6660 }
0x1548   : > { %v4029_v13 = vmul.f32 %v6661_v61, %v8006_v11  ;;  %v8107_v12 = vadd.f32 %v4030_v28, %v4005_v50  ;;  %v6546_v11 = vld [vmem:[%s8445_s3 + $0x668] sm:$0xff]  }
0x154a   : > { %v4031_v34 = vmul.f32 %v4029_v13, %v4004_v3 }
0x154c   : > { %v8109_v35 = vadd.f32 %v4031_v34, %v4005_v50 }
0x154e   : > { %v4034_v24 = vpack.c.bf16 %v8109_v35, %v8107_v12 }
0x1550   : > { %4284 = vmatmul.mubr.bf16.vlgmr.msra.gmra.mxu1 %v4034_v24  ;;  %4327 = vmatmul.mubr.bf16.vlgmr.msra.gmra.mxu0 %v4034_v24 }
0x1551   : > { %5912 = vmatpush3.bf16.msra.mxu1 %v6540_v62  ;;  %5934 = vmatpush3.bf16.msra.mxu0 %v6541_v17 }
0x1552   : > { %5913 = vmatprep.subr.bf16.mxu1 %v6542_v23  ;;  %5935 = vmatprep.subr.bf16.mxu0 %v6543_v37 }
0x1555   : > { %5914 = vmatpush3.bf16.msra.mxu1 %v6544_v5  ;;  %5936 = vmatpush3.bf16.msra.mxu0 %v6545_v39 }
0x1556   : > { %5915 = vmatprep.subr.bf16.mxu1 %v6546_v11  ;;  %5937 = vmatprep.subr.bf16.mxu0 %v6547_v10 }
0x1559   : > { %5916 = vmatpush3.bf16.msra.mxu1 %v6548_v40  ;;  %5938 = vmatpush3.bf16.msra.mxu0 %v6549_v41 }
0x155a   : > { %5917 = vmatprep.subr.bf16.mxu1 %v6550_v42  ;;  %5939 = vmatprep.subr.bf16.mxu0 %v6551_v0 }
0x155d   : > { %5918 = vmatpush3.bf16.msra.mxu1 %v6552_v46  ;;  %5940 = vmatpush3.bf16.msra.mxu0 %v6553_v30 }
0x155e   : > { %5919 = vmatprep.subr.bf16.mxu1 %v6554_v27  ;;  %5941 = vmatprep.subr.bf16.mxu0 %v6555_v53 }
0x1561   : > { %5920 = vmatpush3.bf16.msra.mxu1 %v6556_v6  ;;  %5942 = vmatpush3.bf16.msra.mxu0 %v6557_v44 }
0x1562   : > { %5921 = vmatprep.subr.bf16.mxu1 %v6558_v29  ;;  %5943 = vmatprep.subr.bf16.mxu0 %v6559_v55 }
0x1565   : > { %5922 = vmatpush3.bf16.msra.mxu1 %v6560_v31  ;;  %5944 = vmatpush3.bf16.msra.mxu0 %v6561_v4 }
0x1566   : > { %5923 = vmatprep.subr.bf16.mxu1 %v6562_v57  ;;  %5945 = vmatprep.subr.bf16.mxu0 %v6563_v56 }
0x1569   : > { %5924 = vmatpush3.bf16.msra.mxu1 %v6564_v18  ;;  %5946 = vmatpush3.bf16.msra.mxu0 %v6565_v43 }
0x156a   : > { %5925 = vmatprep.subr.bf16.mxu1 %v6566_v26  ;;  %5947 = vmatprep.subr.bf16.mxu0 %v6567_v32 }
0x156d   : > { %5926 = vmatpush3.bf16.msra.mxu1 %v6568_v60  ;;  %5948 = vmatpush3.bf16.msra.mxu0 %v6569_v54 }
0x156e   : > { %6149 = vmatprep.subr.bf16.mxu1 %v6708_v2  ;;  %6169 = vmatprep.subr.bf16.mxu0 %v6708_v2 }
0x1610   : > { %v4285_v8 = vpop.f32.mrf.mxu1  ;;  %v4328_v15 = vpop.f32.mrf.mxu0 }
0x1611   : > { %v8222_v21 = vadd.f32 %v4285_v8, %v4074_v63  ;;  %v8224_v38 = vadd.f32 %v4328_v15, %v4082_v7 }
0x1612   : > { %v4287_v25 = vpop.f32.mrf.mxu1  ;;  %v4330_v1 = vpop.f32.mrf.mxu0 }
0x1613   : > { %v8227_v33 = vmul.f32 0.70710677, %v8222_v21  ;;  %v8230_v48 = vmul.f32 0.70710677, %v8224_v38  ;;  %v8232_v49 = vadd.f32 %v4287_v25, %v4078_v45  ;;  %v8234_v22 = vadd.f32 %v4330_v1, %v4086_v36 }
0x1614   : > { %v4289_v19 = vpop.f32.mrf.mxu1  ;;  %v4332_v9 = vpop.f32.mrf.mxu0 }
0x1615   : > { %v4353_v51 = vand.u32 2147483647, %v8227_v33  ;;  %v4355_v47 = vand.u32 2147483647, %v8230_v48  ;;  %v8239_v52 = vmul.f32 0.70710677, %v8232_v49  ;;  %v8246_v24 = vadd.f32 %v4289_v19, %v4074_v63 }
0x1616   : > { %v8242_v20 = vmul.f32 0.70710677, %v8234_v22  ;;  %v4291_v14 = vpop.f32.mrf.mxu1  ;;  %v8251_v37 = vadd.f32 %v4332_v9, %v4082_v7  ;;  %v4334_v11 = vpop.f32.mrf.mxu0  ;;  %vm4513_vm15 = vcmp.ge.f32.partialorder %v8227_v33, 0.0  ;;  %vm4515_vm2 = vcmp.ge.f32.partialorder %v8230_v48, 0.0 }
0x1617   : > { %v4361_v59 = vmul.f32 0.3275911, %v4353_v51  ;;  %v4363_v16 = vmul.f32 0.3275911, %v4355_v47  ;;  %v4354_v3 = vand.u32 2147483647, %v8239_v52  ;;  %v8253_v5 = vadd.f32 %v4291_v14, %v4078_v45 }
0x1618   : > { %v4356_v61 = vand.u32 2147483647, %v8242_v20  ;;  %v8249_v23 = vmul.f32 0.70710677, %v8246_v24  ;;  %v8257_v10 = vmul.f32 0.70710677, %v8251_v37  ;;  %v8263_v0 = vadd.f32 %v4334_v11, %v4086_v36 }
0x1619   : > { %v4369_v13 = vadd.f32 1.0, %v4361_v59  ;;  %v4371_v28 = vadd.f32 1.0, %v4363_v16  ;;  %v4362_v50 = vmul.f32 0.3275911, %v4354_v3  ;;  %v8260_v41 = vmul.f32 0.70710677, %v8253_v5 }
0x161a   : > { %v4364_v34 = vmul.f32 0.3275911, %v4356_v61  ;;  %v4357_v39 = vand.u32 2147483647, %v8249_v23  ;;  %v4359_v42 = vand.u32 2147483647, %v8257_v10 }
0x161b   : > { %6662 = vrcp.f32 %v4369_v13  ;;  %v4370_v62 = vadd.f32 1.0, %v4362_v50  ;;  %v4465_v46 = vsub.f32 0.0, %v4353_v51  ;;  %v4358_v27 = vand.u32 2147483647, %v8260_v41 }
0x161c   : > { %6664 = vrcp.f32 %v4371_v28  ;;  %v4372_v17 = vadd.f32 1.0, %v4364_v34  ;;  %v4365_v40 = vmul.f32 0.3275911, %v4357_v39  ;;  %v4367_v53 = vmul.f32 0.3275911, %v4359_v42 }
0x161d   : > { %6666 = vrcp.f32 %v4370_v62  ;;  %v8267_v6 = vmul.f32 0.70710677, %v8263_v0  ;;  %v4467_v44 = vsub.f32 0.0, %v4355_v47  ;;  %v4366_v29 = vmul.f32 0.3275911, %v4358_v27 }
0x161e   : > { %6668 = vrcp.f32 %v4372_v17  ;;  %v4373_v30 = vadd.f32 1.0, %v4365_v40  ;;  %v4466_v55 = vsub.f32 0.0, %v4354_v3  ;;  %v4375_v31 = vadd.f32 1.0, %v4367_v53 }
0x161f   : > { %v8270_v4 = vand.u32 2147483647, %v8267_v6  ;;  %v4473_v57 = vmul.f32 %v4465_v46, %v4353_v51  ;;  %v4374_v56 = vadd.f32 1.0, %v4366_v29  ;;  %v4468_v43 = vsub.f32 0.0, %v4356_v61 }
0x1620   : > { %6670 = vrcp.f32 %v4373_v30  ;;  %v4475_v54 = vmul.f32 %v4467_v44, %v4355_v47  ;;  %v4474_v63 = vmul.f32 %v4466_v55, %v4354_v3  ;;  %v4469_v7 = vsub.f32 0.0, %v4357_v39 }
0x1621   : > { %6672 = vrcp.f32 %v4375_v31  ;;  %v4368_v26 = vmul.f32 0.3275911, %v8270_v4  ;;  %v4481_v45 = vmul.f32 1.442695, %v4473_v57  ;;  %v4476_v1 = vmul.f32 %v4468_v43, %v4356_v61 }
0x1622   : > { %6674 = vrcp.f32 %v4374_v56  ;;  %v4471_v51 = vsub.f32 0.0, %v4359_v42  ;;  %v4485_v16 = vmul.f32 1.442695, %v4475_v54  ;;  %v4483_v3 = vmul.f32 1.442695, %v4474_v63 }
0x1623   : > { %v4376_v8 = vadd.f32 1.0, %v4368_v26  ;;  %v4477_v28 = vmul.f32 %v4469_v7, %v4357_v39  ;;  %v4470_v50 = vsub.f32 0.0, %v4358_v27  ;;  %v4487_v62 = vmul.f32 1.442695, %v4476_v1 }
0x1624   : > { %v4479_v17 = vmul.f32 %v4471_v51, %v4359_v42  ;;  %v4472_v56 = vsub.f32 0.0, %v8270_v4  ;;  %vm4517_vm14 = vcmp.ge.f32.partialorder %v8249_v23, 0.0  ;;  %vm4514_vm1 = vcmp.ge.f32.partialorder %v8239_v52, 0.0 }
0x1625   : > { %6676 = vrcp.f32 %v4376_v8  ;;  %v4489_v39 = vmul.f32 1.442695, %v4477_v28  ;;  %v4478_v44 = vmul.f32 %v4470_v50, %v4358_v27  ;;  %vm4516_vm3 = vcmp.ge.f32.partialorder %v8242_v20, 0.0 }
0x1626   : > { %6678 = vpow2.f32 %v4481_v45  ;;  %v4493_v42 = vmul.f32 1.442695, %v4479_v17  ;;  %vm4519_vm4 = vcmp.ge.f32.partialorder %v8257_v10, 0.0  ;;  %vm4518_vm6 = vcmp.ge.f32.partialorder %v8260_v41, 0.0 }
0x1627   : > { %6680 = vpow2.f32 %v4485_v16  ;;  %v4337_v20 = vmul.f32 0.5, %v8222_v21  ;;  %vm4520_vm7 = vcmp.ge.f32.partialorder %v8267_v6, 0.0  ;;  %v4344_v48 = vmul.f32 0.5, %v8263_v0 }
0x1628   : > { %v8272_v18 = vpop.eup %6662  ;;  %6682 = vpow2.f32 %v4483_v3 }
0x1629   : > { %v8275_v32 = vpop.eup %6664  ;;  %v4393_v60 = vmul.f32 1.0614054, %v8272_v18  ;;  %6684 = vpow2.f32 %v4487_v62 }
0x162a   : > { %v4395_v58 = vmul.f32 1.0614054, %v8275_v32  ;;  %v8279_v36 = vpop.eup %6666  ;;  %6686 = vpow2.f32 %v4489_v39 }
0x162b   : > { %v4401_v15 = vadd.f32 -1.4531521, %v4393_v60  ;;  %v4394_v19 = vmul.f32 1.0614054, %v8279_v36  ;;  %v8283_v47 = vpop.eup %6668  ;;  %6688 = vpow2.f32 %v4493_v42 }
0x162c   : > { %v4403_v25 = vadd.f32 -1.4531521, %v4395_v58  ;;  %v4396_v14 = vmul.f32 1.0614054, %v8283_v47 }
0x162d   : > { %v4409_v59 = vmul.f32 %v8272_v18, %v4401_v15  ;;  %v4402_v9 = vadd.f32 -1.4531521, %v4394_v19  ;;  %v8289_v30 = vpop.eup %6670 }
0x162e   : > { %v4411_v13 = vmul.f32 %v8275_v32, %v4403_v25  ;;  %v4404_v46 = vadd.f32 -1.4531521, %v4396_v14  ;;  %v4397_v57 = vmul.f32 1.0614054, %v8289_v30  ;;  %v8295_v43 = vpop.eup %6672  ;;  %v4491_v25 = vmul.f32 1.442695, %v4478_v44 }
0x162f   : > { %v4417_v34 = vadd.f32 1.4214138, %v4409_v59  ;;  %v4410_v40 = vmul.f32 %v8279_v36, %v4402_v9  ;;  %v8299_v63 = vpop.eup %6674  ;;  %v4399_v7 = vmul.f32 1.0614054, %v8295_v43  ;;  %v4480_v59 = vmul.f32 %v4472_v56, %v8270_v4 }
0x1630   : > { %v4419_v61 = vadd.f32 1.4214138, %v4411_v13  ;;  %v4412_v31 = vmul.f32 %v8283_v47, %v4404_v46  ;;  %v4405_v58 = vadd.f32 -1.4531521, %v4397_v57  ;;  %v4398_v51 = vmul.f32 1.0614054, %v8299_v63 }
0x1631   : > { %v4425_v11 = vmul.f32 %v8272_v18, %v4417_v34  ;;  %v4418_v55 = vadd.f32 1.4214138, %v4410_v40  ;;  %v4407_v1 = vadd.f32 -1.4531521, %v4399_v7  ;;  %6690 = vpow2.f32 %v4491_v25 }
0x1632   : > { %v4427_v53 = vmul.f32 %v8275_v32, %v4419_v61  ;;  %v4420_v54 = vadd.f32 1.4214138, %v4412_v31  ;;  %v4413_v45 = vmul.f32 %v8289_v30, %v4405_v58  ;;  %v8306_v16 = vpop.eup %6676  ;;  %v4406_v9 = vadd.f32 -1.4531521, %v4398_v51 }
0x1633   : > { %v4433_v29 = vadd.f32 -0.28449672, %v4425_v11  ;;  %v4426_v60 = vmul.f32 %v8279_v36, %v4418_v55  ;;  %v4415_v34 = vmul.f32 %v8295_v43, %v4407_v1  ;;  %v4400_v14 = vmul.f32 1.0614054, %v8306_v16 }
0x1634   : > { %v4435_v27 = vadd.f32 -0.28449672, %v4427_v53  ;;  %v4428_v15 = vmul.f32 %v8283_v47, %v4420_v54  ;;  %v4421_v28 = vadd.f32 1.4214138, %v4413_v45  ;;  %v4414_v11 = vmul.f32 %v8299_v63, %v4406_v9  ;;  %v6679_v53 = vpop.eup %6678 }
0x1635   : > { %v4441_v26 = vmul.f32 %v8272_v18, %v4433_v29  ;;  %v4434_v8 = vadd.f32 -0.28449672, %v4426_v60  ;;  %v4423_v4 = vadd.f32 1.4214138, %v4415_v34  ;;  %v4408_v40 = vadd.f32 -1.4531521, %v4400_v14  ;;  %v6681_v31 = vpop.eup %6680 }
0x1636   : > { %v4436_v3 = vadd.f32 -0.28449672, %v4428_v15  ;;  %v4443_v50 = vmul.f32 %v8275_v32, %v4435_v27  ;;  %v4429_v17 = vmul.f32 %v8289_v30, %v4421_v28  ;;  %v4495_v46 = vmul.f32 1.442695, %v4480_v59  ;;  %v6683_v60 = vpop.eup %6682 }
0x1637   : > { %v4449_v19 = vadd.f32 0.2548296, %v4441_v26  ;;  %v4442_v13 = vmul.f32 %v8279_v36, %v4434_v8  ;;  %v4431_v42 = vmul.f32 %v8295_v43, %v4423_v4  ;;  %v4422_v56 = vadd.f32 1.4214138, %v4414_v11 }
0x1638   : > { %v4444_v62 = vmul.f32 %v8283_v47, %v4436_v3  ;;  %v4437_v55 = vadd.f32 -0.28449672, %v4429_v17  ;;  %v4451_v57 = vadd.f32 0.2548296, %v4443_v50  ;;  %v4416_v26 = vmul.f32 %v8306_v16, %v4408_v40 }
0x1639   : > { %v4450_v61 = vadd.f32 0.2548296, %v4442_v13  ;;  %v4457_v39 = vmul.f32 %v8272_v18, %v4449_v19  ;;  %v4439_v27 = vadd.f32 -0.28449672, %v4431_v42  ;;  %v4430_v7 = vmul.f32 %v8299_v63, %v4422_v56  ;;  %v6685_v18 = vpop.eup %6684 }
0x163a   : > { %v4452_v29 = vadd.f32 0.2548296, %v4444_v62  ;;  %v4445_v54 = vmul.f32 %v8289_v30, %v4437_v55  ;;  %v4424_v8 = vadd.f32 1.4214138, %v4416_v26  ;;  %6692 = vpow2.f32 %v4495_v46  ;;  %v6687_v59 = vpop.eup %6686 }
0x163b   : > { %v4458_v44 = vmul.f32 %v8279_v36, %v4450_v61  ;;  %v4497_v15 = vmul.f32 %v6679_v53, %v4457_v39  ;;  %v4459_v25 = vmul.f32 %v8275_v32, %v4451_v57  ;;  %v4447_v1 = vmul.f32 %v8295_v43, %v4439_v27  ;;  %v6689_v34 = vpop.eup %6688 }
0x163c   : > { %v4460_v36 = vmul.f32 %v8283_v47, %v4452_v29  ;;  %v4453_v45 = vadd.f32 0.2548296, %v4445_v54  ;;  %v4438_v51 = vadd.f32 -0.28449672, %v4430_v7  ;;  %v4432_v50 = vmul.f32 %v8306_v16, %v4424_v8 }
0x163d   : > { %v4498_v58 = vmul.f32 %v6683_v60, %v4458_v44  ;;  %v4455_v3 = vadd.f32 0.2548296, %v4447_v1  ;;  %v4505_v9 = vsub.f32 1.0, %v4497_v15  ;;  %v4499_v61 = vmul.f32 %v6681_v31, %v4459_v25 }
0x163e   : > { %v4461_v19 = vmul.f32 %v8289_v30, %v4453_v45  ;;  %v4446_v28 = vmul.f32 %v8299_v63, %v4438_v51  ;;  %v4500_v14 = vmul.f32 %v6685_v18, %v4460_v36  ;;  %v4440_v17 = vadd.f32 -0.28449672, %v4432_v50  ;;  %v6691_v11 = vpop.eup %6690 }
0x163f   : > { %v4506_v13 = vsub.f32 1.0, %v4498_v58  ;;  %v4463_v62 = vmul.f32 %v8295_v43, %v4455_v3  ;;  %v4521_v53 = vsub.f32 0.0, %v4505_v9  ;;  %v4507_v55 = vsub.f32 1.0, %v4499_v61 }
0x1640   : > { %v4501_v47 = vmul.f32 %v6687_v59, %v4461_v19  ;;  %v4454_v32 = vadd.f32 0.2548296, %v4446_v28  ;;  %v4508_v39 = vsub.f32 1.0, %v4500_v14  ;;  %v4448_v29 = vmul.f32 %v8306_v16, %v4440_v17 }
0x1641   : > { %v4522_v40 = vsub.f32 0.0, %v4506_v13  ;;  %v4503_v46 = vmul.f32 %v6689_v34, %v4463_v62  ;;  %v4529_v60 = vsel %vm4513_vm15, %v4505_v9, %v4521_v53  ;;  %v4338_v54 = vmul.f32 0.5, %v8232_v49 }
0x1642   : > { %v4509_v4 = vsub.f32 1.0, %v4501_v47  ;;  %v4462_v30 = vmul.f32 %v8299_v63, %v4454_v32  ;;  %v4456_v42 = vadd.f32 0.2548296, %v4448_v29  ;;  %v4524_v58 = vsub.f32 0.0, %v4508_v39 }
0x1643   : > { %v4511_v57 = vsub.f32 1.0, %v4503_v46  ;;  %v4530_v56 = vsel %vm4514_vm1, %v4506_v13, %v4522_v40  ;;  %v4523_v7 = vsub.f32 0.0, %v4507_v55  ;;  %v4537_v15 = vadd.f32 1.0, %v4529_v60 }
0x1644   : > { %v4525_v44 = vsub.f32 0.0, %v4509_v4  ;;  %v4502_v31 = vmul.f32 %v6691_v11, %v4462_v30  ;;  %v4464_v27 = vmul.f32 %v8306_v16, %v4456_v42  ;;  %v4538_v52 = vadd.f32 1.0, %v4530_v56 }
0x1645   : > { %v4527_v63 = vsub.f32 0.0, %v4511_v57  ;;  %v4341_v36 = vmul.f32 0.5, %v8246_v24  ;;  %v4532_v25 = vsel %vm4516_vm3, %v4508_v39, %v4524_v58  ;;  %v4342_v16 = vmul.f32 0.5, %v8253_v5 }
0x1646   : > { %v4533_v43 = vsel %vm4517_vm14, %v4509_v4, %v4525_v44  ;;  %v4510_v26 = vsub.f32 1.0, %v4502_v31  ;;  %v4531_v59 = vsel %vm4515_vm2, %v4507_v55, %v4523_v7  ;;  %v4546_v10 = vmul.f32 %v4538_v52, %v4338_v54 }
0x1647   : > { %v6693_v23 = vpop.eup %6692  ;;  %v4541_v33 = vadd.f32 1.0, %v4533_v43  ;;  %v4535_v45 = vsel %vm4519_vm4, %v4511_v57, %v4527_v63  ;;  %v4545_v28 = vmul.f32 %v4537_v15, %v4337_v20  ;;  %v4540_v50 = vadd.f32 1.0, %v4532_v25  ;;  %v6572_v15 = vld [vmem:[%s8445_s3 + $0x428] sm:$0xff]  }
0x1648   : > { %v4526_v8 = vsub.f32 0.0, %v4510_v26  ;;  %v4504_v18 = vmul.f32 %v6693_v23, %v4464_v27  ;;  %v4543_v13 = vadd.f32 1.0, %v4535_v45  ;;  %v4539_v24 = vadd.f32 1.0, %v4531_v59  ;;  %v6574_v45 = vld [vmem:[%s8445_s3 + $0x418] sm:$0xff]   ;;  %v6576_v25 = vld [vmem:[%s8445_s3 + $0x408] sm:$0xff]   ;;  %v6581_v59 = vld [vmem:[%s8445_s3 + $0x460] sm:$0xff]  }
0x1649   : > { %v4549_v19 = vmul.f32 %v4541_v33, %v4341_v36  ;;  %v4343_v34 = vmul.f32 0.5, %v8251_v37  ;;  %v4340_v14 = vmul.f32 0.5, %v8234_v22  ;;  %v4339_v61 = vmul.f32 0.5, %v8224_v38  ;;  %v4621_v38 = vld [vmem:[%s8448_s6 + $0x46] ss:$0 sm:$0xff]  ;;  %v6580_v20 = vld [vmem:[%s8445_s3 + $0x468] sm:$0xff]  }
0x164a   : > { %v4534_v49 = vsel %vm4518_vm6, %v4510_v26, %v4526_v8  ;;  %v4512_v51 = vsub.f32 1.0, %v4504_v18  ;;  %v6573_v36 = vld [vmem:[%s8445_s3 + $0x420] sm:$0xff]  }
0x164b   : > { %v4542_v1 = vadd.f32 1.0, %v4534_v49  ;;  %v4553_v21 = vpack.c.bf16 %v4549_v19, %v4545_v28  ;;  %v4551_v62 = vmul.f32 %v4543_v13, %v4343_v34  ;;  %v4548_v32 = vmul.f32 %v4540_v50, %v4340_v14  ;;  %v6575_v49 = vld [vmem:[%s8445_s3 + $0x410] sm:$0xff]   ;;  %v6582_v19 = vld [vmem:[%s8445_s3 + $0x458] sm:$0xff]  }
0x164c   : > { %v4528_v3 = vsub.f32 0.0, %v4512_v51  ;;  %v4547_v4 = vmul.f32 %v4539_v24, %v4339_v61 }
0x164d   : > { %v4550_v41 = vmul.f32 %v4542_v1, %v4342_v16  ;;  %v6577_v16 = vld [vmem:[%s8445_s3 + $0x400] sm:$0xff]   ;;  %v6578_v1 = vld [vmem:[%s8445_s3 + $0x478] sm:$0xff]  }
0x164e   : > { %v4536_v5 = vsel %vm4520_vm7, %v4512_v51, %v4528_v3  ;;  %v4555_v6 = vpack.c.bf16 %v4551_v62, %v4547_v4  ;;  %v6579_v51 = vld [vmem:[%s8445_s3 + $0x470] sm:$0xff]   ;;  %v6584_v4 = vld [vmem:[%s8445_s3 + $0x448] sm:$0xff]  }
0x164f   : > { %v4554_v9 = vpack.c.bf16 %v4550_v41, %v4546_v10  ;;  %v4544_v47 = vadd.f32 1.0, %v4536_v5  ;;  %v4898_v5 = vld [vmem:[%s8448_s6 + $0x47] ss:$0 sm:$0xff] }
0x1651   : > { %4846 = vmatprep.mubr.bf16.mxu1 %v4554_v9  ;;  %v4552_v17 = vmul.f32 %v4544_v47, %v4344_v48  ;;  %v4899_v48 = vld [vmem:[%s8448_s6 + $0x60] ss:$0 sm:$0xff] }
0x1652   : > { %4847 = vmatmul.mubr.bf16.vlgmr.msra.gmra.mxu1 %v4553_v21 }
0x1653   : > { %6165 = vmatprep.mubr.msk.bf16.mxu1 %vm6709_vm0, %v6708_v2  ;;  %v4556_v37 = vpack.c.bf16 %v4552_v17, %v4548_v32  ;;  %v6583_v17 = vld [vmem:[%s8445_s3 + $0x450] sm:$0xff]  }
0x1655   : > { %4887 = vmatprep.mubr.bf16.mxu0 %v4556_v37  ;;  %v6585_v37 = vld [vmem:[%s8445_s3 + $0x440] sm:$0xff]  }
0x1656   : > { %4888 = vmatmul.mubr.bf16.vlgmr.msra.gmra.mxu0 %v4555_v6  ;;  %v4945_v6 = vld [vmem:[%s8448_s6 + $0x3] ss:$0 sm:$0xff] }
0x1657   : > { %6185 = vmatprep.mubr.msk.bf16.mxu0 %vm6709_vm0, %v6708_v2  ;;  %6170 = vmatpush3.bf16.msra.mxu0 %v6578_v1 }
0x1658   : > { %6171 = vmatprep.subr.bf16.mxu0 %v6708_v2 }
0x165b   : > { %6172 = vmatpush3.bf16.msra.mxu0 %v6579_v51 }
0x165c   : > { %6173 = vmatprep.subr.bf16.mxu0 %v6708_v2 }
0x165f   : > { %6174 = vmatpush3.bf16.msra.mxu0 %v6580_v20 }
0x1660   : > { %6175 = vmatprep.subr.bf16.mxu0 %v6708_v2 }
0x1663   : > { %6176 = vmatpush3.bf16.msra.mxu0 %v6581_v59 }
0x1664   : > { %6177 = vmatprep.subr.bf16.mxu0 %v6708_v2 }
0x1667   : > { %6178 = vmatpush3.bf16.msra.mxu0 %v6582_v19 }
0x1668   : > { %6179 = vmatprep.subr.bf16.mxu0 %v6708_v2 }
0x166b   : > { %6180 = vmatpush3.bf16.msra.mxu0 %v6583_v17 }
0x166c   : > { %6181 = vmatprep.subr.bf16.mxu0 %v6708_v2 }
0x166f   : > { %6182 = vmatpush3.bf16.msra.mxu0 %v6584_v4 }
0x1670   : > { %6183 = vmatprep.subr.bf16.mxu0 %v6708_v2 }
0x1673   : > { %6184 = vmatpush3.bf16.msra.mxu0 %v6585_v37 }
0x1712   : > { %v5927_v22 = vpop.f32.mrf.mxu1 }
0x1714   : > { %v5928_v0 = vpop.f32.mrf.mxu1 }
0x1715   : > { %v5929_v11 = vadd.f32 %v5928_v0, %v5927_v22 }
0x1716   : > { %v5930_v40 = vpop.f32.mrf.mxu1  ;;  %v5949_v46 = vpop.f32.mrf.mxu0 }
0x1717   : > { %v4849_v30 = vadd.f32 %v5929_v11, %v4621_v38 }
0x1718   : > { %v5931_v53 = vpop.f32.mrf.mxu1  ;;  %v5950_v39 = vpop.f32.mrf.mxu0 }
0x1719   : > { %v5932_v44 = vadd.f32 %v5931_v53, %v5930_v40  ;;  %v5951_v29 = vadd.f32 %v5950_v39, %v5949_v46 }
0x171a   : > { %v5952_v55 = vpop.f32.mrf.mxu0 }
0x171b   : > { %v4890_v57 = vadd.f32 %v5951_v29, %v4849_v30  ;;  %v4852_v31 = vadd.f32 %v5932_v44, %v4621_v38 }
0x171c   : > { %v5953_v43 = vpop.f32.mrf.mxu0 }
0x171d   : > { %v5954_v42 = vadd.f32 %v5953_v43, %v5952_v55  ;;  %v4896_v56 = vadd.f32 %v4890_v57, %v8107_v12  ;;  %v6570_v12 = vld [vmem:[%s8445_s3 + $0x438] sm:$0xff]  }
0x171e   : > { %6150 = vmatpush3.bf16.msra.mxu1 %v6570_v12 }
0x171f   : > { %v4893_v63 = vadd.f32 %v5954_v42, %v4852_v31  ;;  %4900 = vadd.xlane.f32.xlu1 %v4896_v56  ;;  %6151 = vmatprep.subr.bf16.mxu1 %v6708_v2 }
0x1721   : > { %v4897_v26 = vadd.f32 %v4893_v63, %v8109_v35  ;;  %v6571_v35 = vld [vmem:[%s8445_s3 + $0x430] sm:$0xff]  }
0x1722   : > { %6152 = vmatpush3.bf16.msra.mxu1 %v6571_v35 }
0x1723   : > { %v4902_v60 = vsel %vm2419_vm5, %v4897_v26, 0.0  ;;  %6153 = vmatprep.subr.bf16.mxu1 %v6708_v2 }
0x1724   : > { %4903 = vadd.xlane.f32.xlu0 %v4902_v60 }
0x1726   : > { %6154 = vmatpush3.bf16.msra.mxu1 %v6572_v15 }
0x1727   : > { %6155 = vmatprep.subr.bf16.mxu1 %v6708_v2 }
0x172a   : > { %6156 = vmatpush3.bf16.msra.mxu1 %v6573_v36 }
0x172b   : > { %6157 = vmatprep.subr.bf16.mxu1 %v6708_v2 }
0x172e   : > { %6158 = vmatpush3.bf16.msra.mxu1 %v6574_v45 }
0x172f   : > { %6159 = vmatprep.subr.bf16.mxu1 %v6708_v2 }
0x1732   : > { %6160 = vmatpush3.bf16.msra.mxu1 %v6575_v49 }
0x1733   : > { %6161 = vmatprep.subr.bf16.mxu1 %v6708_v2 }
0x1736   : > { %6162 = vmatpush3.bf16.msra.mxu1 %v6576_v25 }
0x1737   : > { %6163 = vmatprep.subr.bf16.mxu1 %v6708_v2  ;;  %v5054_v2 = vld [vmem:[%s8448_s6 + $0x4] ss:$0 sm:$0xff] }
0x173a   : > { %6164 = vmatpush3.bf16.msra.mxu1 %v6577_v16 }
0x17a8   : > { %v4901_v54 = vpop.xlane.xlu1 %4900 }
0x17a9   : > { %v4905_v58 = vmul.f32 0.0078125, %v4901_v54 }
0x17ab   : > { %v4907_v27 = vsub.f32 %v4896_v56, %v4905_v58 }
0x17ad   : > { %v4904_v23 = vpop.xlane.xlu0 %4903  ;;  %v4909_v7 = vmul.f32 %v4907_v27, %v4907_v27 }
0x17ae   : > { %v4906_v33 = vmul.f32 0.0078125, %v4904_v23 }
0x17af   : > { %4911 = vadd.xlane.f32.xlu0 %v4909_v7 }
0x17b0   : > { %v4908_v8 = vsub.f32 %v4897_v26, %v4906_v33 }
0x17b2   : > { %v4910_v52 = vmul.f32 %v4908_v8, %v4908_v8 }
0x17b4   : > { %v4913_v18 = vsel %vm2419_vm5, %v4910_v52, 0.0 }
0x17b5   : > { %4914 = vadd.xlane.f32.xlu0 %v4913_v18 }
0x1838   : > { %v4912_v10 = vpop.xlane.xlu0 %4911 }
0x1839   : > { %v4916_v13 = vmul.f32 0.0078125, %v4912_v10 }
0x183b   : > { %v4918_v41 = vadd.f32 1e-12, %v4916_v13 }
0x183d   : > { %6694 = vrsqrt.f32 %v4918_v41 }
0x183e   : > { %v4915_v3 = vpop.xlane.xlu0 %4914 }
0x183f   : > { %v4917_v28 = vmul.f32 0.0078125, %v4915_v3 }
0x1841   : > { %v4919_v50 = vadd.f32 1e-12, %v4917_v28 }
0x1843   : > { %6696 = vrsqrt.f32 %v4919_v50 }
0x184a   : > { %v6695_v24 = vpop.eup %6694 }
0x184b   : > { %v4922_v34 = vmul.f32 %v6695_v24, %v4907_v27 }
0x184d   : > { %v4924_v21 = vmul.f32 %v4922_v34, %v4898_v5 }
0x184f   : > { %v4926_v61 = vadd.f32 %v4924_v21, %v4899_v48 }
0x1850   : > { %v6697_v9 = vpop.eup %6696 }
0x1851   : > { %v4923_v14 = vmul.f32 %v6697_v9, %v4908_v8 }
0x1853   : > { %v4925_v47 = vmul.f32 %v4923_v14, %v4898_v5 }
0x1855   : > { %v4927_v62 = vadd.f32 %v4925_v47, %v4899_v48 }
0x1857   : > { %v4928_v32 = vpack.c.bf16 %v4927_v62, %v4926_v61 }
0x1859   : > { %6166 = vmatmul.mubr.bf16.vlgmr.msra.gmra.mxu1 %v4928_v32 }
0x1919   : > { %v5028_v22 = vpop.f32.mrf.mxu1 }
0x191a   : > { %v5029_v38 = vadd.f32 %v5028_v22, %v4945_v6 }
0x191b   : > { %v6167_v0 = vpop.f32.mrf.mxu1 }
0x191c   : > { %v5035_v30 = vmax.f32 %v5029_v38, 0.0 }
0x191d   : > { %v5031_v11 = vpop.f32.mrf.mxu1 }
0x191e   : > { %v5032_v40 = vadd.f32 %v5031_v11, %v4945_v6 }
0x191f   : > { %v6168_v46 = vpop.f32.mrf.mxu1 }
0x1920   : > { %v5036_v53 = vmax.f32 %v5032_v40, 0.0 }
0x1922   : > { %v5037_v39 = vpack.c.bf16 %v5036_v53, %v5035_v30 }
0x1924   : > { %6186 = vmatmul.mubr.bf16.vlgmr.msra.gmra.mxu0 %v5037_v39 }
0x19e4   : > { %v5137_v44 = vpop.f32.mrf.mxu0 }
0x19e5   : > { %v5138_v29 = vadd.f32 %v5137_v44, %v5054_v2 }
0x19e6   : > { %v6187_v55 = vpop.f32.mrf.mxu0 }
0x19e7   : > { %5144 = vst [vmem:[%s298_s12] sm:$0xff] %v5138_v29 }
0x19e8   : > { %v5140_v57 = vpop.f32.mrf.mxu0 }
0x19e9   : > { %v5141_v31 = vadd.f32 %v5140_v57, %v5054_v2 }
0x19ea   : > { %v6188_v43 = vpop.f32.mrf.mxu0 }
0x19eb   : > { %5145 = vst [vmem:[%s298_s12 + $0x8] sm:$0xf] %v5141_v31 }
0x19ec PF: > { %s17_s24 = sadd.s32 1, %s6706_s24  }
0x19ed   : > { %p14_p4 = scmp.ge.s32.totalorder %s17_s24, 4  }
0x19ef   :  { %16 = sbr.rel (!%p14_p4) target bundleno = 1 (0x1), region = 85 }

</bundles_post_ra>
